<compile_context>
chip_gen: v5e
topology: v5e:2x2
jax: 0.10.0
libtpu: 0.0.40
codegen_flags: <defaults>
</compile_context>

<pallas_src>
import functools
import math

import jax
import jax.numpy as jnp
from jax.experimental import pallas as pl
from jax.experimental.pallas import tpu as pltpu


# ---------------------------------------------------------------------------
# Fused whole-block kernel
# ---------------------------------------------------------------------------
def _make_block_kernel(*, n, h, w, cp, cop, n_plain):
    """Builds the fused kernel for `n_plain` plain layers followed by one upsample layer."""
    nh, wc = n * h, w * cp
    wide = 2 * w * cop                       # lanes of one (even or odd) output row slab
    inv_m = 1.0 / float(n * h * w)           # BatchNorm reduces over (N, H, W)

    def kernel(*refs):
        x_ref, proj_ref = refs[0], refs[1]
        o_ref, zp_ref = refs[-2], refs[-1]
        prm = refs[2:-2]

        proj = proj_ref[...]                 # (W*Cp, W*Cp) tiled-identity channel projection

        def bn_stats(v):
            # Per-channel batch mean / rstd in the wide (rows, W*Cp) layout.  The tiny
            # projection matmuls stay f32 / HIGHEST (errors are amplified by rsqrt).
            s = jnp.dot(jnp.sum(v, axis=0, keepdims=True), proj,
                        preferred_element_type=jnp.float32,
                        precision=jax.lax.Precision.HIGHEST)
            mean = s * inv_m
            d = v - mean
            sv = jnp.dot(jnp.sum(d * d, axis=0, keepdims=True), proj,
                         preferred_element_type=jnp.float32,
                         precision=jax.lax.Precision.HIGHEST)
            return mean, jax.lax.rsqrt(sv * inv_m + 1e-5)

        def bn_relu(v, mean, rstd, g_ref, b_ref):
            # BN folded into a single FMA + ReLU.
            scale = g_ref[...] * rstd
            shift = b_ref[...] - mean * scale
            return jnp.maximum(v * scale + shift, 0.0)

        def conv3(z, w_ref):
            # 3x3 / pad-1 conv as ONE bf16 MXU matmul: the three row-shifted slabs are
            # concatenated along K against the stacked banded weight matrix.
            zp_ref[:, 1:h + 1, :] = z.reshape(n, h, wc)
            up = zp_ref[:, 0:h, :].reshape(nh, wc)        # rows q-1 (zero at q=0)
            dn = zp_ref[:, 2:h + 2, :].reshape(nh, wc)    # rows q+1 (zero at q=h-1)
            lhs = jnp.concatenate([up, z, dn], axis=1).astype(jnp.bfloat16)
            return jnp.dot(lhs, w_ref[...], preferred_element_type=jnp.float32)

        # Zero the bordered scratch ONCE; rows 0 / h+1 stay zero for every conv below.
        zp_ref[...] = jnp.zeros_like(zp_ref)
        xf = x_ref[...]                                   # (N*H, W*Cp) f32

        i = 0
        for _ in range(n_plain):                          # plain residual layers
            g1, b1, w1, g2, b2, w2 = prm[i:i + 6]
            i += 6
            m1, r1 = bn_stats(xf)
            z1 = bn_relu(xf, m1, r1, g1, b1)
            hmid = conv3(z1, w1)
            m2, r2 = bn_stats(hmid)
            z2 = bn_relu(hmid, m2, r2, g2, b2)
            xf = conv3(z2, w2) + xf                       # residual add fused, stays f32

        # Final (upsampling) layer.
        g1, b1, w1, g2, b2, gu, bu, we, wo = prm[i:i + 9]
        m1, r1 = bn_stats(xf)
        z1 = bn_relu(xf, m1, r1, g1, b1)
        hmid = conv3(z1, w1)
        m2, r2 = bn_stats(hmid)
        z2 = bn_relu(hmid, m2, r2, g2, b2)
        # Identity branch BN sees the same input -> same batch stats, different affine.
        zu = bn_relu(xf, m1, r1, gu, bu)

        # ConvTranspose2d(3x3, s=2, p=1, op=1) + ConvTranspose2d(1x1, s=2, op=1)
        # identity via the sub-pixel decomposition: two 256x256 bf16 matmuls with the
        # output-column interleave baked into the weight matrices.
        zp_ref[:, 1:h + 1, :] = z2.reshape(n, h, wc)
        z2_dn = zp_ref[:, 2:h + 2, :].reshape(nh, wc)     # z2 rows shifted by +1 (zero tail)

        lhs_e = jnp.concatenate([z2, zu], axis=1).astype(jnp.bfloat16)
        lhs_o = jnp.concatenate([z2, z2_dn], axis=1).astype(jnp.bfloat16)
        even = jnp.dot(lhs_e, we[...], preferred_element_type=jnp.float32)   # output rows 2q
        odd = jnp.dot(lhs_o, wo[...], preferred_element_type=jnp.float32)    # output rows 2q+1

        # Lane-dense, unmasked stores (512 lanes).
        o_ref[:, :wide] = even
        o_ref[:, wide:] = odd

    return kernel


# ---------------------------------------------------------------------------
# Wrapper: one pallas_call for the whole block
# ---------------------------------------------------------------------------
def decoder_residual_block(x_nchw, proj, flat_weights, *, cp, cop, out_c, n_plain):
    n, c, h, w = x_nchw.shape
    wc = w * cp
    wide = 2 * w * cop

    # Entry: NCHW -> channel-padded, lane-dense "wide" (N*H, W*Cp) layout.
    x = jnp.transpose(x_nchw, (0, 2, 3, 1)).astype(jnp.float32)
    x = jnp.pad(x, ((0, 0), (0, 0), (0, 0), (0, cp - c)))
    x = x.reshape(n * h, wc)

    kernel = _make_block_kernel(n=n, h=h, w=w, cp=cp, cop=cop, n_plain=n_plain)
    out = pl.pallas_call(
        kernel,
        out_shape=jax.ShapeDtypeStruct((n * h, 2 * wide), jnp.float32),
        scratch_shapes=[pltpu.VMEM((n, h + 2, wc), jnp.float32)],
    )(x, proj, *flat_weights)

    # Exit: the single unavoidable transpose back to NCHW; the sub-pixel row/column
    # de-interleave and the channel un-padding are folded into it.
    out = out.reshape(n, h, 2, 2 * w, cop)                # [n, q, r, 2m+s, co]
    out = jnp.transpose(out, (0, 4, 1, 2, 3)).reshape(n, cop, 2 * h, 2 * w)
    return out[:, :out_c]


# ---------------------------------------------------------------------------
# Host-side weight preparation (done once)
# ---------------------------------------------------------------------------
def _pad_channels(c, w_sp):
    """Smallest Cp >= c with (w_sp * Cp) % 128 == 0 (lane-dense minor dim)."""
    unit = 128 // math.gcd(w_sp, 128)
    return ((c + unit - 1) // unit) * unit


def _tile_bn(v, cp, w_sp):
    c = v.shape[0]
    vp = jnp.zeros((cp,), jnp.float32).at[:c].set(v.astype(jnp.float32))
    return jnp.tile(vp, (w_sp,)).reshape(1, w_sp * cp)


def _conv3_stacked(w_oihw, w_sp, cpi, cpo):
    """Conv2d(3x3,s=1,p=1) -> one stacked (3*W*Cpi, W*Cpo) bf16 banded matrix."""
    cout, cin = w_oihw.shape[0], w_oihw.shape[1]
    w_hwio = jnp.transpose(w_oihw, (2, 3, 1, 0)).astype(jnp.float32)   # (kh, kw, cin, cout)
    mats = []
    for kh in range(3):
        m = jnp.zeros((w_sp * cpi, w_sp * cpo), jnp.float32)
        for mo in range(w_sp):
            for kw in range(3):
                mi = mo + kw - 1
                if 0 <= mi < w_sp:
                    m = m.at[mi * cpi:mi * cpi + cin,
                             mo * cpo:mo * cpo + cout].set(w_hwio[kh, kw])
        mats.append(m)
    return jnp.concatenate(mats, axis=0).astype(jnp.bfloat16)


def _convT3_col_mat(wt_a, w_sp, cpi, cpo):
    """Column-interleaved tap matrix for one fixed row tap `a` of the 3x3 convT.

    Output column 2*mo:   input col mo  with tap b=1.
    Output column 2*mo+1: input col mo  with tap b=2  +  input col mo+1 with tap b=0."""
    cin, cout = wt_a.shape[1], wt_a.shape[2]
    m = jnp.zeros((w_sp * cpi, 2 * w_sp * cpo), jnp.float32)
    for mo in range(w_sp):
        m = m.at[mo * cpi:mo * cpi + cin,
                 (2 * mo) * cpo:(2 * mo) * cpo + cout].set(wt_a[1])
        m = m.at[mo * cpi:mo * cpi + cin,
                 (2 * mo + 1) * cpo:(2 * mo + 1) * cpo + cout].set(wt_a[2])
        if mo + 1 < w_sp:
            m = m.at[(mo + 1) * cpi:(mo + 1) * cpi + cin,
                     (2 * mo + 1) * cpo:(2 * mo + 1) * cpo + cout].set(wt_a[0])
    return m


def _convT_phase_mats(wt, wtu, w_sp, cpi, cpo):
    """ConvTranspose2d(3x3,s=2,p=1,op=1) + ConvTranspose2d(1x1,s=2,op=1) identity.

    Even output rows 2q:   z[q] with row tap a=1                 (+ identity at even cols).
    Odd  output rows 2q+1: z[q] with a=2  +  z[q+1] with a=0.
    Returns (we, wo), each (2*W*Cpi, 2*W*Cpo) bf16, to be used against
    concat([z2, zu]) and concat([z2, z2_shifted_down]) respectively."""
    wt_abio = jnp.transpose(wt, (2, 3, 0, 1)).astype(jnp.float32)      # (a, b, cin, cout)
    cin, cout = wt.shape[0], wt.shape[1]
    m_even = _convT3_col_mat(wt_abio[1], w_sp, cpi, cpo)
    m_odd_q = _convT3_col_mat(wt_abio[2], w_sp, cpi, cpo)
    m_odd_q1 = _convT3_col_mat(wt_abio[0], w_sp, cpi, cpo)
    mu = jnp.zeros((w_sp * cpi, 2 * w_sp * cpo), jnp.float32)
    wu = wtu[:, :, 0, 0].astype(jnp.float32)
    for mo in range(w_sp):                                             # 1x1/s=2: even/even only
        mu = mu.at[mo * cpi:mo * cpi + cin,
                   (2 * mo) * cpo:(2 * mo) * cpo + cout].set(wu)
    we = jnp.concatenate([m_even, mu], axis=0).astype(jnp.bfloat16)
    wo = jnp.concatenate([m_odd_q, m_odd_q1], axis=0).astype(jnp.bfloat16)
    return we, wo


def prepare_params(raw_params, w_sp):
    hidden = int(raw_params[0]["g1"].shape[0])
    out_c = int(raw_params[-1]["wt2"].shape[1])
    cp = _pad_channels(hidden, w_sp)
    cop = _pad_channels(out_c, w_sp)
    flat = []
    for rp in raw_params[:-1]:
        flat += [_tile_bn(rp["g1"], cp, w_sp), _tile_bn(rp["b1"], cp, w_sp),
                 _conv3_stacked(rp["w1"], w_sp, cp, cp),
                 _tile_bn(rp["g2"], cp, w_sp), _tile_bn(rp["b2"], cp, w_sp),
                 _conv3_stacked(rp["w2"], w_sp, cp, cp)]
    rp = raw_params[-1]
    we, wo = _convT_phase_mats(rp["wt2"], rp["wtu"], w_sp, cp, cop)
    flat += [_tile_bn(rp["g1"], cp, w_sp), _tile_bn(rp["b1"], cp, w_sp),
             _conv3_stacked(rp["w1"], w_sp, cp, cp),
             _tile_bn(rp["g2"], cp, w_sp), _tile_bn(rp["b2"], cp, w_sp),
             _tile_bn(rp["gu"], cp, w_sp), _tile_bn(rp["bu"], cp, w_sp),
             we, wo]
    proj = jnp.tile(jnp.eye(cp, dtype=jnp.float32), (w_sp, w_sp))
    return {"flat": flat, "proj": proj, "cp": cp, "cop": cop,
            "out_c": out_c, "n_plain": len(raw_params) - 1}


def init_raw_params(key, hidden_channels, output_channels, layers):
    """PyTorch-shaped parameters (Conv2d OIHW, ConvTranspose2d (in,out,kh,kw), BN affine).
    All convolutions in the module use bias=False, so no bias terms exist."""
    params = []
    for i in range(layers):
        upsample = (i == layers - 1)
        oc = output_channels if upsample else hidden_channels
        key, *ks = jax.random.split(key, 10)
        c = hidden_channels
        p = {"upsample": upsample}
        p["g1"] = 1.0 + 0.1 * jax.random.normal(ks[0], (c,), jnp.float32)
        p["b1"] = 0.1 * jax.random.normal(ks[1], (c,), jnp.float32)
        p["w1"] = 0.1 * jax.random.normal(ks[2], (c, c, 3, 3), jnp.float32)
        p["g2"] = 1.0 + 0.1 * jax.random.normal(ks[3], (c,), jnp.float32)
        p["b2"] = 0.1 * jax.random.normal(ks[4], (c,), jnp.float32)
        if upsample:
            p["wt2"] = 0.1 * jax.random.normal(ks[5], (c, oc, 3, 3), jnp.float32)
            p["gu"] = 1.0 + 0.1 * jax.random.normal(ks[6], (c,), jnp.float32)
            p["bu"] = 0.1 * jax.random.normal(ks[7], (c,), jnp.float32)
            p["wtu"] = 0.1 * jax.random.normal(ks[8], (c, oc, 1, 1), jnp.float32)
        else:
            p["w2"] = 0.1 * jax.random.normal(ks[5], (oc, c, 3, 3), jnp.float32)
        params.append(p)
    return params


# ---------------------------------------------------------------------------
# Pure-JAX (XLA) reference of the same module, used only for the correctness check
# ---------------------------------------------------------------------------
def _ref_bn_relu(x, g, b):
    mean = jnp.mean(x, axis=(0, 2, 3), keepdims=True)
    var = jnp.mean((x - mean) ** 2, axis=(0, 2, 3), keepdims=True)
    xn = (x - mean) * jax.lax.rsqrt(var + 1e-5)
    return jnp.maximum(xn * g.reshape(1, -1, 1, 1) + b.reshape(1, -1, 1, 1), 0.0)


def _ref_conv3(x, w_oihw):
    return jax.lax.conv_general_dilated(
        x, w_oihw, window_strides=(1, 1), padding=((1, 1), (1, 1)),
        dimension_numbers=("NCHW", "OIHW", "NCHW"),
        precision=jax.lax.Precision.HIGHEST)


def _ref_convT(x, wt, k, stride, pad, outpad):
    w = jnp.transpose(jnp.flip(wt, (2, 3)), (1, 0, 2, 3))
    lo = k - 1 - pad
    hi = k - 1 - pad + outpad
    return jax.lax.conv_general_dilated(
        x, w, window_strides=(1, 1), padding=((lo, hi), (lo, hi)),
        lhs_dilation=(stride, stride),
        dimension_numbers=("NCHW", "OIHW", "NCHW"),
        precision=jax.lax.Precision.HIGHEST)


def _ref_block(x, raw_params):
    for rp in raw_params:
        identity = x
        x1 = _ref_conv3(_ref_bn_relu(x, rp["g1"], rp["b1"]), rp["w1"])
        z2 = _ref_bn_relu(x1, rp["g2"], rp["b2"])
        if rp["upsample"]:
            main = _ref_convT(z2, rp["wt2"], 3, 2, 1, 1)
            ident = _ref_convT(_ref_bn_relu(identity, rp["gu"], rp["bu"]),
                               rp["wtu"], 1, 2, 0, 1)
            x = main + ident
        else:
            x = _ref_conv3(z2, rp["w2"]) + identity
    return x


# ---------------------------------------------------------------------------
if __name__ == "__main__":
    hidden_channels = 8
    output_channels = 8
    layers = 2
    N, H, W = 2, 8, 8

    key = jax.random.PRNGKey(0)
    key, pkey, xkey = jax.random.split(key, 3)
    raw_params = init_raw_params(pkey, hidden_channels, output_channels, layers)
    prep = prepare_params(raw_params, W)

    # PyTorch-style NCHW input
    x = jax.random.normal(xkey, (N, hidden_channels, H, W), jnp.float32)

    fwd = jax.jit(functools.partial(
        decoder_residual_block,
        cp=prep["cp"], cop=prep["cop"], out_c=prep["out_c"], n_plain=prep["n_plain"]))
    y = jax.block_until_ready(fwd(x, prep["proj"], prep["flat"]))

    # Final layer upsamples 2x spatially: (N, output_channels, 2H, 2W)
    assert y.shape == (N, output_channels, 2 * H, 2 * W), y.shape
    assert bool(jnp.all(jnp.isfinite(y)))

    # Numerical cross-check against the pure-JAX (f32/HIGHEST) reference.  The kernel
    # runs its conv matmuls through the MXU in bf16 (single pass) with f32 accumulation,
    # so the expected max abs error is O(1e-2); 5e-2 leaves >3x margin.
    y_ref = _ref_block(x, raw_params)
    max_err = float(jnp.max(jnp.abs(y - y_ref)))
    assert max_err < 5e-2, f"max abs err {max_err}"

    print("KERNEL_OK")
</pallas_src>

<mosaic_0001>
module attributes {stable_mosaic.version = 11 : i64} {
  func.func @kernel(%arg0: memref<16x128xf32, #tpu.memory_space<vmem>>, %arg1: memref<128x128xf32, #tpu.memory_space<vmem>>, %arg2: memref<1x128xf32, #tpu.memory_space<vmem>>, %arg3: memref<1x128xf32, #tpu.memory_space<vmem>>, %arg4: memref<384x128xbf16, #tpu.memory_space<vmem>>, %arg5: memref<1x128xf32, #tpu.memory_space<vmem>>, %arg6: memref<1x128xf32, #tpu.memory_space<vmem>>, %arg7: memref<384x128xbf16, #tpu.memory_space<vmem>>, %arg8: memref<1x128xf32, #tpu.memory_space<vmem>>, %arg9: memref<1x128xf32, #tpu.memory_space<vmem>>, %arg10: memref<384x128xbf16, #tpu.memory_space<vmem>>, %arg11: memref<1x128xf32, #tpu.memory_space<vmem>>, %arg12: memref<1x128xf32, #tpu.memory_space<vmem>>, %arg13: memref<1x128xf32, #tpu.memory_space<vmem>>, %arg14: memref<1x128xf32, #tpu.memory_space<vmem>>, %arg15: memref<256x256xbf16, #tpu.memory_space<vmem>>, %arg16: memref<256x256xbf16, #tpu.memory_space<vmem>>, %arg17: memref<16x512xf32, #tpu.memory_space<vmem>>, %arg18: memref<2x10x128xf32, #tpu.memory_space<vmem>>) attributes {dimension_semantics = [], scalar_prefetch = 0 : i64, scratch_operands = 1 : i64, tpu.core_type = #tpu.core_type<tc>} {
    %c0 = arith.constant 0 : index
    %c0_0 = arith.constant 0 : index
    %0 = vector.load %arg1[%c0, %c0_0] : memref<128x128xf32, #tpu.memory_space<vmem>>, vector<128x128xf32>
    %cst = arith.constant 0.000000e+00 : f32
    %1 = vector.broadcast %cst : f32 to vector<2x10x128xf32>
    %c0_1 = arith.constant 0 : index
    %c0_2 = arith.constant 0 : index
    %c0_3 = arith.constant 0 : index
    %2 = vector.load %arg18[%c0_1, %c0_2, %c0_3] : memref<2x10x128xf32, #tpu.memory_space<vmem>>, vector<2x10x128xf32>
    tpu.vector_store %arg18[%c0_1, %c0_2, %c0_3], %1 {strides = array<i32>} : memref<2x10x128xf32, #tpu.memory_space<vmem>>, vector<2x10x128xf32>,
    %c0_4 = arith.constant 0 : index
    %c0_5 = arith.constant 0 : index
    %3 = vector.load %arg0[%c0_4, %c0_5] : memref<16x128xf32, #tpu.memory_space<vmem>>, vector<16x128xf32>
    %cst_6 = arith.constant dense<0.000000e+00> : vector<128xf32>
    %4 = vector.multi_reduction <add>, %3, %cst_6 [0] : vector<16x128xf32> to vector<128xf32>
    %5 = vector.shape_cast %4 : vector<128xf32> to vector<1x128xf32>
    %cst_7 = arith.constant dense<0.000000e+00> : vector<1x128xf32>
    %6 = tpu.matmul %5, %0, %cst_7 {dimension_numbers = #tpu.dot_dimension_numbers<[1], [0], [0], [1], [0, 0, 1, 1], [], []>, precision = #tpu.contract_precision<fp32>} : vector<1x128xf32>, vector<128x128xf32>, vector<1x128xf32> -> vector<1x128xf32>
    %cst_8 = arith.constant 7.812500e-03 : f32
    %7 = vector.broadcast %cst_8 : f32 to vector<1x128xf32>
    %8 = arith.mulf %6, %7 : vector<1x128xf32>
    %9 = vector.broadcast %8 : vector<1x128xf32> to vector<16x128xf32>
    %10 = arith.subf %3, %9 : vector<16x128xf32>
    %11 = arith.mulf %10, %10 : vector<16x128xf32>
    %cst_9 = arith.constant dense<0.000000e+00> : vector<128xf32>
    %12 = vector.multi_reduction <add>, %11, %cst_9 [0] : vector<16x128xf32> to vector<128xf32>
    %13 = vector.shape_cast %12 : vector<128xf32> to vector<1x128xf32>
    %cst_10 = arith.constant dense<0.000000e+00> : vector<1x128xf32>
    %14 = tpu.matmul %13, %0, %cst_10 {dimension_numbers = #tpu.dot_dimension_numbers<[1], [0], [0], [1], [0, 0, 1, 1], [], []>, precision = #tpu.contract_precision<fp32>} : vector<1x128xf32>, vector<128x128xf32>, vector<1x128xf32> -> vector<1x128xf32>
    %cst_11 = arith.constant 7.812500e-03 : f32
    %15 = vector.broadcast %cst_11 : f32 to vector<1x128xf32>
    %16 = arith.mulf %14, %15 : vector<1x128xf32>
    %cst_12 = arith.constant 9.99999974E-6 : f32
    %17 = vector.broadcast %cst_12 : f32 to vector<1x128xf32>
    %18 = arith.addf %16, %17 : vector<1x128xf32>
    %19 = math.rsqrt %18 : vector<1x128xf32>
    %c0_13 = arith.constant 0 : index
    %c0_14 = arith.constant 0 : index
    %20 = vector.load %arg2[%c0_13, %c0_14] : memref<1x128xf32, #tpu.memory_space<vmem>>, vector<1x128xf32>
    %21 = arith.mulf %20, %19 : vector<1x128xf32>
    %c0_15 = arith.constant 0 : index
    %c0_16 = arith.constant 0 : index
    %22 = vector.load %arg3[%c0_15, %c0_16] : memref<1x128xf32, #tpu.memory_space<vmem>>, vector<1x128xf32>
    %23 = arith.mulf %8, %21 : vector<1x128xf32>
    %24 = arith.subf %22, %23 : vector<1x128xf32>
    %25 = vector.broadcast %21 : vector<1x128xf32> to vector<16x128xf32>
    %26 = arith.mulf %3, %25 : vector<16x128xf32>
    %27 = vector.broadcast %24 : vector<1x128xf32> to vector<16x128xf32>
    %28 = arith.addf %26, %27 : vector<16x128xf32>
    %cst_17 = arith.constant 0.000000e+00 : f32
    %29 = vector.broadcast %cst_17 : f32 to vector<16x128xf32>
    %30 = arith.maximumf %28, %29 : vector<16x128xf32>
    %31 = vector.shape_cast %30 : vector<16x128xf32> to vector<2x8x128xf32>
    %c0_18 = arith.constant 0 : index
    %c1 = arith.constant 1 : index
    %c0_19 = arith.constant 0 : index
    %32 = vector.load %arg18[%c0_18, %c1, %c0_19] : memref<2x10x128xf32, #tpu.memory_space<vmem>>, vector<2x8x128xf32>
    tpu.vector_store %arg18[%c0_18, %c1, %c0_19], %31 {strides = array<i32>} : memref<2x10x128xf32, #tpu.memory_space<vmem>>, vector<2x8x128xf32>,
    %c0_20 = arith.constant 0 : index
    %c0_21 = arith.constant 0 : index
    %c0_22 = arith.constant 0 : index
    %33 = vector.load %arg18[%c0_20, %c0_21, %c0_22] : memref<2x10x128xf32, #tpu.memory_space<vmem>>, vector<2x8x128xf32>
    %34 = vector.shape_cast %33 : vector<2x8x128xf32> to vector<16x128xf32>
    %c0_23 = arith.constant 0 : index
    %c2 = arith.constant 2 : index
    %c0_24 = arith.constant 0 : index
    %35 = vector.load %arg18[%c0_23, %c2, %c0_24] : memref<2x10x128xf32, #tpu.memory_space<vmem>>, vector<2x8x128xf32>
    %36 = vector.shape_cast %35 : vector<2x8x128xf32> to vector<16x128xf32>
    %37 = tpu.concatenate %34, %30, %36 in 1 : vector<16x128xf32>, vector<16x128xf32>, vector<16x128xf32> -> vector<16x384xf32>
    %38 = arith.truncf %37 : vector<16x384xf32> to vector<16x384xbf16>
    %c0_25 = arith.constant 0 : index
    %c0_26 = arith.constant 0 : index
    %39 = vector.load %arg4[%c0_25, %c0_26] : memref<384x128xbf16, #tpu.memory_space<vmem>>, vector<384x128xbf16>
    %cst_27 = arith.constant dense<0.000000e+00> : vector<16x128xf32>
    %40 = tpu.matmul %38, %39, %cst_27 {dimension_numbers = #tpu.dot_dimension_numbers<[1], [0], [0], [1], [0, 0, 1, 1], [], []>} : vector<16x384xbf16>, vector<384x128xbf16>, vector<16x128xf32> -> vector<16x128xf32>
    %cst_28 = arith.constant dense<0.000000e+00> : vector<128xf32>
    %41 = vector.multi_reduction <add>, %40, %cst_28 [0] : vector<16x128xf32> to vector<128xf32>
    %42 = vector.shape_cast %41 : vector<128xf32> to vector<1x128xf32>
    %cst_29 = arith.constant dense<0.000000e+00> : vector<1x128xf32>
    %43 = tpu.matmul %42, %0, %cst_29 {dimension_numbers = #tpu.dot_dimension_numbers<[1], [0], [0], [1], [0, 0, 1, 1], [], []>, precision = #tpu.contract_precision<fp32>} : vector<1x128xf32>, vector<128x128xf32>, vector<1x128xf32> -> vector<1x128xf32>
    %cst_30 = arith.constant 7.812500e-03 : f32
    %44 = vector.broadcast %cst_30 : f32 to vector<1x128xf32>
    %45 = arith.mulf %43, %44 : vector<1x128xf32>
    %46 = vector.broadcast %45 : vector<1x128xf32> to vector<16x128xf32>
    %47 = arith.subf %40, %46 : vector<16x128xf32>
    %48 = arith.mulf %47, %47 : vector<16x128xf32>
    %cst_31 = arith.constant dense<0.000000e+00> : vector<128xf32>
    %49 = vector.multi_reduction <add>, %48, %cst_31 [0] : vector<16x128xf32> to vector<128xf32>
    %50 = vector.shape_cast %49 : vector<128xf32> to vector<1x128xf32>
    %cst_32 = arith.constant dense<0.000000e+00> : vector<1x128xf32>
    %51 = tpu.matmul %50, %0, %cst_32 {dimension_numbers = #tpu.dot_dimension_numbers<[1], [0], [0], [1], [0, 0, 1, 1], [], []>, precision = #tpu.contract_precision<fp32>} : vector<1x128xf32>, vector<128x128xf32>, vector<1x128xf32> -> vector<1x128xf32>
    %cst_33 = arith.constant 7.812500e-03 : f32
    %52 = vector.broadcast %cst_33 : f32 to vector<1x128xf32>
    %53 = arith.mulf %51, %52 : vector<1x128xf32>
    %cst_34 = arith.constant 9.99999974E-6 : f32
    %54 = vector.broadcast %cst_34 : f32 to vector<1x128xf32>
    %55 = arith.addf %53, %54 : vector<1x128xf32>
    %56 = math.rsqrt %55 : vector<1x128xf32>
    %c0_35 = arith.constant 0 : index
    %c0_36 = arith.constant 0 : index
    %57 = vector.load %arg5[%c0_35, %c0_36] : memref<1x128xf32, #tpu.memory_space<vmem>>, vector<1x128xf32>
    %58 = arith.mulf %57, %56 : vector<1x128xf32>
    %c0_37 = arith.constant 0 : index
    %c0_38 = arith.constant 0 : index
    %59 = vector.load %arg6[%c0_37, %c0_38] : memref<1x128xf32, #tpu.memory_space<vmem>>, vector<1x128xf32>
    %60 = arith.mulf %45, %58 : vector<1x128xf32>
    %61 = arith.subf %59, %60 : vector<1x128xf32>
    %62 = vector.broadcast %58 : vector<1x128xf32> to vector<16x128xf32>
    %63 = arith.mulf %40, %62 : vector<16x128xf32>
    %64 = vector.broadcast %61 : vector<1x128xf32> to vector<16x128xf32>
    %65 = arith.addf %63, %64 : vector<16x128xf32>
    %cst_39 = arith.constant 0.000000e+00 : f32
    %66 = vector.broadcast %cst_39 : f32 to vector<16x128xf32>
    %67 = arith.maximumf %65, %66 : vector<16x128xf32>
    %68 = vector.shape_cast %67 : vector<16x128xf32> to vector<2x8x128xf32>
    %c0_40 = arith.constant 0 : index
    %c1_41 = arith.constant 1 : index
    %c0_42 = arith.constant 0 : index
    %69 = vector.load %arg18[%c0_40, %c1_41, %c0_42] : memref<2x10x128xf32, #tpu.memory_space<vmem>>, vector<2x8x128xf32>
    tpu.vector_store %arg18[%c0_40, %c1_41, %c0_42], %68 {strides = array<i32>} : memref<2x10x128xf32, #tpu.memory_space<vmem>>, vector<2x8x128xf32>,
    %c0_43 = arith.constant 0 : index
    %c0_44 = arith.constant 0 : index
    %c0_45 = arith.constant 0 : index
    %70 = vector.load %arg18[%c0_43, %c0_44, %c0_45] : memref<2x10x128xf32, #tpu.memory_space<vmem>>, vector<2x8x128xf32>
    %71 = vector.shape_cast %70 : vector<2x8x128xf32> to vector<16x128xf32>
    %c0_46 = arith.constant 0 : index
    %c2_47 = arith.constant 2 : index
    %c0_48 = arith.constant 0 : index
    %72 = vector.load %arg18[%c0_46, %c2_47, %c0_48] : memref<2x10x128xf32, #tpu.memory_space<vmem>>, vector<2x8x128xf32>
    %73 = vector.shape_cast %72 : vector<2x8x128xf32> to vector<16x128xf32>
    %74 = tpu.concatenate %71, %67, %73 in 1 : vector<16x128xf32>, vector<16x128xf32>, vector<16x128xf32> -> vector<16x384xf32>
    %75 = arith.truncf %74 : vector<16x384xf32> to vector<16x384xbf16>
    %c0_49 = arith.constant 0 : index
    %c0_50 = arith.constant 0 : index
    %76 = vector.load %arg7[%c0_49, %c0_50] : memref<384x128xbf16, #tpu.memory_space<vmem>>, vector<384x128xbf16>
    %cst_51 = arith.constant dense<0.000000e+00> : vector<16x128xf32>
    %77 = tpu.matmul %75, %76, %cst_51 {dimension_numbers = #tpu.dot_dimension_numbers<[1], [0], [0], [1], [0, 0, 1, 1], [], []>} : vector<16x384xbf16>, vector<384x128xbf16>, vector<16x128xf32> -> vector<16x128xf32>
    %78 = arith.addf %77, %3 : vector<16x128xf32>
    %cst_52 = arith.constant dense<0.000000e+00> : vector<128xf32>
    %79 = vector.multi_reduction <add>, %78, %cst_52 [0] : vector<16x128xf32> to vector<128xf32>
    %80 = vector.shape_cast %79 : vector<128xf32> to vector<1x128xf32>
    %cst_53 = arith.constant dense<0.000000e+00> : vector<1x128xf32>
    %81 = tpu.matmul %80, %0, %cst_53 {dimension_numbers = #tpu.dot_dimension_numbers<[1], [0], [0], [1], [0, 0, 1, 1], [], []>, precision = #tpu.contract_precision<fp32>} : vector<1x128xf32>, vector<128x128xf32>, vector<1x128xf32> -> vector<1x128xf32>
    %cst_54 = arith.constant 7.812500e-03 : f32
    %82 = vector.broadcast %cst_54 : f32 to vector<1x128xf32>
    %83 = arith.mulf %81, %82 : vector<1x128xf32>
    %84 = vector.broadcast %83 : vector<1x128xf32> to vector<16x128xf32>
    %85 = arith.subf %78, %84 : vector<16x128xf32>
    %86 = arith.mulf %85, %85 : vector<16x128xf32>
    %cst_55 = arith.constant dense<0.000000e+00> : vector<128xf32>
    %87 = vector.multi_reduction <add>, %86, %cst_55 [0] : vector<16x128xf32> to vector<128xf32>
    %88 = vector.shape_cast %87 : vector<128xf32> to vector<1x128xf32>
    %cst_56 = arith.constant dense<0.000000e+00> : vector<1x128xf32>
    %89 = tpu.matmul %88, %0, %cst_56 {dimension_numbers = #tpu.dot_dimension_numbers<[1], [0], [0], [1], [0, 0, 1, 1], [], []>, precision = #tpu.contract_precision<fp32>} : vector<1x128xf32>, vector<128x128xf32>, vector<1x128xf32> -> vector<1x128xf32>
    %cst_57 = arith.constant 7.812500e-03 : f32
    %90 = vector.broadcast %cst_57 : f32 to vector<1x128xf32>
    %91 = arith.mulf %89, %90 : vector<1x128xf32>
    %cst_58 = arith.constant 9.99999974E-6 : f32
    %92 = vector.broadcast %cst_58 : f32 to vector<1x128xf32>
    %93 = arith.addf %91, %92 : vector<1x128xf32>
    %94 = math.rsqrt %93 : vector<1x128xf32>
    %c0_59 = arith.constant 0 : index
    %c0_60 = arith.constant 0 : index
    %95 = vector.load %arg8[%c0_59, %c0_60] : memref<1x128xf32, #tpu.memory_space<vmem>>, vector<1x128xf32>
    %96 = arith.mulf %95, %94 : vector<1x128xf32>
    %c0_61 = arith.constant 0 : index
    %c0_62 = arith.constant 0 : index
    %97 = vector.load %arg9[%c0_61, %c0_62] : memref<1x128xf32, #tpu.memory_space<vmem>>, vector<1x128xf32>
    %98 = arith.mulf %83, %96 : vector<1x128xf32>
    %99 = arith.subf %97, %98 : vector<1x128xf32>
    %100 = vector.broadcast %96 : vector<1x128xf32> to vector<16x128xf32>
    %101 = arith.mulf %78, %100 : vector<16x128xf32>
    %102 = vector.broadcast %99 : vector<1x128xf32> to vector<16x128xf32>
    %103 = arith.addf %101, %102 : vector<16x128xf32>
    %cst_63 = arith.constant 0.000000e+00 : f32
    %104 = vector.broadcast %cst_63 : f32 to vector<16x128xf32>
    %105 = arith.maximumf %103, %104 : vector<16x128xf32>
    %106 = vector.shape_cast %105 : vector<16x128xf32> to vector<2x8x128xf32>
    %c0_64 = arith.constant 0 : index
    %c1_65 = arith.constant 1 : index
    %c0_66 = arith.constant 0 : index
    %107 = vector.load %arg18[%c0_64, %c1_65, %c0_66] : memref<2x10x128xf32, #tpu.memory_space<vmem>>, vector<2x8x128xf32>
    tpu.vector_store %arg18[%c0_64, %c1_65, %c0_66], %106 {strides = array<i32>} : memref<2x10x128xf32, #tpu.memory_space<vmem>>, vector<2x8x128xf32>,
    %c0_67 = arith.constant 0 : index
    %c0_68 = arith.constant 0 : index
    %c0_69 = arith.constant 0 : index
    %108 = vector.load %arg18[%c0_67, %c0_68, %c0_69] : memref<2x10x128xf32, #tpu.memory_space<vmem>>, vector<2x8x128xf32>
    %109 = vector.shape_cast %108 : vector<2x8x128xf32> to vector<16x128xf32>
    %c0_70 = arith.constant 0 : index
    %c2_71 = arith.constant 2 : index
    %c0_72 = arith.constant 0 : index
    %110 = vector.load %arg18[%c0_70, %c2_71, %c0_72] : memref<2x10x128xf32, #tpu.memory_space<vmem>>, vector<2x8x128xf32>
    %111 = vector.shape_cast %110 : vector<2x8x128xf32> to vector<16x128xf32>
    %112 = tpu.concatenate %109, %105, %111 in 1 : vector<16x128xf32>, vector<16x128xf32>, vector<16x128xf32> -> vector<16x384xf32>
    %113 = arith.truncf %112 : vector<16x384xf32> to vector<16x384xbf16>
    %c0_73 = arith.constant 0 : index
    %c0_74 = arith.constant 0 : index
    %114 = vector.load %arg10[%c0_73, %c0_74] : memref<384x128xbf16, #tpu.memory_space<vmem>>, vector<384x128xbf16>
    %cst_75 = arith.constant dense<0.000000e+00> : vector<16x128xf32>
    %115 = tpu.matmul %113, %114, %cst_75 {dimension_numbers = #tpu.dot_dimension_numbers<[1], [0], [0], [1], [0, 0, 1, 1], [], []>} : vector<16x384xbf16>, vector<384x128xbf16>, vector<16x128xf32> -> vector<16x128xf32>
    %cst_76 = arith.constant dense<0.000000e+00> : vector<128xf32>
    %116 = vector.multi_reduction <add>, %115, %cst_76 [0] : vector<16x128xf32> to vector<128xf32>
    %117 = vector.shape_cast %116 : vector<128xf32> to vector<1x128xf32>
    %cst_77 = arith.constant dense<0.000000e+00> : vector<1x128xf32>
    %118 = tpu.matmul %117, %0, %cst_77 {dimension_numbers = #tpu.dot_dimension_numbers<[1], [0], [0], [1], [0, 0, 1, 1], [], []>, precision = #tpu.contract_precision<fp32>} : vector<1x128xf32>, vector<128x128xf32>, vector<1x128xf32> -> vector<1x128xf32>
    %cst_78 = arith.constant 7.812500e-03 : f32
    %119 = vector.broadcast %cst_78 : f32 to vector<1x128xf32>
    %120 = arith.mulf %118, %119 : vector<1x128xf32>
    %121 = vector.broadcast %120 : vector<1x128xf32> to vector<16x128xf32>
    %122 = arith.subf %115, %121 : vector<16x128xf32>
    %123 = arith.mulf %122, %122 : vector<16x128xf32>
    %cst_79 = arith.constant dense<0.000000e+00> : vector<128xf32>
    %124 = vector.multi_reduction <add>, %123, %cst_79 [0] : vector<16x128xf32> to vector<128xf32>
    %125 = vector.shape_cast %124 : vector<128xf32> to vector<1x128xf32>
    %cst_80 = arith.constant dense<0.000000e+00> : vector<1x128xf32>
    %126 = tpu.matmul %125, %0, %cst_80 {dimension_numbers = #tpu.dot_dimension_numbers<[1], [0], [0], [1], [0, 0, 1, 1], [], []>, precision = #tpu.contract_precision<fp32>} : vector<1x128xf32>, vector<128x128xf32>, vector<1x128xf32> -> vector<1x128xf32>
    %cst_81 = arith.constant 7.812500e-03 : f32
    %127 = vector.broadcast %cst_81 : f32 to vector<1x128xf32>
    %128 = arith.mulf %126, %127 : vector<1x128xf32>
    %cst_82 = arith.constant 9.99999974E-6 : f32
    %129 = vector.broadcast %cst_82 : f32 to vector<1x128xf32>
    %130 = arith.addf %128, %129 : vector<1x128xf32>
    %131 = math.rsqrt %130 : vector<1x128xf32>
    %c0_83 = arith.constant 0 : index
    %c0_84 = arith.constant 0 : index
    %132 = vector.load %arg11[%c0_83, %c0_84] : memref<1x128xf32, #tpu.memory_space<vmem>>, vector<1x128xf32>
    %133 = arith.mulf %132, %131 : vector<1x128xf32>
    %c0_85 = arith.constant 0 : index
    %c0_86 = arith.constant 0 : index
    %134 = vector.load %arg12[%c0_85, %c0_86] : memref<1x128xf32, #tpu.memory_space<vmem>>, vector<1x128xf32>
    %135 = arith.mulf %120, %133 : vector<1x128xf32>
    %136 = arith.subf %134, %135 : vector<1x128xf32>
    %137 = vector.broadcast %133 : vector<1x128xf32> to vector<16x128xf32>
    %138 = arith.mulf %115, %137 : vector<16x128xf32>
    %139 = vector.broadcast %136 : vector<1x128xf32> to vector<16x128xf32>
    %140 = arith.addf %138, %139 : vector<16x128xf32>
    %cst_87 = arith.constant 0.000000e+00 : f32
    %141 = vector.broadcast %cst_87 : f32 to vector<16x128xf32>
    %142 = arith.maximumf %140, %141 : vector<16x128xf32>
    %c0_88 = arith.constant 0 : index
    %c0_89 = arith.constant 0 : index
    %143 = vector.load %arg13[%c0_88, %c0_89] : memref<1x128xf32, #tpu.memory_space<vmem>>, vector<1x128xf32>
    %144 = arith.mulf %143, %94 : vector<1x128xf32>
    %c0_90 = arith.constant 0 : index
    %c0_91 = arith.constant 0 : index
    %145 = vector.load %arg14[%c0_90, %c0_91] : memref<1x128xf32, #tpu.memory_space<vmem>>, vector<1x128xf32>
    %146 = arith.mulf %83, %144 : vector<1x128xf32>
    %147 = arith.subf %145, %146 : vector<1x128xf32>
    %148 = vector.broadcast %144 : vector<1x128xf32> to vector<16x128xf32>
    %149 = arith.mulf %78, %148 : vector<16x128xf32>
    %150 = vector.broadcast %147 : vector<1x128xf32> to vector<16x128xf32>
    %151 = arith.addf %149, %150 : vector<16x128xf32>
    %cst_92 = arith.constant 0.000000e+00 : f32
    %152 = vector.broadcast %cst_92 : f32 to vector<16x128xf32>
    %153 = arith.maximumf %151, %152 : vector<16x128xf32>
    %154 = vector.shape_cast %142 : vector<16x128xf32> to vector<2x8x128xf32>
    %c0_93 = arith.constant 0 : index
    %c1_94 = arith.constant 1 : index
    %c0_95 = arith.constant 0 : index
    %155 = vector.load %arg18[%c0_93, %c1_94, %c0_95] : memref<2x10x128xf32, #tpu.memory_space<vmem>>, vector<2x8x128xf32>
    tpu.vector_store %arg18[%c0_93, %c1_94, %c0_95], %154 {strides = array<i32>} : memref<2x10x128xf32, #tpu.memory_space<vmem>>, vector<2x8x128xf32>,
    %c0_96 = arith.constant 0 : index
    %c2_97 = arith.constant 2 : index
    %c0_98 = arith.constant 0 : index
    %156 = vector.load %arg18[%c0_96, %c2_97, %c0_98] : memref<2x10x128xf32, #tpu.memory_space<vmem>>, vector<2x8x128xf32>
    %157 = vector.shape_cast %156 : vector<2x8x128xf32> to vector<16x128xf32>
    %158 = tpu.concatenate %142, %153 in 1 : vector<16x128xf32>, vector<16x128xf32> -> vector<16x256xf32>
    %159 = arith.truncf %158 : vector<16x256xf32> to vector<16x256xbf16>
    %160 = tpu.concatenate %142, %157 in 1 : vector<16x128xf32>, vector<16x128xf32> -> vector<16x256xf32>
    %161 = arith.truncf %160 : vector<16x256xf32> to vector<16x256xbf16>
    %c0_99 = arith.constant 0 : index
    %c0_100 = arith.constant 0 : index
    %162 = vector.load %arg15[%c0_99, %c0_100] : memref<256x256xbf16, #tpu.memory_space<vmem>>, vector<256x256xbf16>
    %cst_101 = arith.constant dense<0.000000e+00> : vector<16x256xf32>
    %163 = tpu.matmul %159, %162, %cst_101 {dimension_numbers = #tpu.dot_dimension_numbers<[1], [0], [0], [1], [0, 0, 1, 1], [], []>} : vector<16x256xbf16>, vector<256x256xbf16>, vector<16x256xf32> -> vector<16x256xf32>
    %c0_102 = arith.constant 0 : index
    %c0_103 = arith.constant 0 : index
    %164 = vector.load %arg16[%c0_102, %c0_103] : memref<256x256xbf16, #tpu.memory_space<vmem>>, vector<256x256xbf16>
    %cst_104 = arith.constant dense<0.000000e+00> : vector<16x256xf32>
    %165 = tpu.matmul %161, %164, %cst_104 {dimension_numbers = #tpu.dot_dimension_numbers<[1], [0], [0], [1], [0, 0, 1, 1], [], []>} : vector<16x256xbf16>, vector<256x256xbf16>, vector<16x256xf32> -> vector<16x256xf32>
    %c0_105 = arith.constant 0 : index
    %c0_106 = arith.constant 0 : index
    %166 = vector.load %arg17[%c0_105, %c0_106] : memref<16x512xf32, #tpu.memory_space<vmem>>, vector<16x256xf32>
    tpu.vector_store %arg17[%c0_105, %c0_106], %163 {strides = array<i32>} : memref<16x512xf32, #tpu.memory_space<vmem>>, vector<16x256xf32>,
    %c0_107 = arith.constant 0 : index
    %c256 = arith.constant 256 : index
    %167 = vector.load %arg17[%c0_107, %c256] : memref<16x512xf32, #tpu.memory_space<vmem>>, vector<16x256xf32>
    tpu.vector_store %arg17[%c0_107, %c256], %165 {strides = array<i32>} : memref<16x512xf32, #tpu.memory_space<vmem>>, vector<16x256xf32>,
    return
  }
}

</mosaic_0001>

<bundles_post_ra>
// kernel: decoder_residual_block.1
= control target key start
LH: loop header
LB: loop body
LE: loop exit
PB: predicated region body
PF: predicated region fallthrough
CT: control target
= control target key end

     0   :  { %s6716_s0 = inlined_call_operand.vmem [shape: f32[16,128], index: 0, kind: input, shape index: {}]   ;;  %s6717_s1 = inlined_call_operand.vmem [shape: f32[128,128], index: 1, kind: input, shape index: {}]   ;;  %s6718_s2 = inlined_call_operand.vmem [shape: f32[1,128], index: 2, kind: input, shape index: {}]   ;;  %s6719_s3 = inlined_call_operand.vmem [shape: f32[1,128], index: 3, kind: input, shape index: {}]   ;;  %s6720_s4 = inlined_call_operand.hbm [shape: bf16[384,128], index: 4, kind: input, shape index: {}]   ;;  %s6721_s5 = inlined_call_operand.vmem [shape: f32[1,128], index: 5, kind: input, shape index: {}]   ;;  %s6722_s6 = inlined_call_operand.vmem [shape: f32[1,128], index: 6, kind: input, shape index: {}]   ;;  %s6723_s7 = inlined_call_operand.hbm [shape: bf16[384,128], index: 7, kind: input, shape index: {}]   ;;  %s6724_s8 = inlined_call_operand.vmem [shape: f32[1,128], index: 8, kind: input, shape index: {}]   ;;  %s6725_s9 = inlined_call_operand.vmem [shape: f32[1,128], index: 9, kind: input, shape index: {}]   ;;  %s6726_s10 = inlined_call_operand.hbm [shape: bf16[384,128], index: 10, kind: input, shape index: {}]   ;;  %s6727_s11 = inlined_call_operand.vmem [shape: f32[1,128], index: 11, kind: input, shape index: {}]   ;;  %s6728_s12 = inlined_call_operand.vmem [shape: f32[1,128], index: 12, kind: input, shape index: {}]   ;;  %s6729_s13 = inlined_call_operand.vmem [shape: f32[1,128], index: 13, kind: input, shape index: {}]   ;;  %s6730_s14 = inlined_call_operand.vmem [shape: f32[1,128], index: 14, kind: input, shape index: {}]   ;;  %s6731_s15 = inlined_call_operand.vmem [shape: bf16[256,256], index: 15, kind: input, shape index: {}]   ;;  %s6732_s16 = inlined_call_operand.vmem [shape: bf16[256,256], index: 16, kind: input, shape index: {}]   ;;  %s6733_s17 = inlined_call_operand.vmem [shape: f32[16,512], index: 17, kind: output, shape index: {}]  }
   0x1   :  { %6839 = sst [smem:[#allocation38_spill]] %s6716_s0 }
   0x2   :  { %6840 = sst [smem:[#allocation39_spill]] %s6717_s1 }
   0x3   :  { %22 = vsyncpa [#allocation4], 0 }
   0x4   :  { %23 = vsyncpa [#allocation6], 0  ;;  %s53_s26 = sshll.u32 %s6723_s7, 4  ;;  %s5084_s27 = smov [#allocation5]   ;;  %s54_s26 = int_to_ptr.hbm [resolvable:$true] %s53_s26 }
   0x5   :  { %s55_s28 = sshll.u32 %s5084_s27, 4  ;;  %s36_s30 = sshll.u32 %s6720_s4, 4  ;;  %s56_s28 = int_to_ptr.vmem [resolvable:$true] %s55_s28  ;;  %s37_s30 = int_to_ptr.hbm [resolvable:$true] %s36_s30 }
   0x6   :  { %s5085_s18 = smov 64   ;;  %s5086_s19 = smov 4  }
   0x7   :  { %61 = dma.hbm_to_vmem [thread:$0]  %s54_s26, 3072, %s56_s28, [#allocation6], %s5085_s18, %s5085_s18, %s5086_s19  }
   0x8   :  { %s5087_s1 = smov [#allocation3]   ;;  %s70_s23 = sshll.u32 %s6726_s10, 4  ;;  %s71_s23 = int_to_ptr.hbm [resolvable:$true] %s70_s23 }
   0x9   :  { %s38_s20 = sshll.u32 %s5087_s1, 4  ;;  %s5088_s7 = smov [#allocation7]   ;;  %s39_s20 = int_to_ptr.vmem [resolvable:$true] %s38_s20 }
   0xa   :  { %44 = dma.hbm_to_vmem [thread:$0]  %s37_s30, 3072, %s39_s20, [#allocation4], %s5085_s18, %s5085_s18, %s5086_s19  }
   0xb   :  { %s72_s24 = sshll.u32 %s5088_s7, 4  ;;  %s73_s24 = int_to_ptr.vmem [resolvable:$true] %s72_s24 }
   0xc   :  { %78 = dma.hbm_to_vmem [thread:$0]  %s71_s23, 3072, %s73_s24, [#allocation6], %s5085_s18, %s5085_s18, %s5086_s19  }
   0xd   :  { %5080 = dma.done.wait [#allocation4], 3072  }
   0xe   :  { %5081 = vsyncadd [#allocation4], 4294964224 }
   0xf   :  { %5082 = dma.done.wait [#allocation6], 6144  }
  0x10   :  { %5083 = vsyncadd [#allocation6], 4294961152  ;;  %s6841_s26 = sld [smem:[#allocation39_spill]] }
  0x11   :  { %s6849_s7 = sld [smem:[#allocation38_spill]] }
  0x16   :  { %v118_v0 = vld [vmem:[%s6841_s26 + $0x78] sm:$0xff]  ;;  %v117_v1 = vld [vmem:[%s6841_s26 + $0x70] sm:$0xff]  ;;  %v116_v2 = vld [vmem:[%s6841_s26 + $0x68] sm:$0xff] }
  0x17   :  { %v5198_v3 = vand.u32 4294901760, %v118_v0  ;;  %v5200_v4 = vand.u32 4294901760, %v117_v1  ;;  %v5202_v5 = vand.u32 4294901760, %v116_v2  ;;  %v115_v6 = vld [vmem:[%s6841_s26 + $0x60] sm:$0xff]  ;;  %v114_v7 = vld [vmem:[%s6841_s26 + $0x58] sm:$0xff]  ;;  %v113_v8 = vld [vmem:[%s6841_s26 + $0x50] sm:$0xff] }
  0x18   :  { %v5213_v9 = vand.u32 4294901760, %v115_v6  ;;  %v5215_v10 = vand.u32 4294901760, %v114_v7  ;;  %v5217_v11 = vand.u32 4294901760, %v113_v8  ;;  %v112_v12 = vld [vmem:[%s6841_s26 + $0x48] sm:$0xff]  ;;  %v111_v13 = vld [vmem:[%s6841_s26 + $0x40] sm:$0xff]  ;;  %v110_v18 = vld [vmem:[%s6841_s26 + $0x38] sm:$0xff] }
  0x19   :  { %133 = vmatpush.msra.mxu0 %v5198_v3  ;;  %v5227_v14 = vsub.f32 %v118_v0, %v5198_v3  ;;  %v5230_v15 = vsub.f32 %v117_v1, %v5200_v4  ;;  %v5233_v16 = vsub.f32 %v116_v2, %v5202_v5  ;;  %v5235_v17 = vand.u32 4294901760, %v112_v12  ;;  %329 = vmatpush.msra.mxu3 %v5198_v3  ;;  %v109_v26 = vld [vmem:[%s6841_s26 + $0x30] sm:$0xff]  ;;  %v108_v36 = vld [vmem:[%s6841_s26 + $0x28] sm:$0xff]  ;;  %v107_v41 = vld [vmem:[%s6841_s26 + $0x20] sm:$0xff] }
  0x1a   :  { %v5242_v19 = vsub.f32 %v115_v6, %v5213_v9  ;;  %v5245_v20 = vsub.f32 %v114_v7, %v5215_v10  ;;  %v5248_v21 = vsub.f32 %v113_v8, %v5217_v11  ;;  %v5260_v25 = vand.u32 4294901760, %v111_v13  ;;  %v106_v47 = vld [vmem:[%s6841_s26 + $0x18] sm:$0xff]  ;;  %v105_v55 = vld [vmem:[%s6841_s26 + $0x10] sm:$0xff]  ;;  %v104_v60 = vld [vmem:[%s6841_s26 + $0x8] sm:$0xff] }
  0x1b   :  { %135 = vmatpush.msra.mxu0 %v5200_v4  ;;  %v5252_v22 = vand.u32 4294901760, %v5227_v14  ;;  %v5255_v23 = vand.u32 4294901760, %v5230_v15  ;;  %v5258_v24 = vand.u32 4294901760, %v5233_v16  ;;  %276 = vmatpush.msra.mxu2 %v5227_v14  ;;  %v5269_v28 = vand.u32 4294901760, %v110_v18  ;;  %v5373_v61 = vld [vmem:[%s6849_s7] sm:$0xff]  ;;  %v5378_v62 = vld [vmem:[%s6849_s7 + $0x8] sm:$0xff] }
  0x1c   :  { %v5267_v27 = vand.u32 4294901760, %v5242_v19  ;;  %v5272_v29 = vsub.f32 %v112_v12, %v5235_v17  ;;  %331 = vmatpush.msra.mxu3 %v5200_v4  ;;  %v5283_v33 = vand.u32 4294901760, %v5245_v20  ;;  %v5287_v34 = vand.u32 4294901760, %v5248_v21  ;;  %6850 = vst [vmem:[#allocation17_spill] sm:$0xff] %v5373_v61  ;;  %v103_v6 = vld [vmem:[%s6841_s26] sm:$0xff] }
  0x1d   :  { %137 = vmatpush.msra.mxu0 %v5202_v5  ;;  %v176_v30 = vsub.f32 %v5227_v14, %v5252_v22  ;;  %v182_v31 = vsub.f32 %v5230_v15, %v5255_v23  ;;  %v188_v32 = vsub.f32 %v5233_v16, %v5258_v24  ;;  %279 = vmatpush.msra.mxu2 %v5230_v15  ;;  %v5289_v35 = vand.u32 4294901760, %v109_v26 }
  0x1e   :  { %333 = vmatpush.msra.mxu3 %v5202_v5  ;;  %v194_v39 = vsub.f32 %v5242_v19, %v5267_v27  ;;  %v5303_v40 = vsub.f32 %v111_v13, %v5260_v25  ;;  %v5310_v42 = vand.u32 4294901760, %v5272_v29  ;;  %v200_v44 = vsub.f32 %v5245_v20, %v5283_v33  ;;  %6851 = vst [vmem:[#allocation18_spill] sm:$0xff] %v5378_v62 }
  0x1f   :  { %v5295_v37 = vand.u32 4294901760, %v176_v30  ;;  %139 = vmatpush.msra.mxu0 %v5213_v9  ;;  %v5298_v38 = vand.u32 4294901760, %v182_v31  ;;  %282 = vmatpush.msra.mxu2 %v5233_v16  ;;  %v5315_v43 = vand.u32 4294901760, %v188_v32  ;;  %v5319_v45 = vand.u32 4294901760, %v108_v36 }
  0x20   :  { %6842 = vst [vmem:[#allocation10_spill] sm:$0xff] %v5303_v40  ;;  %335 = vmatpush.msra.mxu3 %v5213_v9  ;;  %v5322_v46 = vsub.f32 %v110_v18, %v5269_v28  ;;  %v5327_v48 = vand.u32 4294901760, %v107_v41  ;;  %v5333_v49 = vand.u32 4294901760, %v194_v39  ;;  %v206_v50 = vsub.f32 %v5248_v21, %v5287_v34 }
  0x21   :  { %178 = vmatpush.msra.mxu1 %v5295_v37  ;;  %141 = vmatpush.msra.mxu0 %v5215_v10  ;;  %v5338_v51 = vand.u32 4294901760, %v5303_v40  ;;  %v5341_v52 = vsub.f32 %v109_v26, %v5289_v35  ;;  %v212_v53 = vsub.f32 %v5272_v29, %v5310_v42  ;;  %v5345_v54 = vand.u32 4294901760, %v106_v47 }
  0x22   :  { %6843 = vst [vmem:[#allocation11_spill] sm:$0xff] %v5322_v46  ;;  %285 = vmatpush.msra.mxu2 %v5242_v19  ;;  %337 = vmatpush.msra.mxu3 %v5215_v10  ;;  %v5354_v56 = vand.u32 4294901760, %v200_v44  ;;  %v5357_v57 = vand.u32 4294901760, %v5322_v46  ;;  %v5360_v58 = vsub.f32 %v108_v36, %v5319_v45  ;;  %v5363_v59 = vsub.f32 %v107_v41, %v5327_v48 }
  0x23   :  { %184 = vmatpush.msra.mxu1 %v5298_v38  ;;  %143 = vmatpush.msra.mxu0 %v5217_v11  ;;  %6844 = vst [vmem:[#allocation12_spill] sm:$0xff] %v5333_v49  ;;  %v5382_v63 = vand.u32 4294901760, %v206_v50  ;;  %v218_v0 = vsub.f32 %v5303_v40, %v5338_v51  ;;  %v5387_v1 = vand.u32 4294901760, %v5341_v52  ;;  %v5389_v2 = vand.u32 4294901760, %v105_v55 }
  0x24   :  { %6845 = vst [vmem:[#allocation13_spill] sm:$0xff] %v5341_v52  ;;  %288 = vmatpush.msra.mxu2 %v5245_v20  ;;  %339 = vmatpush.msra.mxu3 %v5217_v11  ;;  %v5394_v7 = vand.u32 4294901760, %v212_v53  ;;  %v5397_v8 = vsub.f32 %v106_v47, %v5345_v54  ;;  %v224_v12 = vsub.f32 %v5322_v46, %v5357_v57  ;;  %v5406_v13 = vand.u32 4294901760, %v5360_v58 }
  0x25   :  { %190 = vmatpush.msra.mxu1 %v5315_v43  ;;  %145 = vmatpush.msra.mxu0 %v5235_v17  ;;  %6846 = vst [vmem:[#allocation14_spill] sm:$0xff] %v5354_v56  ;;  %v5408_v18 = vand.u32 4294901760, %v104_v60  ;;  %v125_v26 = vadd.f32 %v5378_v62, %v5373_v61  ;;  %v5413_v30 = vand.u32 4294901760, %v5363_v59  ;;  %v5415_v31 = vand.u32 4294901760, %v103_v6 }
  0x26   :  { %6847 = vst [vmem:[#allocation15_spill] sm:$0xff] %v5360_v58  ;;  %291 = vmatpush.msra.mxu2 %v5248_v21  ;;  %341 = vmatpush.msra.mxu3 %v5235_v17  ;;  %v5421_v32 = vand.u32 4294901760, %v218_v0  ;;  %v230_v36 = vsub.f32 %v5341_v52, %v5387_v1  ;;  %v5426_v39 = vsub.f32 %v105_v55, %v5389_v2  ;;  %v5429_v44 = vand.u32 4294901760, %v5397_v8 }
  0x27   :  { %6848 = vst [vmem:[#allocation16_spill] sm:$0xff] %v5363_v59  ;;  %196 = vmatpush.msra.mxu1 %v5333_v49  ;;  %147 = vmatpush.msra.mxu0 %v5260_v25  ;;  %v126_v41 = vrot.slane %v125_v26, 4  ;;  %v5435_v47 = vand.u32 4294901760, %v224_v12  ;;  %v236_v50 = vsub.f32 %v5360_v58, %v5406_v13  ;;  %v5440_v53 = vsub.f32 %v104_v60, %v5408_v18 }
  0x28   :  { %6852 = vst [vmem:[#allocation19_spill] sm:$0xff] %v5382_v63  ;;  %294 = vmatpush.msra.mxu2 %v5272_v29  ;;  %343 = vmatpush.msra.mxu3 %v5260_v25  ;;  %v242_v0 = vsub.f32 %v5363_v59, %v5413_v30  ;;  %v5448_v12 = vand.u32 4294901760, %v230_v36  ;;  %v5451_v62 = vand.u32 4294901760, %v5426_v39  ;;  %v5454_v60 = vsub.f32 %v103_v6, %v5415_v31 }
  0x29   :  { %6853 = vst [vmem:[#allocation20_spill] sm:$0xff] %v5394_v7  ;;  %202 = vmatpush.msra.mxu1 %v5354_v56  ;;  %149 = vmatpush.msra.mxu0 %v5269_v28  ;;  %v127_v55 = vadd.f32 %v126_v41, %v125_v26  ;;  %v5460_v41 = vand.u32 4294901760, %v236_v50  ;;  %v248_v36 = vsub.f32 %v5397_v8, %v5429_v44  ;;  %v5465_v61 = vand.u32 4294901760, %v5440_v53 }
  0x2a   :  { %6854 = vst [vmem:[#allocation21_spill] sm:$0xff] %v5397_v8  ;;  %297 = vmatpush.msra.mxu2 %v5303_v40  ;;  %345 = vmatpush.msra.mxu3 %v5269_v28  ;;  %v5471_v6 = vand.u32 4294901760, %v242_v0  ;;  %v254_v50 = vsub.f32 %v5426_v39, %v5451_v62 }
  0x2b   :  { %208 = vmatpush.msra.mxu1 %v5382_v63  ;;  %151 = vmatpush.msra.mxu0 %v5289_v35  ;;  %6855 = vst [vmem:[#allocation22_spill] sm:$0xff] %v5421_v32  ;;  %v128_v26 = vrot.slane %v127_v55, 2  ;;  %v260_v0 = vsub.f32 %v5440_v53, %v5465_v61 }
  0x2c   :  { %6856 = vst [vmem:[#allocation23_spill] sm:$0xff] %v5426_v39  ;;  %300 = vmatpush.msra.mxu2 %v5322_v46  ;;  %347 = vmatpush.msra.mxu3 %v5289_v35 }
  0x2d   :  { %6857 = vst [vmem:[#allocation24_spill] sm:$0xff] %v5429_v44  ;;  %214 = vmatpush.msra.mxu1 %v5394_v7  ;;  %153 = vmatpush.msra.mxu0 %v5319_v45 }
  0x2e   :  { %6858 = vst [vmem:[#allocation25_spill] sm:$0xff] %v5435_v47  ;;  %303 = vmatpush.msra.mxu2 %v5341_v52  ;;  %349 = vmatpush.msra.mxu3 %v5319_v45  ;;  %v129_v52 = vadd.f32 %v128_v26, %v127_v55  ;;  %v5482_v55 = vand.u32 4294901760, %v248_v36 }
  0x2f   :  { %6859 = vst [vmem:[#allocation26_spill] sm:$0xff] %v5440_v53  ;;  %220 = vmatpush.msra.mxu1 %v5421_v32  ;;  %155 = vmatpush.msra.mxu0 %v5327_v48 }
  0x30   :  { %6860 = vst [vmem:[#allocation27_spill] sm:$0xff] %v5448_v12  ;;  %306 = vmatpush.msra.mxu2 %v5360_v58  ;;  %351 = vmatpush.msra.mxu3 %v5327_v48  ;;  %v5476_v58 = vand.u32 4294901760, %v5454_v60  ;;  %v130_v46 = vrot.slane %v129_v52, 1 }
  0x31   :  { %6861 = vst [vmem:[#allocation28_spill] sm:$0xff] %v5451_v62  ;;  %226 = vmatpush.msra.mxu1 %v5435_v47  ;;  %157 = vmatpush.msra.mxu0 %v5345_v54 }
  0x32   :  { %6862 = vst [vmem:[#allocation29_spill] sm:$0xff] %v5454_v60  ;;  %309 = vmatpush.msra.mxu2 %v5363_v59  ;;  %353 = vmatpush.msra.mxu3 %v5345_v54  ;;  %v131_v26 = vadd.f32 %v130_v46, %v129_v52  ;;  %v266_v59 = vsub.f32 %v5454_v60, %v5476_v58  ;;  %v5499_v46 = vand.u32 4294901760, %v260_v0 }
  0x33   :  { %6863 = vst [vmem:[#allocation30_spill] sm:$0xff] %v5460_v41  ;;  %232 = vmatpush.msra.mxu1 %v5448_v12  ;;  %159 = vmatpush.msra.mxu0 %v5389_v2 }
  0x34   :  { %6864 = vst [vmem:[#allocation31_spill] sm:$0xff] %v5465_v61  ;;  %312 = vmatpush.msra.mxu2 %v5397_v8  ;;  %355 = vmatpush.msra.mxu3 %v5389_v2  ;;  %v5490_v8 = vand.u32 4294901760, %v254_v50  ;;  %v5494_v40 = vand.u32 4294901760, %v131_v26  ;;  %v5506_v36 = vand.u32 4294901760, %v266_v59  ;;  %v6872_v59 = vld [vmem:[#allocation11_spill] sm:$0xff] }
  0x35   :  { %6865 = vst [vmem:[#allocation32_spill] sm:$0xff] %v5471_v6  ;;  %238 = vmatpush.msra.mxu1 %v5460_v41  ;;  %161 = vmatpush.msra.mxu0 %v5408_v18 }
  0x36   :  { %6866 = vst [vmem:[#allocation33_spill] sm:$0xff] %v5476_v58  ;;  %315 = vmatpush.msra.mxu2 %v5426_v39  ;;  %357 = vmatpush.msra.mxu3 %v5408_v18  ;;  %v165_v52 = vsub.f32 %v131_v26, %v5494_v40 }
  0x37   :  { %6867 = vst [vmem:[#allocation34_spill] sm:$0xff] %v5482_v55  ;;  %244 = vmatpush.msra.mxu1 %v5471_v6  ;;  %163 = vmatpush.msra.mxu0 %v5415_v31 }
  0x38   :  { %6868 = vst [vmem:[#allocation35_spill] sm:$0xff] %v5490_v8  ;;  %318 = vmatpush.msra.mxu2 %v5440_v53  ;;  %359 = vmatpush.msra.mxu3 %v5415_v31  ;;  %v166_v50 = vand.u32 4294901760, %v165_v52 }
  0x39   :  { %370 = vmatpush.msrb.mxu0 %v5252_v22  ;;  %250 = vmatpush.msra.mxu1 %v5482_v55  ;;  %6869 = vst [vmem:[#allocation36_spill] sm:$0xff] %v5499_v46 }
  0x3a   :  { %321 = vmatpush.msra.mxu2 %v5454_v60  ;;  %6870 = vst [vmem:[#allocation37_spill] sm:$0xff] %v5506_v36  ;;  %532 = vmatpush.msrb.mxu3 %v5295_v37  ;;  %v167_v0 = vsub.f32 %v165_v52, %v166_v50 }
  0x3b   :  { %374 = vmatpush.msrb.mxu0 %v5255_v23  ;;  %256 = vmatpush.msra.mxu1 %v5490_v8 }
  0x3c   :  { %324 = vmatmul.f32.vlgmr.msra.gmra.mxu2 %v165_v52  ;;  %363 = vmatmul.f32.vlgmr.msra.gmra.mxu3 %v166_v50  ;;  %v168_v26 = vand.u32 4294901760, %v167_v0  ;;  %v6873_v52 = vld [vmem:[#allocation13_spill] sm:$0xff]  ;;  %v6874_v50 = vld [vmem:[#allocation15_spill] sm:$0xff]  ;;  %v6875_v0 = vld [vmem:[#allocation16_spill] sm:$0xff] }
  0x3d   :  { %378 = vmatpush.msrb.mxu0 %v5258_v24  ;;  %262 = vmatpush.msra.mxu1 %v5499_v46 }
  0x3e   :  { %538 = vmatpush.msrb.mxu3 %v5298_v38  ;;  %487 = vmatpush.msrb.mxu2 %v5198_v3 }
  0x3f   :  { %382 = vmatpush.msrb.mxu0 %v5267_v27  ;;  %268 = vmatpush.msra.mxu1 %v5506_v36 }
  0x40   :  { %169 = vmatmul.f32.vlgmr.msra.gmra.mxu0 %v168_v26  ;;  %270 = vmatmul.f32.vlgmr.msra.gmra.mxu1 %v5494_v40  ;;  %v6876_v26 = vld [vmem:[#allocation21_spill] sm:$0xff] }
  0x41   :  { %437 = vmatpush.msrb.mxu1 %v5198_v3  ;;  %386 = vmatpush.msrb.mxu0 %v5283_v33 }
  0x42   :  { %544 = vmatpush.msrb.mxu3 %v5315_v43  ;;  %489 = vmatpush.msrb.mxu2 %v5200_v4 }
  0x43   :  { %439 = vmatpush.msrb.mxu1 %v5200_v4  ;;  %390 = vmatpush.msrb.mxu0 %v5287_v34 }
  0x44   :  { %550 = vmatpush.msrb.mxu3 %v5333_v49  ;;  %491 = vmatpush.msrb.mxu2 %v5202_v5 }
  0x45   :  { %441 = vmatpush.msrb.mxu1 %v5202_v5  ;;  %394 = vmatpush.msrb.mxu0 %v5310_v42 }
  0x46   :  { %556 = vmatpush.msrb.mxu3 %v5354_v56  ;;  %493 = vmatpush.msrb.mxu2 %v5213_v9 }
  0x47   :  { %443 = vmatpush.msrb.mxu1 %v5213_v9  ;;  %398 = vmatpush.msrb.mxu0 %v5338_v51 }
  0x48   :  { %562 = vmatpush.msrb.mxu3 %v5382_v63  ;;  %495 = vmatpush.msrb.mxu2 %v5215_v10 }
  0x49   :  { %445 = vmatpush.msrb.mxu1 %v5215_v10  ;;  %402 = vmatpush.msrb.mxu0 %v5357_v57 }
  0x4a   :  { %568 = vmatpush.msrb.mxu3 %v5394_v7  ;;  %497 = vmatpush.msrb.mxu2 %v5217_v11  ;;  %v6878_v7 = vld [vmem:[#allocation18_spill] sm:$0xff] }
  0x4b   :  { %447 = vmatpush.msrb.mxu1 %v5217_v11  ;;  %406 = vmatpush.msrb.mxu0 %v5387_v1 }
  0x4c   :  { %574 = vmatpush.msrb.mxu3 %v5421_v32  ;;  %499 = vmatpush.msrb.mxu2 %v5235_v17  ;;  %v6877_v32 = vld [vmem:[#allocation17_spill] sm:$0xff] }
  0x4d   :  { %449 = vmatpush.msrb.mxu1 %v5235_v17  ;;  %410 = vmatpush.msrb.mxu0 %v5406_v13 }
  0x4e   :  { %580 = vmatpush.msrb.mxu3 %v5435_v47  ;;  %501 = vmatpush.msrb.mxu2 %v5260_v25 }
  0x4f   :  { %451 = vmatpush.msrb.mxu1 %v5260_v25  ;;  %414 = vmatpush.msrb.mxu0 %v5413_v30 }
  0x50   :  { %586 = vmatpush.msrb.mxu3 %v5448_v12  ;;  %503 = vmatpush.msrb.mxu2 %v5269_v28 }
  0x51   :  { %453 = vmatpush.msrb.mxu1 %v5269_v28  ;;  %418 = vmatpush.msrb.mxu0 %v5429_v44 }
  0x52   :  { %592 = vmatpush.msrb.mxu3 %v5460_v41  ;;  %505 = vmatpush.msrb.mxu2 %v5289_v35 }
  0x53   :  { %455 = vmatpush.msrb.mxu1 %v5289_v35  ;;  %422 = vmatpush.msrb.mxu0 %v5451_v62 }
  0x54   :  { %598 = vmatpush.msrb.mxu3 %v5471_v6  ;;  %507 = vmatpush.msrb.mxu2 %v5319_v45 }
  0x55   :  { %457 = vmatpush.msrb.mxu1 %v5319_v45  ;;  %426 = vmatpush.msrb.mxu0 %v5465_v61 }
  0x56   :  { %604 = vmatpush.msrb.mxu3 %v5482_v55  ;;  %509 = vmatpush.msrb.mxu2 %v5327_v48 }
  0x57   :  { %459 = vmatpush.msrb.mxu1 %v5327_v48  ;;  %430 = vmatpush.msrb.mxu0 %v5476_v58 }
  0x58   :  { %432 = vmatmul.f32.vlgmr.msrb.gmra.mxu0 %v5494_v40  ;;  %610 = vmatpush.msrb.mxu3 %v5490_v8 }
  0x59   :  { %461 = vmatpush.msrb.mxu1 %v5345_v54  ;;  %630 = vmatpush.msra.mxu0 %v5227_v14 }
  0x5a   :  { %616 = vmatpush.msrb.mxu3 %v5499_v46  ;;  %511 = vmatpush.msrb.mxu2 %v5345_v54 }
  0x5b   :  { %463 = vmatpush.msrb.mxu1 %v5389_v2  ;;  %633 = vmatpush.msra.mxu0 %v5230_v15 }
  0x5c   :  { %622 = vmatpush.msrb.mxu3 %v5506_v36  ;;  %513 = vmatpush.msrb.mxu2 %v5389_v2 }
  0x5d   :  { %465 = vmatpush.msrb.mxu1 %v5408_v18  ;;  %636 = vmatpush.msra.mxu0 %v5233_v16 }
  0x5e   :  { %791 = vmatpush.msra.mxu3 %v5198_v3  ;;  %515 = vmatpush.msrb.mxu2 %v5408_v18 }
  0x5f   :  { %467 = vmatpush.msrb.mxu1 %v5415_v31  ;;  %639 = vmatpush.msra.mxu0 %v5242_v19 }
  0x60   :  { %469 = vmatmul.f32.vlgmr.msrb.gmra.mxu1 %v5494_v40  ;;  %793 = vmatpush.msra.mxu3 %v5200_v4  ;;  %v6871_v40 = vld [vmem:[#allocation10_spill] sm:$0xff] }
  0x61   :  { %683 = vmatpush.msra.mxu1 %v5198_v3  ;;  %642 = vmatpush.msra.mxu0 %v5245_v20 }
  0x62   :  { %795 = vmatpush.msra.mxu3 %v5202_v5  ;;  %517 = vmatpush.msrb.mxu2 %v5415_v31 }
  0x63   :  { %685 = vmatpush.msra.mxu1 %v5200_v4  ;;  %645 = vmatpush.msra.mxu0 %v5248_v21 }
  0x64   :  { %797 = vmatpush.msra.mxu3 %v5213_v9  ;;  %724 = vmatpush.msra.mxu2 %v5252_v22 }
  0x65   :  { %687 = vmatpush.msra.mxu1 %v5202_v5  ;;  %648 = vmatpush.msra.mxu0 %v5272_v29 }
  0x66   :  { %799 = vmatpush.msra.mxu3 %v5215_v10  ;;  %728 = vmatpush.msra.mxu2 %v5255_v23 }
  0x67   :  { %689 = vmatpush.msra.mxu1 %v5213_v9  ;;  %651 = vmatpush.msra.mxu0 %v6871_v40 }
  0x68   :  { %801 = vmatpush.msra.mxu3 %v5217_v11  ;;  %732 = vmatpush.msra.mxu2 %v5258_v24 }
  0x69   :  { %691 = vmatpush.msra.mxu1 %v5215_v10  ;;  %654 = vmatpush.msra.mxu0 %v6872_v59 }
  0x6a   :  { %803 = vmatpush.msra.mxu3 %v5235_v17  ;;  %736 = vmatpush.msra.mxu2 %v5267_v27 }
  0x6b   :  { %693 = vmatpush.msra.mxu1 %v5217_v11  ;;  %657 = vmatpush.msra.mxu0 %v6873_v52 }
  0x6c   :  { %805 = vmatpush.msra.mxu3 %v5260_v25  ;;  %740 = vmatpush.msra.mxu2 %v5283_v33 }
  0x6d   :  { %695 = vmatpush.msra.mxu1 %v5235_v17  ;;  %660 = vmatpush.msra.mxu0 %v6874_v50 }
  0x6e   :  { %807 = vmatpush.msra.mxu3 %v5269_v28  ;;  %744 = vmatpush.msra.mxu2 %v5287_v34 }
  0x6f   :  { %697 = vmatpush.msra.mxu1 %v5260_v25  ;;  %663 = vmatpush.msra.mxu0 %v6875_v0 }
  0x70   :  { %809 = vmatpush.msra.mxu3 %v5289_v35  ;;  %748 = vmatpush.msra.mxu2 %v5310_v42 }
  0x71   :  { %699 = vmatpush.msra.mxu1 %v5269_v28  ;;  %666 = vmatpush.msra.mxu0 %v6876_v26 }
  0x72   :  { %811 = vmatpush.msra.mxu3 %v5319_v45  ;;  %752 = vmatpush.msra.mxu2 %v5338_v51 }
  0x73   :  { %701 = vmatpush.msra.mxu1 %v5289_v35  ;;  %669 = vmatpush.msra.mxu0 %v5426_v39 }
  0x74   :  { %813 = vmatpush.msra.mxu3 %v5327_v48  ;;  %756 = vmatpush.msra.mxu2 %v5357_v57 }
  0x75   :  { %703 = vmatpush.msra.mxu1 %v5319_v45  ;;  %672 = vmatpush.msra.mxu0 %v5440_v53 }
  0x76   :  { %815 = vmatpush.msra.mxu3 %v5345_v54  ;;  %760 = vmatpush.msra.mxu2 %v5387_v1 }
  0x77   :  { %705 = vmatpush.msra.mxu1 %v5327_v48  ;;  %675 = vmatpush.msra.mxu0 %v5454_v60 }
  0x78   :  { %817 = vmatpush.msra.mxu3 %v5389_v2  ;;  %764 = vmatpush.msra.mxu2 %v5406_v13 }
  0x79   :  { %707 = vmatpush.msra.mxu1 %v5345_v54 }
  0x7a   :  { %819 = vmatpush.msra.mxu3 %v5408_v18  ;;  %768 = vmatpush.msra.mxu2 %v5413_v30 }
  0x7b   :  { %709 = vmatpush.msra.mxu1 %v5389_v2 }
  0x7c   :  { %821 = vmatpush.msra.mxu3 %v5415_v31  ;;  %772 = vmatpush.msra.mxu2 %v5429_v44 }
  0x7d   :  { %711 = vmatpush.msra.mxu1 %v5408_v18 }
  0x7e   :  { %776 = vmatpush.msra.mxu2 %v5451_v62 }
  0x7f   :  { %713 = vmatpush.msra.mxu1 %v5415_v31 }
  0x80   :  { %780 = vmatpush.msra.mxu2 %v5465_v61 }
  0x82   :  { %784 = vmatpush.msra.mxu2 %v5476_v58 }
  0xbd   :  { %v271_v36 = vpop.f32.mrf.mxu1  ;;  %v170_v46 = vpop.f32.mrf.mxu0 }
  0xbe   :  { %v272_v8 = vadd.f32 %v271_v36, %v170_v46 }
  0xbf   :  { %v325_v55 = vpop.f32.mrf.mxu2  ;;  %v364_v6 = vpop.f32.mrf.mxu3 }
  0xc0   :  { %v326_v60 = vadd.f32 %v325_v55, %v272_v8 }
  0xc2   :  { %v365_v53 = vadd.f32 %v364_v6, %v326_v60 }
  0xd5   :  { %v433_v41 = vpop.f32.mrf.mxu0 }
  0xd6   :  { %v434_v39 = vadd.f32 %v433_v41, %v365_v53 }
  0xdd   :  { %v470_v12 = vpop.f32.mrf.mxu1 }
  0xde   :  { %v471_v26 = vadd.f32 %v470_v12, %v434_v39 }
  0xe0   :  { %v5639_v47 = vmul.f32 0.0078125, %v471_v26  ;;  %v4862_v26 = vld [vmem:[#allocation3 + $0x30] sm:$0xff] }
  0xe2   :  { %v474_v0 = vperm.slane %v5639_v47, 0 }
  0xe4   :  { %v475_v50 = vsub.f32 %v6877_v32, %v474_v0  ;;  %v476_v52 = vsub.f32 %v6878_v7, %v474_v0  ;;  %v4879_v0 = vld [vmem:[#allocation3 + $0xb8] sm:$0xff] }
  0xe6   :  { %v477_v63 = vmul.f32 %v475_v50, %v475_v50  ;;  %v478_v59 = vmul.f32 %v476_v52, %v476_v52  ;;  %v4863_v52 = vld [vmem:[#allocation3 + $0x38] sm:$0xff]  ;;  %v4869_v50 = vld [vmem:[#allocation3 + $0x68] sm:$0xff] }
  0xe7   :  { %1057 = vmatpush.bf16.msrb.mxu0 %v4863_v52 }
  0xe8   :  { %v479_v56 = vadd.f32 %v478_v59, %v477_v63  ;;  %v4870_v59 = vld [vmem:[#allocation3 + $0x70] sm:$0xff] }
  0xea   :  { %v480_v46 = vrot.slane %v479_v56, 4 }
  0xeb   :  { %1058 = vmatpush.bf16.msrb.mxu0 %v4862_v26  ;;  %v5089_v26 = vmov 0.0  }
  0xec   :  { %v481_v36 = vadd.f32 %v480_v46, %v479_v56  ;;  %v4871_v56 = vld [vmem:[#allocation3 + $0x78] sm:$0xff]  ;;  %v4868_v46 = vld [vmem:[#allocation3 + $0x60] sm:$0xff]  ;;  %119 = vst [vmem:[#allocation2] sm:$0xff] %v5089_v26 }
  0xed   :  { %1071 = vmatpush.bf16.msrb.mxu1 %v4871_v56  ;;  %v4866_v56 = vld [vmem:[#allocation3 + $0x50] sm:$0xff]  ;;  %120 = vst [vmem:[#allocation2 + $0x8] sm:$0x3] %v5089_v26 }
  0xee   :  { %v482_v8 = vrot.slane %v481_v36, 2  ;;  %121 = vst [vmem:[#allocation2 + $0x10] sm:$0xff] %v5089_v26 }
  0xef   :  { %122 = vst [vmem:[#allocation2 + $0x18] sm:$0x3] %v5089_v26 }
  0xf0   :  { %v483_v55 = vadd.f32 %v482_v8, %v481_v36  ;;  %v4878_v36 = vld [vmem:[#allocation3 + $0xb0] sm:$0xff] }
  0xf1   :  { %1072 = vmatpush.bf16.msrb.mxu1 %v4870_v59  ;;  %v4876_v59 = vld [vmem:[#allocation3 + $0xa0] sm:$0xff] }
  0xf2   :  { %v484_v60 = vrot.slane %v483_v55, 1 }
  0xf4   :  { %v485_v6 = vadd.f32 %v484_v60, %v483_v55  ;;  %v4861_v60 = vld [vmem:[#allocation3 + $0x28] sm:$0xff] }
  0xf5   :  { %1073 = vmatpush.bf16.msrb.mxu1 %v4869_v50  ;;  %1059 = vmatpush.bf16.msrb.mxu0 %v4861_v60  ;;  %v4859_v50 = vld [vmem:[#allocation3 + $0x18] sm:$0xff] }
  0xf6   :  { %v518_v53 = vand.u32 4294901760, %v485_v6 }
  0xf8   :  { %624 = vmatmul.f32.vlgmr.msrb.gmra.mxu3 %v518_v53  ;;  %v519_v39 = vsub.f32 %v485_v6, %v518_v53  ;;  %v4867_v6 = vld [vmem:[#allocation3 + $0x58] sm:$0xff] }
  0xf9   :  { %1107 = vmatpush.msrb.mxu3 %v5198_v3  ;;  %1074 = vmatpush.bf16.msrb.mxu1 %v4868_v46 }
  0xfa   :  { %678 = vmatmul.f32.vlgmr.msra.gmra.mxu0 %v519_v39  ;;  %v520_v12 = vand.u32 4294901760, %v519_v39 }
  0xfb   :  { %1109 = vmatpush.msrb.mxu3 %v5200_v4 }
  0xfc   :  { %717 = vmatmul.f32.vlgmr.msra.gmra.mxu1 %v520_v12  ;;  %v521_v41 = vsub.f32 %v519_v39, %v520_v12 }
  0xfd   :  { %1111 = vmatpush.msrb.mxu3 %v5202_v5  ;;  %1075 = vmatpush.bf16.msrb.mxu1 %v4867_v6  ;;  %v4858_v6 = vld [vmem:[#allocation3 + $0x10] sm:$0xff] }
  0xfe   :  { %v522_v63 = vand.u32 4294901760, %v521_v41 }
  0xff   :  { %1113 = vmatpush.msrb.mxu3 %v5213_v9 }
 0x100   :  { %523 = vmatmul.f32.vlgmr.msrb.gmra.mxu2 %v522_v63  ;;  %823 = vmatmul.f32.vlgmr.msra.gmra.mxu3 %v518_v53  ;;  %v4860_v63 = vld [vmem:[#allocation3 + $0x20] sm:$0xff] }
 0x101   :  { %1115 = vmatpush.msrb.mxu3 %v5215_v10  ;;  %1085 = vmatpush.bf16.msrb.mxu2 %v4879_v0  ;;  %v4865_v0 = vld [vmem:[#allocation3 + $0x48] sm:$0xff] }
 0x102   :  { %1060 = vmatpush.bf16.msrb.mxu0 %v4860_v63  ;;  %1076 = vmatpush.bf16.msrb.mxu1 %v4866_v56 }
 0x103   :  { %1117 = vmatpush.msrb.mxu3 %v5217_v11 }
 0x105   :  { %1119 = vmatpush.msrb.mxu3 %v5235_v17  ;;  %1086 = vmatpush.bf16.msrb.mxu2 %v4878_v36  ;;  %v4875_v36 = vld [vmem:[#allocation3 + $0x98] sm:$0xff] }
 0x106   :  { %1061 = vmatpush.bf16.msrb.mxu0 %v4859_v50  ;;  %1077 = vmatpush.bf16.msrb.mxu1 %v4865_v0  ;;  %v4872_v50 = vld [vmem:[#allocation3 + $0x80] sm:$0xff] }
 0x107   :  { %1121 = vmatpush.msrb.mxu3 %v5260_v25 }
 0x108   :  { %786 = vmatmul.f32.vlgmr.msra.gmra.mxu2 %v518_v53  ;;  %v4877_v53 = vld [vmem:[#allocation3 + $0xa8] sm:$0xff] }
 0x109   :  { %1123 = vmatpush.msrb.mxu3 %v5269_v28  ;;  %1087 = vmatpush.bf16.msrb.mxu2 %v4877_v53  ;;  %v4864_v53 = vld [vmem:[#allocation3 + $0x40] sm:$0xff] }
 0x10a   :  { %1062 = vmatpush.bf16.msrb.mxu0 %v4858_v6  ;;  %1078 = vmatpush.bf16.msrb.mxu1 %v4864_v53  ;;  %v6879_v6 = vld [vmem:[#allocation14_spill] sm:$0xff]  ;;  %v6880_v53 = vld [vmem:[#allocation11_spill] sm:$0xff] }
 0x10b   :  { %1125 = vmatpush.msrb.mxu3 %v5289_v35 }
 0x10d   :  { %1127 = vmatpush.msrb.mxu3 %v5319_v45  ;;  %1088 = vmatpush.bf16.msrb.mxu2 %v4876_v59  ;;  %v4873_v59 = vld [vmem:[#allocation3 + $0x88] sm:$0xff] }
 0x10e   :  { %1250 = vmatpush.msra.mxu1 %v5227_v14 }
 0x10f   :  { %1129 = vmatpush.msrb.mxu3 %v5327_v48 }
 0x110   :  { %1253 = vmatpush.msra.mxu1 %v5230_v15 }
 0x111   :  { %1131 = vmatpush.msrb.mxu3 %v5345_v54  ;;  %1089 = vmatpush.bf16.msrb.mxu2 %v4875_v36 }
 0x112   :  { %1256 = vmatpush.msra.mxu1 %v5233_v16 }
 0x113   :  { %1133 = vmatpush.msrb.mxu3 %v5389_v2 }
 0x114   :  { %1259 = vmatpush.msra.mxu1 %v5242_v19 }
 0x115   :  { %1135 = vmatpush.msrb.mxu3 %v5408_v18 }
 0x116   :  { %1262 = vmatpush.msra.mxu1 %v5245_v20 }
 0x117   :  { %1137 = vmatpush.msrb.mxu3 %v5415_v31 }
 0x118   :  { %1265 = vmatpush.msra.mxu1 %v5248_v21 }
 0x119   :  { %1344 = vmatpush.msra.mxu3 %v5252_v22 }
 0x11a   :  { %1268 = vmatpush.msra.mxu1 %v5272_v29 }
 0x11b   :  { %1348 = vmatpush.msra.mxu3 %v5255_v23 }
 0x11c   :  { %1271 = vmatpush.msra.mxu1 %v6871_v40 }
 0x11d   :  { %1352 = vmatpush.msra.mxu3 %v5258_v24 }
 0x11e   :  { %1274 = vmatpush.msra.mxu1 %v6880_v53 }
 0x11f   :  { %1356 = vmatpush.msra.mxu3 %v5267_v27 }
 0x121   :  { %1360 = vmatpush.msra.mxu3 %v5283_v33 }
 0x123   :  { %1364 = vmatpush.msra.mxu3 %v5287_v34 }
 0x125   :  { %1368 = vmatpush.msra.mxu3 %v5310_v42 }
 0x127   :  { %1372 = vmatpush.msra.mxu3 %v5338_v51 }
 0x129   :  { %1376 = vmatpush.msra.mxu3 %v5357_v57 }
 0x12b   :  { %1380 = vmatpush.msra.mxu3 %v5387_v1 }
 0x12d   :  { %1384 = vmatpush.msra.mxu3 %v5406_v13 }
 0x12f   :  { %1388 = vmatpush.msra.mxu3 %v5413_v30 }
 0x131   :  { %1392 = vmatpush.msra.mxu3 %v5429_v44 }
 0x133   :  { %1396 = vmatpush.msra.mxu3 %v5451_v62 }
 0x135   :  { %1400 = vmatpush.msra.mxu3 %v5465_v61 }
 0x137   :  { %1404 = vmatpush.msra.mxu3 %v5476_v58 }
 0x177   :  { %v679_v12 = vpop.f32.mrf.mxu0 }
 0x179   :  { %v718_v52 = vpop.f32.mrf.mxu1 }
 0x17b   :  { %v625_v8 = vpop.f32.mrf.mxu3 }
 0x183   :  { %v524_v55 = vpop.f32.mrf.mxu2  ;;  %v824_v60 = vpop.f32.mrf.mxu3 }
 0x184   :  { %v626_v39 = vadd.f32 %v625_v8, %v524_v55 }
 0x186   :  { %v680_v41 = vadd.f32 %v679_v12, %v626_v39  ;;  %v4874_v12 = vld [vmem:[#allocation3 + $0x90] sm:$0xff] }
 0x187   :  { %1090 = vmatpush.bf16.msrb.mxu2 %v4874_v12  ;;  %v6881_v12 = vld [vmem:[#allocation19_spill] sm:$0xff] }
 0x188   :  { %v719_v46 = vadd.f32 %v718_v52, %v680_v41  ;;  %v4857_v41 = vld [vmem:[#allocation3 + $0x8] sm:$0xff]  ;;  %v4856_v52 = vld [vmem:[#allocation3] sm:$0xff] }
 0x189   :  { %1063 = vmatpush.bf16.msrb.mxu0 %v4857_v41  ;;  %v6882_v41 = vld [vmem:[#allocation13_spill] sm:$0xff] }
 0x18a   :  { %1277 = vmatpush.msra.mxu1 %v6882_v41 }
 0x18b   :  { %v787_v8 = vpop.f32.mrf.mxu2  ;;  %1091 = vmatpush.bf16.msrb.mxu2 %v4873_v59  ;;  %v6883_v59 = vld [vmem:[#allocation20_spill] sm:$0xff] }
 0x18c   :  { %v788_v55 = vadd.f32 %v787_v8, %v719_v46 }
 0x18d   :  { %1064 = vmatpush.bf16.msrb.mxu0 %v4856_v52 }
 0x18e   :  { %v825_v39 = vadd.f32 %v824_v60, %v788_v55  ;;  %v839_v60 = vld [vmem:[%s6718_s2] sm:$0x1] }
 0x18f   :  { %1092 = vmatpush.bf16.msrb.mxu2 %v4872_v50 }
 0x190   :  { %v827_v63 = vmul.f32 0.0078125, %v825_v39 }
 0x191   :  { %1152 = vmatpush.msra.mxu0 %v5295_v37 }
 0x192   :  { %v828_v56 = vadd.f32 1e-05, %v827_v63 }
 0x193   :  { %1303 = vmatpush.msra.mxu2 %v5198_v3  ;;  %1158 = vmatpush.msra.mxu0 %v5298_v38 }
 0x194   :  { %4998 = vrsqrt.f32 %v828_v56  ;;  %vm835_vm1 = vweird.f32 %v828_v56 }
 0x195   :  { %1305 = vmatpush.msra.mxu2 %v5200_v4  ;;  %1164 = vmatpush.msra.mxu0 %v5315_v43 }
 0x197   :  { %1307 = vmatpush.msra.mxu2 %v5202_v5  ;;  %1170 = vmatpush.msra.mxu0 %v5333_v49 }
 0x199   :  { %1309 = vmatpush.msra.mxu2 %v5213_v9  ;;  %1176 = vmatpush.msra.mxu0 %v6879_v6 }
 0x19a   :  { %v4999_v0 = vpop.eup %4998 }
 0x19b   :  { %v830_v26 = vmul.f32 %v4999_v0, %v828_v56  ;;  %vm836_vm0 = vweird.f32 %v4999_v0  ;;  %1311 = vmatpush.msra.mxu2 %v5215_v10  ;;  %1182 = vmatpush.msra.mxu0 %v6881_v12  ;;  %v841_v56 = vld [vmem:[%s6719_s3] sm:$0x1] }
 0x19c   :  { %vm837_vm2 = vmor %vm835_vm1, %vm836_vm0 }
 0x19d   :  { %v831_v46 = vmul.f32 %v4999_v0, %v830_v26  ;;  %1313 = vmatpush.msra.mxu2 %v5217_v11  ;;  %1188 = vmatpush.msra.mxu0 %v6883_v59  ;;  %v6884_v26 = vld [vmem:[#allocation15_spill] sm:$0xff] }
 0x19e   :  { %1280 = vmatpush.msra.mxu1 %v6884_v26 }
 0x19f   :  { %v832_v36 = vmul.f32 0.5, %v831_v46  ;;  %1315 = vmatpush.msra.mxu2 %v5235_v17 }
 0x1a1   :  { %v833_v8 = vsub.f32 1.5, %v832_v36  ;;  %1317 = vmatpush.msra.mxu2 %v5260_v25  ;;  %v6886_v36 = vld [vmem:[#allocation16_spill] sm:$0xff] }
 0x1a2   :  { %1283 = vmatpush.msra.mxu1 %v6886_v36 }
 0x1a3   :  { %v834_v55 = vmul.f32 %v4999_v0, %v833_v8  ;;  %v6887_v8 = vld [vmem:[#allocation25_spill] sm:$0xff]  ;;  %1319 = vmatpush.msra.mxu2 %v5269_v28 }
 0x1a5   :  { %v838_v39 = vsel %vm837_vm2, %v4999_v0, %v834_v55  ;;  %v6885_v0 = vld [vmem:[#allocation22_spill] sm:$0xff]  ;;  %1321 = vmatpush.msra.mxu2 %v5289_v35 }
 0x1a6   :  { %v840_v63 = vmul.f32 %v839_v60, %v838_v39  ;;  %1194 = vmatpush.msra.mxu0 %v6885_v0 }
 0x1a7   :  { %1323 = vmatpush.msra.mxu2 %v5319_v45 }
 0x1a8   :  { %v842_v52 = vmul.f32 %v840_v63, %v5639_v47  ;;  %v845_v50 = vperm.slane %v840_v63, 0  ;;  %1200 = vmatpush.msra.mxu0 %v6887_v8  ;;  %v6888_v47 = vld [vmem:[#allocation21_spill] sm:$0xff]  ;;  %v6889_v63 = vld [vmem:[#allocation27_spill] sm:$0xff] }
 0x1a9   :  { %1286 = vmatpush.msra.mxu1 %v6888_v47  ;;  %1325 = vmatpush.msra.mxu2 %v5327_v48 }
 0x1aa   :  { %v843_v46 = vsub.f32 %v841_v56, %v842_v52  ;;  %v847_v55 = vmul.f32 %v845_v50, %v6877_v32  ;;  %v848_v60 = vmul.f32 %v845_v50, %v6878_v7  ;;  %1206 = vmatpush.msra.mxu0 %v6889_v63  ;;  %v6890_v56 = vld [vmem:[#allocation23_spill] sm:$0xff]  ;;  %v6891_v52 = vld [vmem:[#allocation30_spill] sm:$0xff]  ;;  %v6893_v7 = vld [vmem:[#allocation32_spill] sm:$0xff] }
 0x1ab   :  { %1289 = vmatpush.msra.mxu1 %v6890_v56  ;;  %v6892_v32 = vld [vmem:[#allocation26_spill] sm:$0xff]  ;;  %1327 = vmatpush.msra.mxu2 %v5345_v54 }
 0x1ac   :  { %v850_v39 = vperm.slane %v843_v46, 0  ;;  %1212 = vmatpush.msra.mxu0 %v6891_v52  ;;  %v6894_v46 = vld [vmem:[#allocation29_spill] sm:$0xff] }
 0x1ad   :  { %1292 = vmatpush.msra.mxu1 %v6892_v32  ;;  %1329 = vmatpush.msra.mxu2 %v5389_v2 }
 0x1ae   :  { %v852_v58 = vadd.f32 %v850_v39, %v847_v55  ;;  %v853_v61 = vadd.f32 %v850_v39, %v848_v60  ;;  %1218 = vmatpush.msra.mxu0 %v6893_v7  ;;  %v6895_v55 = vld [vmem:[#allocation34_spill] sm:$0xff]  ;;  %v6896_v60 = vld [vmem:[#allocation35_spill] sm:$0xff] }
 0x1af   :  { %1295 = vmatpush.msra.mxu1 %v6894_v46  ;;  %1331 = vmatpush.msra.mxu2 %v5408_v18 }
 0x1b0   :  { %v854_v62 = vmax.f32 %v852_v58, 0.0  ;;  %v855_v44 = vmax.f32 %v853_v61, 0.0  ;;  %1224 = vmatpush.msra.mxu0 %v6895_v55  ;;  %v6897_v58 = vld [vmem:[#allocation36_spill] sm:$0xff] }
 0x1b1   :  { %1333 = vmatpush.msra.mxu2 %v5415_v31 }
 0x1b2   :  { %856 = vst [vmem:[#allocation2 + $0x1] sm:$0xff] %v854_v62  ;;  %v863_v50 = vpack.c.bf16 %v855_v44, %v854_v62  ;;  %1230 = vmatpush.msra.mxu0 %v6896_v60 }
 0x1b3   :  { %857 = vst [vmem:[#allocation2 + $0x11] sm:$0xff] %v855_v44  ;;  %v6898_v44 = vld [vmem:[#allocation37_spill] sm:$0xff] }
 0x1b4   :  { %1079 = vmatmul.bf16.vlgmr.msrb.gmra.mxu1 %v863_v50  ;;  %1236 = vmatpush.msra.mxu0 %v6897_v58 }
 0x1b5   :  { %1461 = vmatpush.msrb.mxu1 %v5198_v3 }
 0x1b6   :  { %1242 = vmatpush.msra.mxu0 %v6898_v44 }
 0x1b7   :  { %1463 = vmatpush.msrb.mxu1 %v5200_v4 }
 0x1b9   :  { %v858_v61 = vld [vmem:[#allocation2] sm:$0xff]  ;;  %1465 = vmatpush.msrb.mxu1 %v5202_v5 }
 0x1ba   :  { %v860_v62 = vld [vmem:[#allocation2 + $0x2] sm:$0xff]  ;;  %v859_v39 = vld [vmem:[#allocation2 + $0x10] sm:$0xff] }
 0x1bb   :  { %v861_v50 = vld [vmem:[#allocation2 + $0x12] sm:$0xff]  ;;  %v862_v46 = vpack.c.bf16 %v859_v39, %v858_v61  ;;  %1467 = vmatpush.msrb.mxu1 %v5213_v9 }
 0x1bc   :  { %v864_v32 = vpack.c.bf16 %v861_v50, %v860_v62 }
 0x1bd   :  { %1065 = vmatmul.bf16.vlgmr.msrb.gmra.mxu0 %v862_v46  ;;  %1469 = vmatpush.msrb.mxu1 %v5215_v10 }
 0x1be   :  { %1093 = vmatmul.bf16.vlgmr.msrb.gmra.mxu2 %v864_v32  ;;  %1411 = vmatpush.msrb.mxu0 %v5198_v3 }
 0x1bf   :  { %1506 = vmatpush.msrb.mxu2 %v5295_v37  ;;  %1471 = vmatpush.msrb.mxu1 %v5217_v11 }
 0x1c0   :  { %1413 = vmatpush.msrb.mxu0 %v5200_v4 }
 0x1c1   :  { %1512 = vmatpush.msrb.mxu2 %v5298_v38  ;;  %1473 = vmatpush.msrb.mxu1 %v5235_v17 }
 0x1c2   :  { %1415 = vmatpush.msrb.mxu0 %v5202_v5 }
 0x1c3   :  { %1518 = vmatpush.msrb.mxu2 %v5315_v43  ;;  %1475 = vmatpush.msrb.mxu1 %v5260_v25 }
 0x1c4   :  { %1417 = vmatpush.msrb.mxu0 %v5213_v9 }
 0x1c5   :  { %1524 = vmatpush.msrb.mxu2 %v5333_v49  ;;  %1477 = vmatpush.msrb.mxu1 %v5269_v28 }
 0x1c6   :  { %1419 = vmatpush.msrb.mxu0 %v5215_v10 }
 0x1c7   :  { %1530 = vmatpush.msrb.mxu2 %v6879_v6  ;;  %1479 = vmatpush.msrb.mxu1 %v5289_v35 }
 0x1c8   :  { %1421 = vmatpush.msrb.mxu0 %v5217_v11 }
 0x1c9   :  { %1536 = vmatpush.msrb.mxu2 %v6881_v12  ;;  %1481 = vmatpush.msrb.mxu1 %v5319_v45 }
 0x1ca   :  { %1423 = vmatpush.msrb.mxu0 %v5235_v17 }
 0x1cb   :  { %1542 = vmatpush.msrb.mxu2 %v6883_v59  ;;  %1483 = vmatpush.msrb.mxu1 %v5327_v48 }
 0x1cc   :  { %1425 = vmatpush.msrb.mxu0 %v5260_v25 }
 0x1cd   :  { %1548 = vmatpush.msrb.mxu2 %v6885_v0  ;;  %1485 = vmatpush.msrb.mxu1 %v5345_v54 }
 0x1ce   :  { %1427 = vmatpush.msrb.mxu0 %v5269_v28 }
 0x1cf   :  { %1554 = vmatpush.msrb.mxu2 %v6887_v8  ;;  %1487 = vmatpush.msrb.mxu1 %v5389_v2 }
 0x1d0   :  { %1429 = vmatpush.msrb.mxu0 %v5289_v35 }
 0x1d1   :  { %1560 = vmatpush.msrb.mxu2 %v6889_v63  ;;  %1489 = vmatpush.msrb.mxu1 %v5408_v18 }
 0x1d2   :  { %1431 = vmatpush.msrb.mxu0 %v5319_v45 }
 0x1d3   :  { %1566 = vmatpush.msrb.mxu2 %v6891_v52  ;;  %1491 = vmatpush.msrb.mxu1 %v5415_v31 }
 0x1d4   :  { %1433 = vmatpush.msrb.mxu0 %v5327_v48 }
 0x1d5   :  { %1572 = vmatpush.msrb.mxu2 %v6893_v7 }
 0x1d6   :  { %1435 = vmatpush.msrb.mxu0 %v5345_v54 }
 0x1d7   :  { %1578 = vmatpush.msrb.mxu2 %v6895_v55 }
 0x1d8   :  { %1437 = vmatpush.msrb.mxu0 %v5389_v2 }
 0x1d9   :  { %1584 = vmatpush.msrb.mxu2 %v6896_v60 }
 0x1da   :  { %1439 = vmatpush.msrb.mxu0 %v5408_v18 }
 0x1db   :  { %1590 = vmatpush.msrb.mxu2 %v6897_v58 }
 0x1dc   :  { %1441 = vmatpush.msrb.mxu0 %v5415_v31 }
 0x1dd   :  { %1596 = vmatpush.msrb.mxu2 %v6898_v44 }
 0x231   :  { %v1080_v46 = vpop.f32.mrf.mxu1 }
 0x239   :  { %v1082_v39 = vpop.f32.mrf.mxu1 }
 0x23a   :  { %v1066_v32 = vpop.f32.mrf.mxu0 }
 0x23b   :  { %v1081_v50 = vadd.f32 %v1080_v46, %v1066_v32 }
 0x241   :  { %v1094_v61 = vpop.f32.mrf.mxu2 }
 0x242   :  { %v1068_v62 = vpop.f32.mrf.mxu0  ;;  %v5781_v52 = vadd.f32 %v1094_v61, %v1081_v50 }
 0x243   :  { %v1083_v7 = vadd.f32 %v1082_v39, %v1068_v62 }
 0x249   :  { %v1096_v55 = vpop.f32.mrf.mxu2 }
 0x24a   :  { %v5783_v63 = vadd.f32 %v1096_v55, %v1083_v7  ;;  %v6904_v55 = vld [vmem:[#allocation29_spill] sm:$0xff] }
 0x24c   :  { %v1099_v60 = vadd.f32 %v5783_v63, %v5781_v52 }
 0x24e   :  { %v1100_v58 = vrot.slane %v1099_v60, 4 }
 0x250   :  { %v1101_v8 = vadd.f32 %v1100_v58, %v1099_v60 }
 0x252   :  { %v1102_v0 = vrot.slane %v1101_v8, 2 }
 0x254   :  { %v1103_v59 = vadd.f32 %v1102_v0, %v1101_v8  ;;  %v6903_v8 = vld [vmem:[#allocation33_spill] sm:$0xff] }
 0x256   :  { %v1104_v44 = vrot.slane %v1103_v59, 1 }
 0x258   :  { %v1105_v12 = vadd.f32 %v1104_v44, %v1103_v59  ;;  %v6902_v59 = vld [vmem:[#allocation26_spill] sm:$0xff] }
 0x25a   :  { %v1138_v6 = vand.u32 4294901760, %v1105_v12 }
 0x25c   :  { %1244 = vmatmul.f32.vlgmr.msra.gmra.mxu0 %v1138_v6  ;;  %v1139_v49 = vsub.f32 %v1105_v12, %v1138_v6  ;;  %v6901_v12 = vld [vmem:[#allocation31_spill] sm:$0xff] }
 0x25d   :  { %1657 = vmatpush.msra.mxu0 %v5198_v3 }
 0x25e   :  { %1298 = vmatmul.f32.vlgmr.msra.gmra.mxu1 %v1139_v49  ;;  %v1140_v32 = vand.u32 4294901760, %v1139_v49 }
 0x25f   :  { %1659 = vmatpush.msra.mxu0 %v5200_v4  ;;  %1698 = vmatpush.msra.mxu1 %v5252_v22 }
 0x260   :  { %1337 = vmatmul.f32.vlgmr.msra.gmra.mxu2 %v1140_v32  ;;  %v1141_v7 = vsub.f32 %v1139_v49, %v1140_v32  ;;  %v6899_v49 = vld [vmem:[#allocation24_spill] sm:$0xff] }
 0x261   :  { %1661 = vmatpush.msra.mxu0 %v5202_v5  ;;  %1765 = vmatpush.msra.mxu2 %v5198_v3 }
 0x262   :  { %v1142_v0 = vand.u32 4294901760, %v1141_v7  ;;  %1702 = vmatpush.msra.mxu1 %v5255_v23 }
 0x263   :  { %1663 = vmatpush.msra.mxu0 %v5213_v9  ;;  %1767 = vmatpush.msra.mxu2 %v5200_v4 }
 0x264   :  { %1143 = vmatmul.f32.vlgmr.msrb.gmra.mxu3 %v1142_v0  ;;  %1443 = vmatmul.f32.vlgmr.msrb.gmra.mxu0 %v1138_v6 }
 0x265   :  { %1604 = vmatpush.msrb.mxu3 %v5227_v14  ;;  %1665 = vmatpush.msra.mxu0 %v5215_v10 }
 0x266   :  { %1769 = vmatpush.msra.mxu2 %v5202_v5  ;;  %1706 = vmatpush.msra.mxu1 %v5258_v24 }
 0x267   :  { %1607 = vmatpush.msrb.mxu3 %v5230_v15  ;;  %1667 = vmatpush.msra.mxu0 %v5217_v11 }
 0x268   :  { %1771 = vmatpush.msra.mxu2 %v5213_v9  ;;  %1710 = vmatpush.msra.mxu1 %v5267_v27 }
 0x269   :  { %1610 = vmatpush.msrb.mxu3 %v5233_v16  ;;  %1669 = vmatpush.msra.mxu0 %v5235_v17 }
 0x26a   :  { %1773 = vmatpush.msra.mxu2 %v5215_v10  ;;  %1714 = vmatpush.msra.mxu1 %v5283_v33 }
 0x26b   :  { %1613 = vmatpush.msrb.mxu3 %v5242_v19  ;;  %1671 = vmatpush.msra.mxu0 %v5260_v25 }
 0x26c   :  { %1406 = vmatmul.f32.vlgmr.msra.gmra.mxu3 %v1138_v6  ;;  %1775 = vmatpush.msra.mxu2 %v5217_v11  ;;  %v6900_v6 = vld [vmem:[#allocation28_spill] sm:$0xff] }
 0x26d   :  { %1616 = vmatpush.msrb.mxu3 %v5245_v20  ;;  %1673 = vmatpush.msra.mxu0 %v5269_v28 }
 0x26e   :  { %1777 = vmatpush.msra.mxu2 %v5235_v17  ;;  %1718 = vmatpush.msra.mxu1 %v5287_v34 }
 0x26f   :  { %1619 = vmatpush.msrb.mxu3 %v5248_v21  ;;  %1675 = vmatpush.msra.mxu0 %v5289_v35 }
 0x270   :  { %1779 = vmatpush.msra.mxu2 %v5260_v25  ;;  %1722 = vmatpush.msra.mxu1 %v5310_v42 }
 0x271   :  { %1622 = vmatpush.msrb.mxu3 %v5272_v29  ;;  %1677 = vmatpush.msra.mxu0 %v5319_v45 }
 0x272   :  { %1781 = vmatpush.msra.mxu2 %v5269_v28  ;;  %1726 = vmatpush.msra.mxu1 %v5338_v51 }
 0x273   :  { %1625 = vmatpush.msrb.mxu3 %v6871_v40  ;;  %1679 = vmatpush.msra.mxu0 %v5327_v48 }
 0x274   :  { %1783 = vmatpush.msra.mxu2 %v5289_v35  ;;  %1730 = vmatpush.msra.mxu1 %v5357_v57 }
 0x275   :  { %1628 = vmatpush.msrb.mxu3 %v6880_v53  ;;  %1681 = vmatpush.msra.mxu0 %v5345_v54 }
 0x276   :  { %1785 = vmatpush.msra.mxu2 %v5319_v45  ;;  %1734 = vmatpush.msra.mxu1 %v5387_v1 }
 0x277   :  { %1631 = vmatpush.msrb.mxu3 %v6882_v41  ;;  %1683 = vmatpush.msra.mxu0 %v5389_v2 }
 0x278   :  { %1787 = vmatpush.msra.mxu2 %v5327_v48  ;;  %1738 = vmatpush.msra.mxu1 %v5406_v13 }
 0x279   :  { %1634 = vmatpush.msrb.mxu3 %v6884_v26  ;;  %1685 = vmatpush.msra.mxu0 %v5408_v18 }
 0x27a   :  { %1789 = vmatpush.msra.mxu2 %v5345_v54  ;;  %1742 = vmatpush.msra.mxu1 %v5413_v30 }
 0x27b   :  { %1637 = vmatpush.msrb.mxu3 %v6886_v36  ;;  %1687 = vmatpush.msra.mxu0 %v5415_v31 }
 0x27c   :  { %1791 = vmatpush.msra.mxu2 %v5389_v2  ;;  %1746 = vmatpush.msra.mxu1 %v6899_v49 }
 0x27d   :  { %1640 = vmatpush.msrb.mxu3 %v6888_v47 }
 0x27e   :  { %1793 = vmatpush.msra.mxu2 %v5408_v18  ;;  %1750 = vmatpush.msra.mxu1 %v6900_v6 }
 0x27f   :  { %1643 = vmatpush.msrb.mxu3 %v6890_v56 }
 0x280   :  { %1795 = vmatpush.msra.mxu2 %v5415_v31  ;;  %1754 = vmatpush.msra.mxu1 %v6901_v12 }
 0x281   :  { %1646 = vmatpush.msrb.mxu3 %v6902_v59 }
 0x282   :  { %1758 = vmatpush.msra.mxu1 %v6903_v8 }
 0x283   :  { %1649 = vmatpush.msrb.mxu3 %v6904_v55 }
 0x2d9   :  { %v1245_v60 = vpop.f32.mrf.mxu0 }
 0x2db   :  { %v1299_v46 = vpop.f32.mrf.mxu1 }
 0x2e1   :  { %v1444_v7 = vpop.f32.mrf.mxu0 }
 0x2e3   :  { %v1338_v62 = vpop.f32.mrf.mxu2 }
 0x2e7   :  { %v1144_v58 = vpop.f32.mrf.mxu3 }
 0x2e8   :  { %v1246_v44 = vadd.f32 %v1245_v60, %v1144_v58 }
 0x2ea   :  { %v1300_v61 = vadd.f32 %v1299_v46, %v1246_v44 }
 0x2ec   :  { %v1339_v39 = vadd.f32 %v1338_v62, %v1300_v61 }
 0x2ef   :  { %v1407_v50 = vpop.f32.mrf.mxu3 }
 0x2f0   :  { %v1408_v32 = vadd.f32 %v1407_v50, %v1339_v39 }
 0x2f2   :  { %v1445_v0 = vadd.f32 %v1444_v7, %v1408_v32  ;;  %v4903_v7 = vld [vmem:[#allocation5 + $0xb8] sm:$0xff] }
 0x2f4   :  { %v5851_v56 = vmul.f32 0.0078125, %v1445_v0  ;;  %v4886_v0 = vld [vmem:[#allocation5 + $0x30] sm:$0xff] }
 0x2f6   :  { %v1448_v47 = vperm.slane %v5851_v56, 0 }
 0x2f8   :  { %v1449_v59 = vsub.f32 %v5781_v52, %v1448_v47  ;;  %v1450_v36 = vsub.f32 %v5783_v63, %v1448_v47 }
 0x2fa   :  { %v1451_v55 = vmul.f32 %v1449_v59, %v1449_v59  ;;  %v1452_v26 = vmul.f32 %v1450_v36, %v1450_v36  ;;  %v4894_v36 = vld [vmem:[#allocation5 + $0x70] sm:$0xff]  ;;  %v4887_v59 = vld [vmem:[#allocation5 + $0x38] sm:$0xff] }
 0x2fb   :  { %2031 = vmatpush.bf16.msra.mxu3 %v4887_v59 }
 0x2fc   :  { %v1453_v41 = vadd.f32 %v1452_v26, %v1451_v55  ;;  %v4893_v55 = vld [vmem:[#allocation5 + $0x68] sm:$0xff] }
 0x2fe   :  { %v1454_v60 = vrot.slane %v1453_v41, 4 }
 0x2ff   :  { %2032 = vmatpush.bf16.msra.mxu3 %v4886_v0 }
 0x300   :  { %v1455_v58 = vadd.f32 %v1454_v60, %v1453_v41  ;;  %v4895_v41 = vld [vmem:[#allocation5 + $0x78] sm:$0xff]  ;;  %v4892_v60 = vld [vmem:[#allocation5 + $0x60] sm:$0xff] }
 0x301   :  { %2045 = vmatpush.bf16.msrb.mxu0 %v4895_v41  ;;  %v4890_v41 = vld [vmem:[#allocation5 + $0x50] sm:$0xff] }
 0x302   :  { %v1456_v44 = vrot.slane %v1455_v58, 2 }
 0x304   :  { %v1457_v46 = vadd.f32 %v1456_v44, %v1455_v58  ;;  %v4902_v58 = vld [vmem:[#allocation5 + $0xb0] sm:$0xff] }
 0x305   :  { %2046 = vmatpush.bf16.msrb.mxu0 %v4894_v36  ;;  %v4900_v36 = vld [vmem:[#allocation5 + $0xa0] sm:$0xff] }
 0x306   :  { %v1458_v61 = vrot.slane %v1457_v46, 1 }
 0x308   :  { %v1459_v62 = vadd.f32 %v1458_v61, %v1457_v46  ;;  %v4885_v61 = vld [vmem:[#allocation5 + $0x28] sm:$0xff] }
 0x309   :  { %2047 = vmatpush.bf16.msrb.mxu0 %v4893_v55  ;;  %2033 = vmatpush.bf16.msra.mxu3 %v4885_v61  ;;  %v4883_v55 = vld [vmem:[#allocation5 + $0x18] sm:$0xff] }
 0x30a   :  { %v1492_v39 = vand.u32 4294901760, %v1459_v62 }
 0x30c   :  { %1598 = vmatmul.f32.vlgmr.msrb.gmra.mxu2 %v1492_v39  ;;  %v1493_v50 = vsub.f32 %v1459_v62, %v1492_v39  ;;  %v4891_v62 = vld [vmem:[#allocation5 + $0x58] sm:$0xff] }
 0x30d   :  { %2081 = vmatpush.msrb.mxu2 %v5198_v3  ;;  %2048 = vmatpush.bf16.msrb.mxu0 %v4892_v60  ;;  %v4899_v60 = vld [vmem:[#allocation5 + $0x98] sm:$0xff] }
 0x30e   :  { %1652 = vmatmul.f32.vlgmr.msrb.gmra.mxu3 %v1493_v50  ;;  %v1494_v32 = vand.u32 4294901760, %v1493_v50 }
 0x30f   :  { %2083 = vmatpush.msrb.mxu2 %v5200_v4 }
 0x310   :  { %1691 = vmatmul.f32.vlgmr.msra.gmra.mxu0 %v1494_v32  ;;  %v1495_v47 = vsub.f32 %v1493_v50, %v1494_v32 }
 0x311   :  { %2085 = vmatpush.msrb.mxu2 %v5202_v5  ;;  %2049 = vmatpush.bf16.msrb.mxu0 %v4891_v62  ;;  %v4898_v62 = vld [vmem:[#allocation5 + $0x90] sm:$0xff] }
 0x312   :  { %v1496_v26 = vand.u32 4294901760, %v1495_v47 }
 0x313   :  { %2087 = vmatpush.msrb.mxu2 %v5213_v9 }
 0x314   :  { %1497 = vmatmul.f32.vlgmr.msrb.gmra.mxu1 %v1496_v26  ;;  %1797 = vmatmul.f32.vlgmr.msra.gmra.mxu2 %v1492_v39  ;;  %v4884_v26 = vld [vmem:[#allocation5 + $0x20] sm:$0xff] }
 0x315   :  { %2089 = vmatpush.msrb.mxu2 %v5215_v10  ;;  %2059 = vmatpush.bf16.msrb.mxu1 %v4903_v7  ;;  %v4889_v7 = vld [vmem:[#allocation5 + $0x48] sm:$0xff] }
 0x316   :  { %2034 = vmatpush.bf16.msra.mxu3 %v4884_v26  ;;  %2050 = vmatpush.bf16.msrb.mxu0 %v4890_v41  ;;  %v4880_v26 = vld [vmem:[#allocation5] sm:$0xff] }
 0x317   :  { %2091 = vmatpush.msrb.mxu2 %v5217_v11  ;;  %v4896_v41 = vld [vmem:[#allocation5 + $0x80] sm:$0xff] }
 0x319   :  { %2093 = vmatpush.msrb.mxu2 %v5235_v17  ;;  %2060 = vmatpush.bf16.msrb.mxu1 %v4902_v58 }
 0x31a   :  { %2035 = vmatpush.bf16.msra.mxu3 %v4883_v55  ;;  %2051 = vmatpush.bf16.msrb.mxu0 %v4889_v7  ;;  %v6905_v7 = vld [vmem:[#allocation12_spill] sm:$0xff] }
 0x31b   :  { %2095 = vmatpush.msrb.mxu2 %v5260_v25 }
 0x31c   :  { %1760 = vmatmul.f32.vlgmr.msra.gmra.mxu1 %v1492_v39  ;;  %v4901_v39 = vld [vmem:[#allocation5 + $0xa8] sm:$0xff] }
 0x31d   :  { %2097 = vmatpush.msrb.mxu2 %v5269_v28  ;;  %2061 = vmatpush.bf16.msrb.mxu1 %v4901_v39 }
 0x31f   :  { %2099 = vmatpush.msrb.mxu2 %v5289_v35 }
 0x321   :  { %2101 = vmatpush.msrb.mxu2 %v5319_v45  ;;  %2062 = vmatpush.bf16.msrb.mxu1 %v4900_v36 }
 0x323   :  { %2103 = vmatpush.msrb.mxu2 %v5327_v48 }
 0x325   :  { %2105 = vmatpush.msrb.mxu2 %v5345_v54  ;;  %2063 = vmatpush.bf16.msrb.mxu1 %v4899_v60  ;;  %v1813_v60 = vld [vmem:[%s6721_s5] sm:$0x1] }
 0x327   :  { %2107 = vmatpush.msrb.mxu2 %v5389_v2 }
 0x329   :  { %2109 = vmatpush.msrb.mxu2 %v5408_v18  ;;  %2064 = vmatpush.bf16.msrb.mxu1 %v4898_v62  ;;  %v6908_v62 = vld [vmem:[#allocation13_spill] sm:$0xff] }
 0x32b   :  { %2111 = vmatpush.msrb.mxu2 %v5415_v31 }
 0x32d   :  { %2318 = vmatpush.msra.mxu2 %v5252_v22 }
 0x32f   :  { %2322 = vmatpush.msra.mxu2 %v5255_v23 }
 0x331   :  { %2326 = vmatpush.msra.mxu2 %v5258_v24 }
 0x333   :  { %2330 = vmatpush.msra.mxu2 %v5267_v27 }
 0x335   :  { %2334 = vmatpush.msra.mxu2 %v5283_v33 }
 0x337   :  { %2338 = vmatpush.msra.mxu2 %v5287_v34 }
 0x339   :  { %2342 = vmatpush.msra.mxu2 %v5310_v42 }
 0x33b   :  { %2346 = vmatpush.msra.mxu2 %v5338_v51 }
 0x33d   :  { %2350 = vmatpush.msra.mxu2 %v5357_v57 }
 0x33f   :  { %2354 = vmatpush.msra.mxu2 %v5387_v1 }
 0x341   :  { %2358 = vmatpush.msra.mxu2 %v5406_v13 }
 0x343   :  { %2362 = vmatpush.msra.mxu2 %v5413_v30 }
 0x345   :  { %2366 = vmatpush.msra.mxu2 %v6899_v49 }
 0x347   :  { %2370 = vmatpush.msra.mxu2 %v6900_v6 }
 0x349   :  { %2374 = vmatpush.msra.mxu2 %v6901_v12 }
 0x34b   :  { %2378 = vmatpush.msra.mxu2 %v6903_v8 }
 0x38d   :  { %v1692_v59 = vpop.f32.mrf.mxu0 }
 0x38f   :  { %v1599_v44 = vpop.f32.mrf.mxu2 }
 0x391   :  { %v1498_v46 = vpop.f32.mrf.mxu1  ;;  %v1653_v32 = vpop.f32.mrf.mxu3 }
 0x392   :  { %v1600_v50 = vadd.f32 %v1599_v44, %v1498_v46  ;;  %v4882_v44 = vld [vmem:[#allocation5 + $0x10] sm:$0xff]  ;;  %v4888_v46 = vld [vmem:[#allocation5 + $0x40] sm:$0xff] }
 0x393   :  { %2036 = vmatpush.bf16.msra.mxu3 %v4882_v44  ;;  %2052 = vmatpush.bf16.msrb.mxu0 %v4888_v46  ;;  %v6907_v46 = vld [vmem:[#allocation19_spill] sm:$0xff] }
 0x394   :  { %v1654_v47 = vadd.f32 %v1653_v32, %v1600_v50  ;;  %v4881_v32 = vld [vmem:[#allocation5 + $0x8] sm:$0xff] }
 0x396   :  { %v1693_v0 = vadd.f32 %v1692_v59, %v1654_v47  ;;  %v4897_v47 = vld [vmem:[#allocation5 + $0x88] sm:$0xff] }
 0x397   :  { %v1798_v12 = vpop.f32.mrf.mxu2  ;;  %2224 = vmatpush.msra.mxu0 %v5227_v14  ;;  %2037 = vmatpush.bf16.msra.mxu3 %v4881_v32 }
 0x398   :  { %2065 = vmatpush.bf16.msrb.mxu1 %v4897_v47 }
 0x399   :  { %v1761_v58 = vpop.f32.mrf.mxu1  ;;  %2227 = vmatpush.msra.mxu0 %v5230_v15 }
 0x39a   :  { %v1762_v8 = vadd.f32 %v1761_v58, %v1693_v0  ;;  %v6906_v58 = vld [vmem:[#allocation14_spill] sm:$0xff] }
 0x39b   :  { %2230 = vmatpush.msra.mxu0 %v5233_v16  ;;  %2038 = vmatpush.bf16.msra.mxu3 %v4880_v26  ;;  %v6910_v26 = vld [vmem:[#allocation15_spill] sm:$0xff] }
 0x39c   :  { %v1799_v61 = vadd.f32 %v1798_v12, %v1762_v8  ;;  %2066 = vmatpush.bf16.msrb.mxu1 %v4896_v41  ;;  %v6911_v41 = vld [vmem:[#allocation22_spill] sm:$0xff] }
 0x39d   :  { %2233 = vmatpush.msra.mxu0 %v5242_v19 }
 0x39e   :  { %v1801_v39 = vmul.f32 0.0078125, %v1799_v61 }
 0x39f   :  { %2126 = vmatpush.msrb.mxu3 %v5295_v37  ;;  %2236 = vmatpush.msra.mxu0 %v5245_v20 }
 0x3a0   :  { %v1802_v50 = vadd.f32 1e-05, %v1801_v39  ;;  %2277 = vmatpush.msra.mxu1 %v5198_v3  ;;  %v1815_v39 = vld [vmem:[%s6722_s6] sm:$0x1] }
 0x3a1   :  { %2132 = vmatpush.msrb.mxu3 %v5298_v38  ;;  %2239 = vmatpush.msra.mxu0 %v5248_v21 }
 0x3a2   :  { %5000 = vrsqrt.f32 %v1802_v50  ;;  %2279 = vmatpush.msra.mxu1 %v5200_v4  ;;  %vm1809_vm4 = vweird.f32 %v1802_v50 }
 0x3a3   :  { %2138 = vmatpush.msrb.mxu3 %v5315_v43  ;;  %2242 = vmatpush.msra.mxu0 %v5272_v29 }
 0x3a4   :  { %2281 = vmatpush.msra.mxu1 %v5202_v5 }
 0x3a5   :  { %2144 = vmatpush.msrb.mxu3 %v6905_v7  ;;  %2245 = vmatpush.msra.mxu0 %v6871_v40 }
 0x3a6   :  { %2283 = vmatpush.msra.mxu1 %v5213_v9 }
 0x3a7   :  { %2150 = vmatpush.msrb.mxu3 %v6906_v58  ;;  %2248 = vmatpush.msra.mxu0 %v6880_v53 }
 0x3a8   :  { %v5001_v12 = vpop.eup %5000  ;;  %2285 = vmatpush.msra.mxu1 %v5215_v10 }
 0x3a9   :  { %v1804_v8 = vmul.f32 %v5001_v12, %v1802_v50  ;;  %vm1810_vm3 = vweird.f32 %v5001_v12  ;;  %2156 = vmatpush.msrb.mxu3 %v6907_v46  ;;  %2251 = vmatpush.msra.mxu0 %v6908_v62  ;;  %v6909_v50 = vld [vmem:[#allocation20_spill] sm:$0xff] }
 0x3aa   :  { %vm1811_vm5 = vmor %vm1809_vm4, %vm1810_vm3  ;;  %2287 = vmatpush.msra.mxu1 %v5217_v11 }
 0x3ab   :  { %v1805_v36 = vmul.f32 %v5001_v12, %v1804_v8  ;;  %2162 = vmatpush.msrb.mxu3 %v6909_v50  ;;  %2254 = vmatpush.msra.mxu0 %v6910_v26  ;;  %v6912_v8 = vld [vmem:[#allocation16_spill] sm:$0xff] }
 0x3ac   :  { %2289 = vmatpush.msra.mxu1 %v5235_v17 }
 0x3ad   :  { %v1806_v59 = vmul.f32 0.5, %v1805_v36  ;;  %2168 = vmatpush.msrb.mxu3 %v6911_v41  ;;  %2257 = vmatpush.msra.mxu0 %v6912_v8  ;;  %v6913_v36 = vld [vmem:[#allocation25_spill] sm:$0xff] }
 0x3ae   :  { %2291 = vmatpush.msra.mxu1 %v5260_v25 }
 0x3af   :  { %v1807_v55 = vsub.f32 1.5, %v1806_v59  ;;  %2174 = vmatpush.msrb.mxu3 %v6913_v36 }
 0x3b0   :  { %2293 = vmatpush.msra.mxu1 %v5269_v28 }
 0x3b1   :  { %v1808_v0 = vmul.f32 %v5001_v12, %v1807_v55 }
 0x3b2   :  { %2295 = vmatpush.msra.mxu1 %v5289_v35 }
 0x3b3   :  { %v1812_v44 = vsel %vm1811_vm5, %v5001_v12, %v1808_v0 }
 0x3b4   :  { %v1814_v61 = vmul.f32 %v1813_v60, %v1812_v44  ;;  %v6915_v60 = vld [vmem:[#allocation27_spill] sm:$0xff]  ;;  %2297 = vmatpush.msra.mxu1 %v5319_v45 }
 0x3b5   :  { %2180 = vmatpush.msrb.mxu3 %v6915_v60 }
 0x3b6   :  { %v1816_v32 = vmul.f32 %v1814_v61, %v5851_v56  ;;  %v1819_v47 = vperm.slane %v1814_v61, 0  ;;  %v6914_v56 = vld [vmem:[#allocation21_spill] sm:$0xff]  ;;  %2299 = vmatpush.msra.mxu1 %v5327_v48 }
 0x3b7   :  { %2260 = vmatpush.msra.mxu0 %v6914_v56 }
 0x3b8   :  { %v1817_v12 = vsub.f32 %v1815_v39, %v1816_v32  ;;  %v1821_v59 = vmul.f32 %v1819_v47, %v5781_v52  ;;  %v1822_v55 = vmul.f32 %v1819_v47, %v5783_v63  ;;  %v6916_v39 = vld [vmem:[#allocation23_spill] sm:$0xff]  ;;  %v6917_v32 = vld [vmem:[#allocation30_spill] sm:$0xff]  ;;  %v6919_v63 = vld [vmem:[#allocation32_spill] sm:$0xff]  ;;  %2301 = vmatpush.msra.mxu1 %v5345_v54 }
 0x3b9   :  { %2263 = vmatpush.msra.mxu0 %v6916_v39  ;;  %2186 = vmatpush.msrb.mxu3 %v6917_v32  ;;  %v6918_v52 = vld [vmem:[#allocation26_spill] sm:$0xff] }
 0x3ba   :  { %v1824_v0 = vperm.slane %v1817_v12, 0  ;;  %v6920_v12 = vld [vmem:[#allocation29_spill] sm:$0xff]  ;;  %2303 = vmatpush.msra.mxu1 %v5389_v2 }
 0x3bb   :  { %2266 = vmatpush.msra.mxu0 %v6918_v52  ;;  %2192 = vmatpush.msrb.mxu3 %v6919_v63 }
 0x3bc   :  { %v1826_v44 = vadd.f32 %v1824_v0, %v1821_v59  ;;  %v1827_v61 = vadd.f32 %v1824_v0, %v1822_v55  ;;  %v6921_v59 = vld [vmem:[#allocation34_spill] sm:$0xff]  ;;  %v6922_v55 = vld [vmem:[#allocation35_spill] sm:$0xff]  ;;  %v6923_v0 = vld [vmem:[#allocation36_spill] sm:$0xff]  ;;  %2305 = vmatpush.msra.mxu1 %v5408_v18 }
 0x3bd   :  { %2269 = vmatpush.msra.mxu0 %v6920_v12  ;;  %2198 = vmatpush.msrb.mxu3 %v6921_v59 }
 0x3be   :  { %v1828_v6 = vmax.f32 %v1826_v44, 0.0  ;;  %v1829_v49 = vmax.f32 %v1827_v61, 0.0  ;;  %2307 = vmatpush.msra.mxu1 %v5415_v31 }
 0x3bf   :  { %2204 = vmatpush.msrb.mxu3 %v6922_v55 }
 0x3c0   :  { %1830 = vst [vmem:[#allocation2 + $0x1] sm:$0xff] %v1828_v6  ;;  %v1837_v47 = vpack.c.bf16 %v1829_v49, %v1828_v6 }
 0x3c1   :  { %1831 = vst [vmem:[#allocation2 + $0x11] sm:$0xff] %v1829_v49  ;;  %2210 = vmatpush.msrb.mxu3 %v6923_v0  ;;  %v6924_v49 = vld [vmem:[#allocation37_spill] sm:$0xff] }
 0x3c2   :  { %2053 = vmatmul.bf16.vlgmr.msrb.gmra.mxu0 %v1837_v47 }
 0x3c3   :  { %2435 = vmatpush.msrb.mxu0 %v5198_v3  ;;  %2216 = vmatpush.msrb.mxu3 %v6924_v49 }
 0x3c5   :  { %2437 = vmatpush.msrb.mxu0 %v5200_v4 }
 0x3c7   :  { %v1832_v6 = vld [vmem:[#allocation2] sm:$0xff]  ;;  %2439 = vmatpush.msrb.mxu0 %v5202_v5 }
 0x3c8   :  { %v1834_v44 = vld [vmem:[#allocation2 + $0x2] sm:$0xff]  ;;  %v1833_v61 = vld [vmem:[#allocation2 + $0x10] sm:$0xff] }
 0x3c9   :  { %v1835_v47 = vld [vmem:[#allocation2 + $0x12] sm:$0xff]  ;;  %v1836_v12 = vpack.c.bf16 %v1833_v61, %v1832_v6  ;;  %2441 = vmatpush.msrb.mxu0 %v5213_v9 }
 0x3ca   :  { %v1838_v52 = vpack.c.bf16 %v1835_v47, %v1834_v44  ;;  %v5006_v44 = vld [vmem:[%s6849_s7] sm:$0xff] }
 0x3cb   :  { %2039 = vmatmul.bf16.vlgmr.msra.gmra.mxu3 %v1836_v12  ;;  %2443 = vmatpush.msrb.mxu0 %v5215_v10 }
 0x3cc   :  { %2067 = vmatmul.bf16.vlgmr.msrb.gmra.mxu1 %v1838_v52  ;;  %2385 = vmatpush.msra.mxu3 %v5198_v3 }
 0x3cd   :  { %2480 = vmatpush.msrb.mxu1 %v5295_v37  ;;  %2445 = vmatpush.msrb.mxu0 %v5217_v11 }
 0x3ce   :  { %2387 = vmatpush.msra.mxu3 %v5200_v4 }
 0x3cf   :  { %2486 = vmatpush.msrb.mxu1 %v5298_v38  ;;  %2447 = vmatpush.msrb.mxu0 %v5235_v17 }
 0x3d0   :  { %2389 = vmatpush.msra.mxu3 %v5202_v5 }
 0x3d1   :  { %2492 = vmatpush.msrb.mxu1 %v5315_v43  ;;  %2449 = vmatpush.msrb.mxu0 %v5260_v25 }
 0x3d2   :  { %2391 = vmatpush.msra.mxu3 %v5213_v9 }
 0x3d3   :  { %2498 = vmatpush.msrb.mxu1 %v6905_v7  ;;  %2451 = vmatpush.msrb.mxu0 %v5269_v28 }
 0x3d4   :  { %2393 = vmatpush.msra.mxu3 %v5215_v10 }
 0x3d5   :  { %2504 = vmatpush.msrb.mxu1 %v6906_v58  ;;  %2453 = vmatpush.msrb.mxu0 %v5289_v35 }
 0x3d6   :  { %2395 = vmatpush.msra.mxu3 %v5217_v11 }
 0x3d7   :  { %2510 = vmatpush.msrb.mxu1 %v6907_v46  ;;  %2455 = vmatpush.msrb.mxu0 %v5319_v45 }
 0x3d8   :  { %2397 = vmatpush.msra.mxu3 %v5235_v17 }
 0x3d9   :  { %2516 = vmatpush.msrb.mxu1 %v6909_v50  ;;  %2457 = vmatpush.msrb.mxu0 %v5327_v48 }
 0x3da   :  { %2399 = vmatpush.msra.mxu3 %v5260_v25 }
 0x3db   :  { %2522 = vmatpush.msrb.mxu1 %v6911_v41  ;;  %2459 = vmatpush.msrb.mxu0 %v5345_v54 }
 0x3dc   :  { %2401 = vmatpush.msra.mxu3 %v5269_v28 }
 0x3dd   :  { %2528 = vmatpush.msrb.mxu1 %v6913_v36  ;;  %2461 = vmatpush.msrb.mxu0 %v5389_v2 }
 0x3de   :  { %2403 = vmatpush.msra.mxu3 %v5289_v35 }
 0x3df   :  { %2534 = vmatpush.msrb.mxu1 %v6915_v60  ;;  %2463 = vmatpush.msrb.mxu0 %v5408_v18 }
 0x3e0   :  { %2405 = vmatpush.msra.mxu3 %v5319_v45 }
 0x3e1   :  { %2540 = vmatpush.msrb.mxu1 %v6917_v32  ;;  %2465 = vmatpush.msrb.mxu0 %v5415_v31 }
 0x3e2   :  { %2407 = vmatpush.msra.mxu3 %v5327_v48 }
 0x3e3   :  { %2546 = vmatpush.msrb.mxu1 %v6919_v63 }
 0x3e4   :  { %2409 = vmatpush.msra.mxu3 %v5345_v54 }
 0x3e5   :  { %2552 = vmatpush.msrb.mxu1 %v6921_v59 }
 0x3e6   :  { %2411 = vmatpush.msra.mxu3 %v5389_v2 }
 0x3e7   :  { %2558 = vmatpush.msrb.mxu1 %v6922_v55  ;;  %v5007_v55 = vld [vmem:[%s6849_s7 + $0x8] sm:$0xff] }
 0x3e8   :  { %2413 = vmatpush.msra.mxu3 %v5408_v18 }
 0x3e9   :  { %2564 = vmatpush.msrb.mxu1 %v6923_v0 }
 0x3ea   :  { %2415 = vmatpush.msra.mxu3 %v5415_v31 }
 0x3eb   :  { %2570 = vmatpush.msrb.mxu1 %v6924_v49 }
 0x43f   :  { %v2054_v52 = vpop.f32.mrf.mxu0 }
 0x447   :  { %v2056_v0 = vpop.f32.mrf.mxu0 }
 0x449   :  { %v2068_v6 = vpop.f32.mrf.mxu1 }
 0x44e   :  { %v2040_v12 = vpop.f32.mrf.mxu3 }
 0x44f   :  { %v2041_v61 = vadd.f32 %v5006_v44, %v2040_v12 }
 0x451   :  { %v2055_v59 = vadd.f32 %v2054_v52, %v2041_v61  ;;  %v2070_v60 = vpop.f32.mrf.mxu1 }
 0x453   :  { %v5999_v36 = vadd.f32 %v2068_v6, %v2055_v59  ;;  %v6932_v59 = vld [vmem:[#allocation29_spill] sm:$0xff] }
 0x455   :  { %6925 = vst [vmem:[#allocation10_spill] sm:$0xff] %v5999_v36 }
 0x456   :  { %v2042_v47 = vpop.f32.mrf.mxu3 }
 0x457   :  { %v2043_v63 = vadd.f32 %v5007_v55, %v2042_v47 }
 0x459   :  { %v2057_v32 = vadd.f32 %v2056_v0, %v2043_v63 }
 0x45b   :  { %v6001_v49 = vadd.f32 %v2070_v60, %v2057_v32  ;;  %v6931_v32 = vld [vmem:[#allocation33_spill] sm:$0xff] }
 0x45d   :  { %6926 = vst [vmem:[#allocation17_spill] sm:$0xff] %v6001_v49  ;;  %v2073_v41 = vadd.f32 %v6001_v49, %v5999_v36 }
 0x45f   :  { %v2074_v50 = vrot.slane %v2073_v41, 4 }
 0x461   :  { %v2075_v46 = vadd.f32 %v2074_v50, %v2073_v41  ;;  %v6929_v50 = vld [vmem:[#allocation31_spill] sm:$0xff]  ;;  %v6930_v41 = vld [vmem:[#allocation26_spill] sm:$0xff] }
 0x463   :  { %v2076_v12 = vrot.slane %v2075_v46, 2 }
 0x465   :  { %v2077_v44 = vadd.f32 %v2076_v12, %v2075_v46 }
 0x467   :  { %v2078_v52 = vrot.slane %v2077_v44, 1 }
 0x469   :  { %v2079_v61 = vadd.f32 %v2078_v52, %v2077_v44 }
 0x46b   :  { %v2112_v58 = vand.u32 4294901760, %v2079_v61 }
 0x46d   :  { %2218 = vmatmul.f32.vlgmr.msrb.gmra.mxu3 %v2112_v58  ;;  %v2113_v7 = vsub.f32 %v2079_v61, %v2112_v58 }
 0x46e   :  { %2631 = vmatpush.msrb.mxu3 %v5198_v3 }
 0x46f   :  { %2272 = vmatmul.f32.vlgmr.msra.gmra.mxu0 %v2113_v7  ;;  %v2114_v63 = vand.u32 4294901760, %v2113_v7 }
 0x470   :  { %2633 = vmatpush.msrb.mxu3 %v5200_v4  ;;  %2672 = vmatpush.msra.mxu0 %v5252_v22 }
 0x471   :  { %2311 = vmatmul.f32.vlgmr.msra.gmra.mxu1 %v2114_v63  ;;  %v2115_v60 = vsub.f32 %v2113_v7, %v2114_v63  ;;  %v6927_v7 = vld [vmem:[#allocation24_spill] sm:$0xff] }
 0x472   :  { %2635 = vmatpush.msrb.mxu3 %v5202_v5  ;;  %2739 = vmatpush.msra.mxu1 %v5198_v3 }
 0x473   :  { %v2116_v46 = vand.u32 4294901760, %v2115_v60  ;;  %2676 = vmatpush.msra.mxu0 %v5255_v23 }
 0x474   :  { %2637 = vmatpush.msrb.mxu3 %v5213_v9  ;;  %2741 = vmatpush.msra.mxu1 %v5200_v4 }
 0x475   :  { %2117 = vmatmul.f32.vlgmr.msrb.gmra.mxu2 %v2116_v46  ;;  %2417 = vmatmul.f32.vlgmr.msra.gmra.mxu3 %v2112_v58 }
 0x476   :  { %2578 = vmatpush.msrb.mxu2 %v5227_v14  ;;  %2639 = vmatpush.msrb.mxu3 %v5215_v10 }
 0x477   :  { %2743 = vmatpush.msra.mxu1 %v5202_v5  ;;  %2680 = vmatpush.msra.mxu0 %v5258_v24 }
 0x478   :  { %2581 = vmatpush.msrb.mxu2 %v5230_v15  ;;  %2641 = vmatpush.msrb.mxu3 %v5217_v11 }
 0x479   :  { %2745 = vmatpush.msra.mxu1 %v5213_v9  ;;  %2684 = vmatpush.msra.mxu0 %v5267_v27 }
 0x47a   :  { %2584 = vmatpush.msrb.mxu2 %v5233_v16  ;;  %2643 = vmatpush.msrb.mxu3 %v5235_v17 }
 0x47b   :  { %2747 = vmatpush.msra.mxu1 %v5215_v10  ;;  %2688 = vmatpush.msra.mxu0 %v5283_v33 }
 0x47c   :  { %2587 = vmatpush.msrb.mxu2 %v5242_v19  ;;  %2645 = vmatpush.msrb.mxu3 %v5260_v25 }
 0x47d   :  { %2380 = vmatmul.f32.vlgmr.msra.gmra.mxu2 %v2112_v58  ;;  %2749 = vmatpush.msra.mxu1 %v5217_v11  ;;  %v6928_v58 = vld [vmem:[#allocation28_spill] sm:$0xff] }
 0x47e   :  { %2590 = vmatpush.msrb.mxu2 %v5245_v20  ;;  %2647 = vmatpush.msrb.mxu3 %v5269_v28 }
 0x47f   :  { %2751 = vmatpush.msra.mxu1 %v5235_v17  ;;  %2692 = vmatpush.msra.mxu0 %v5287_v34 }
 0x480   :  { %2593 = vmatpush.msrb.mxu2 %v5248_v21  ;;  %2649 = vmatpush.msrb.mxu3 %v5289_v35 }
 0x481   :  { %2753 = vmatpush.msra.mxu1 %v5260_v25  ;;  %2696 = vmatpush.msra.mxu0 %v5310_v42 }
 0x482   :  { %2596 = vmatpush.msrb.mxu2 %v5272_v29  ;;  %2651 = vmatpush.msrb.mxu3 %v5319_v45 }
 0x483   :  { %2755 = vmatpush.msra.mxu1 %v5269_v28  ;;  %2700 = vmatpush.msra.mxu0 %v5338_v51 }
 0x484   :  { %2599 = vmatpush.msrb.mxu2 %v6871_v40  ;;  %2653 = vmatpush.msrb.mxu3 %v5327_v48 }
 0x485   :  { %2757 = vmatpush.msra.mxu1 %v5289_v35  ;;  %2704 = vmatpush.msra.mxu0 %v5357_v57 }
 0x486   :  { %2602 = vmatpush.msrb.mxu2 %v6880_v53  ;;  %2655 = vmatpush.msrb.mxu3 %v5345_v54 }
 0x487   :  { %2759 = vmatpush.msra.mxu1 %v5319_v45  ;;  %2708 = vmatpush.msra.mxu0 %v5387_v1 }
 0x488   :  { %2605 = vmatpush.msrb.mxu2 %v6908_v62  ;;  %2657 = vmatpush.msrb.mxu3 %v5389_v2 }
 0x489   :  { %2761 = vmatpush.msra.mxu1 %v5327_v48  ;;  %2712 = vmatpush.msra.mxu0 %v5406_v13 }
 0x48a   :  { %2608 = vmatpush.msrb.mxu2 %v6910_v26  ;;  %2659 = vmatpush.msrb.mxu3 %v5408_v18 }
 0x48b   :  { %2763 = vmatpush.msra.mxu1 %v5345_v54  ;;  %2716 = vmatpush.msra.mxu0 %v5413_v30 }
 0x48c   :  { %2611 = vmatpush.msrb.mxu2 %v6912_v8  ;;  %2661 = vmatpush.msrb.mxu3 %v5415_v31 }
 0x48d   :  { %2765 = vmatpush.msra.mxu1 %v5389_v2  ;;  %2720 = vmatpush.msra.mxu0 %v6927_v7 }
 0x48e   :  { %2614 = vmatpush.msrb.mxu2 %v6914_v56 }
 0x48f   :  { %2767 = vmatpush.msra.mxu1 %v5408_v18  ;;  %2724 = vmatpush.msra.mxu0 %v6928_v58 }
 0x490   :  { %2617 = vmatpush.msrb.mxu2 %v6916_v39 }
 0x491   :  { %2769 = vmatpush.msra.mxu1 %v5415_v31  ;;  %2728 = vmatpush.msra.mxu0 %v6929_v50 }
 0x492   :  { %2620 = vmatpush.msrb.mxu2 %v6930_v41 }
 0x493   :  { %2732 = vmatpush.msra.mxu0 %v6931_v32 }
 0x494   :  { %2623 = vmatpush.msrb.mxu2 %v6932_v59 }
 0x4ec   :  { %v2273_v47 = vpop.f32.mrf.mxu0 }
 0x4ee   :  { %v2312_v44 = vpop.f32.mrf.mxu1 }
 0x4f0   :  { %v2219_v55 = vpop.f32.mrf.mxu3 }
 0x4f8   :  { %v2118_v0 = vpop.f32.mrf.mxu2  ;;  %v2418_v60 = vpop.f32.mrf.mxu3 }
 0x4f9   :  { %v2220_v6 = vadd.f32 %v2219_v55, %v2118_v0 }
 0x4fb   :  { %v2274_v12 = vadd.f32 %v2273_v47, %v2220_v6 }
 0x4fd   :  { %v2313_v52 = vadd.f32 %v2312_v44, %v2274_v12 }
 0x500   :  { %v2381_v61 = vpop.f32.mrf.mxu2 }
 0x501   :  { %v2382_v63 = vadd.f32 %v2381_v61, %v2313_v52 }
 0x503   :  { %v2419_v46 = vadd.f32 %v2418_v60, %v2382_v63  ;;  %v4927_v60 = vld [vmem:[#allocation7 + $0xb8] sm:$0xff] }
 0x505   :  { %v6069_v39 = vmul.f32 0.0078125, %v2419_v46  ;;  %v4910_v46 = vld [vmem:[#allocation7 + $0x30] sm:$0xff] }
 0x507   :  { %6933 = vst [vmem:[#allocation18_spill] sm:$0xff] %v6069_v39  ;;  %v2422_v56 = vperm.slane %v6069_v39, 0 }
 0x509   :  { %v2423_v41 = vsub.f32 %v5999_v36, %v2422_v56  ;;  %v2424_v8 = vsub.f32 %v6001_v49, %v2422_v56 }
 0x50b   :  { %v2425_v59 = vmul.f32 %v2423_v41, %v2423_v41  ;;  %v2426_v26 = vmul.f32 %v2424_v8, %v2424_v8  ;;  %v4918_v8 = vld [vmem:[#allocation7 + $0x70] sm:$0xff]  ;;  %v4911_v41 = vld [vmem:[#allocation7 + $0x38] sm:$0xff] }
 0x50c   :  { %3005 = vmatpush.bf16.msra.mxu2 %v4911_v41 }
 0x50d   :  { %v2427_v62 = vadd.f32 %v2426_v26, %v2425_v59  ;;  %v4917_v59 = vld [vmem:[#allocation7 + $0x68] sm:$0xff] }
 0x50f   :  { %v2428_v55 = vrot.slane %v2427_v62, 4 }
 0x510   :  { %3006 = vmatpush.bf16.msra.mxu2 %v4910_v46  ;;  %v4913_v46 = vld [vmem:[#allocation7 + $0x48] sm:$0xff] }
 0x511   :  { %v2429_v0 = vadd.f32 %v2428_v55, %v2427_v62  ;;  %v4919_v62 = vld [vmem:[#allocation7 + $0x78] sm:$0xff]  ;;  %v4916_v55 = vld [vmem:[#allocation7 + $0x60] sm:$0xff] }
 0x512   :  { %3019 = vmatpush.bf16.msra.mxu3 %v4919_v62  ;;  %v4914_v62 = vld [vmem:[#allocation7 + $0x50] sm:$0xff] }
 0x513   :  { %v2430_v6 = vrot.slane %v2429_v0, 2 }
 0x515   :  { %v2431_v47 = vadd.f32 %v2430_v6, %v2429_v0  ;;  %v4926_v0 = vld [vmem:[#allocation7 + $0xb0] sm:$0xff] }
 0x516   :  { %3020 = vmatpush.bf16.msra.mxu3 %v4918_v8  ;;  %v4924_v8 = vld [vmem:[#allocation7 + $0xa0] sm:$0xff] }
 0x517   :  { %v2432_v12 = vrot.slane %v2431_v47, 1 }
 0x519   :  { %v2433_v44 = vadd.f32 %v2432_v12, %v2431_v47 }
 0x51a   :  { %3021 = vmatpush.bf16.msra.mxu3 %v4917_v59 }
 0x51b   :  { %v2466_v52 = vand.u32 4294901760, %v2433_v44 }
 0x51d   :  { %2572 = vmatmul.f32.vlgmr.msrb.gmra.mxu1 %v2466_v52  ;;  %v2467_v61 = vsub.f32 %v2433_v44, %v2466_v52  ;;  %v4909_v44 = vld [vmem:[#allocation7 + $0x28] sm:$0xff] }
 0x51e   :  { %3055 = vmatpush.msrb.mxu1 %v5198_v3  ;;  %3022 = vmatpush.bf16.msra.mxu3 %v4916_v55 }
 0x51f   :  { %2626 = vmatmul.f32.vlgmr.msrb.gmra.mxu2 %v2467_v61  ;;  %v2468_v63 = vand.u32 4294901760, %v2467_v61 }
 0x520   :  { %3057 = vmatpush.msrb.mxu1 %v5200_v4  ;;  %3007 = vmatpush.bf16.msra.mxu2 %v4909_v44  ;;  %v4912_v44 = vld [vmem:[#allocation7 + $0x40] sm:$0xff] }
 0x521   :  { %2665 = vmatmul.f32.vlgmr.msrb.gmra.mxu3 %v2468_v63  ;;  %v2469_v56 = vsub.f32 %v2467_v61, %v2468_v63  ;;  %v4925_v61 = vld [vmem:[#allocation7 + $0xa8] sm:$0xff] }
 0x522   :  { %3059 = vmatpush.msrb.mxu1 %v5202_v5 }
 0x523   :  { %v2470_v26 = vand.u32 4294901760, %v2469_v56 }
 0x524   :  { %3061 = vmatpush.msrb.mxu1 %v5213_v9 }
 0x525   :  { %2471 = vmatmul.f32.vlgmr.msrb.gmra.mxu0 %v2470_v26  ;;  %2771 = vmatmul.f32.vlgmr.msra.gmra.mxu1 %v2466_v52  ;;  %v4908_v26 = vld [vmem:[#allocation7 + $0x20] sm:$0xff] }
 0x526   :  { %3063 = vmatpush.msrb.mxu1 %v5215_v10  ;;  %3033 = vmatpush.bf16.msrb.mxu0 %v4927_v60  ;;  %v4907_v60 = vld [vmem:[#allocation7 + $0x18] sm:$0xff] }
 0x527   :  { %3008 = vmatpush.bf16.msra.mxu2 %v4908_v26  ;;  %v4921_v26 = vld [vmem:[#allocation7 + $0x88] sm:$0xff] }
 0x528   :  { %3065 = vmatpush.msrb.mxu1 %v5217_v11 }
 0x52a   :  { %3067 = vmatpush.msrb.mxu1 %v5235_v17  ;;  %3034 = vmatpush.bf16.msrb.mxu0 %v4926_v0  ;;  %v4923_v0 = vld [vmem:[#allocation7 + $0x98] sm:$0xff] }
 0x52b   :  { %3009 = vmatpush.bf16.msra.mxu2 %v4907_v60 }
 0x52c   :  { %3069 = vmatpush.msrb.mxu1 %v5260_v25 }
 0x52d   :  { %2734 = vmatmul.f32.vlgmr.msra.gmra.mxu0 %v2466_v52  ;;  %v4915_v52 = vld [vmem:[#allocation7 + $0x58] sm:$0xff] }
 0x52e   :  { %3071 = vmatpush.msrb.mxu1 %v5269_v28  ;;  %3023 = vmatpush.bf16.msra.mxu3 %v4915_v52  ;;  %v4922_v52 = vld [vmem:[#allocation7 + $0x90] sm:$0xff] }
 0x52f   :  { %3035 = vmatpush.bf16.msrb.mxu0 %v4925_v61 }
 0x530   :  { %3073 = vmatpush.msrb.mxu1 %v5289_v35 }
 0x532   :  { %3075 = vmatpush.msrb.mxu1 %v5319_v45  ;;  %3024 = vmatpush.bf16.msra.mxu3 %v4914_v62  ;;  %v4904_v62 = vld [vmem:[#allocation7] sm:$0xff] }
 0x533   :  { %3036 = vmatpush.bf16.msrb.mxu0 %v4924_v8  ;;  %v4920_v8 = vld [vmem:[#allocation7 + $0x80] sm:$0xff] }
 0x534   :  { %3077 = vmatpush.msrb.mxu1 %v5327_v48 }
 0x536   :  { %3079 = vmatpush.msrb.mxu1 %v5345_v54  ;;  %3025 = vmatpush.bf16.msra.mxu3 %v4913_v46 }
 0x537   :  { %3037 = vmatpush.bf16.msrb.mxu0 %v4923_v0 }
 0x538   :  { %3081 = vmatpush.msrb.mxu1 %v5389_v2 }
 0x53a   :  { %3083 = vmatpush.msrb.mxu1 %v5408_v18  ;;  %3026 = vmatpush.bf16.msra.mxu3 %v4912_v44  ;;  %v6937_v44 = vld [vmem:[#allocation19_spill] sm:$0xff] }
 0x53b   :  { %3038 = vmatpush.bf16.msrb.mxu0 %v4922_v52 }
 0x53c   :  { %3085 = vmatpush.msrb.mxu1 %v5415_v31 }
 0x53e   :  { %3292 = vmatpush.msra.mxu1 %v5252_v22  ;;  %3198 = vmatpush.msrb.mxu3 %v5227_v14 }
 0x53f   :  { %3039 = vmatpush.bf16.msrb.mxu0 %v4921_v26 }
 0x540   :  { %3296 = vmatpush.msra.mxu1 %v5255_v23  ;;  %3201 = vmatpush.msrb.mxu3 %v5230_v15 }
 0x542   :  { %3300 = vmatpush.msra.mxu1 %v5258_v24  ;;  %3204 = vmatpush.msrb.mxu3 %v5233_v16 }
 0x543   :  { %3040 = vmatpush.bf16.msrb.mxu0 %v4920_v8  ;;  %v6940_v8 = vld [vmem:[#allocation15_spill] sm:$0xff] }
 0x544   :  { %3304 = vmatpush.msra.mxu1 %v5267_v27  ;;  %3207 = vmatpush.msrb.mxu3 %v5242_v19 }
 0x546   :  { %3308 = vmatpush.msra.mxu1 %v5283_v33  ;;  %3210 = vmatpush.msrb.mxu3 %v5245_v20 }
 0x547   :  { %3251 = vmatpush.msra.mxu0 %v5198_v3 }
 0x548   :  { %3312 = vmatpush.msra.mxu1 %v5287_v34  ;;  %3213 = vmatpush.msrb.mxu3 %v5248_v21 }
 0x549   :  { %3253 = vmatpush.msra.mxu0 %v5200_v4 }
 0x54a   :  { %3316 = vmatpush.msra.mxu1 %v5310_v42  ;;  %3216 = vmatpush.msrb.mxu3 %v5272_v29 }
 0x54b   :  { %3255 = vmatpush.msra.mxu0 %v5202_v5 }
 0x54c   :  { %3320 = vmatpush.msra.mxu1 %v5338_v51  ;;  %3219 = vmatpush.msrb.mxu3 %v6871_v40 }
 0x54d   :  { %3257 = vmatpush.msra.mxu0 %v5213_v9 }
 0x54e   :  { %3324 = vmatpush.msra.mxu1 %v5357_v57  ;;  %3222 = vmatpush.msrb.mxu3 %v6880_v53 }
 0x54f   :  { %3259 = vmatpush.msra.mxu0 %v5215_v10 }
 0x550   :  { %3328 = vmatpush.msra.mxu1 %v5387_v1 }
 0x551   :  { %3261 = vmatpush.msra.mxu0 %v5217_v11 }
 0x552   :  { %3332 = vmatpush.msra.mxu1 %v5406_v13 }
 0x553   :  { %3263 = vmatpush.msra.mxu0 %v5235_v17 }
 0x554   :  { %3336 = vmatpush.msra.mxu1 %v5413_v30 }
 0x555   :  { %3265 = vmatpush.msra.mxu0 %v5260_v25 }
 0x556   :  { %3340 = vmatpush.msra.mxu1 %v6927_v7 }
 0x557   :  { %3267 = vmatpush.msra.mxu0 %v5269_v28 }
 0x558   :  { %3344 = vmatpush.msra.mxu1 %v6928_v58 }
 0x559   :  { %3269 = vmatpush.msra.mxu0 %v5289_v35 }
 0x55a   :  { %3348 = vmatpush.msra.mxu1 %v6929_v50 }
 0x55b   :  { %3271 = vmatpush.msra.mxu0 %v5319_v45 }
 0x55c   :  { %3352 = vmatpush.msra.mxu1 %v6931_v32 }
 0x55d   :  { %3273 = vmatpush.msra.mxu0 %v5327_v48 }
 0x55f   :  { %3275 = vmatpush.msra.mxu0 %v5345_v54 }
 0x561   :  { %3277 = vmatpush.msra.mxu0 %v5389_v2 }
 0x563   :  { %3279 = vmatpush.msra.mxu0 %v5408_v18 }
 0x565   :  { %3281 = vmatpush.msra.mxu0 %v5415_v31 }
 0x59a   :  { %v2573_v6 = vpop.f32.mrf.mxu1 }
 0x5a2   :  { %v2472_v47 = vpop.f32.mrf.mxu0  ;;  %v2627_v63 = vpop.f32.mrf.mxu2 }
 0x5a3   :  { %v2574_v12 = vadd.f32 %v2573_v6, %v2472_v47  ;;  %v2772_v47 = vpop.f32.mrf.mxu1 }
 0x5a4   :  { %v2666_v41 = vpop.f32.mrf.mxu3 }
 0x5a5   :  { %v2628_v56 = vadd.f32 %v2627_v63, %v2574_v12  ;;  %v4906_v12 = vld [vmem:[#allocation7 + $0x10] sm:$0xff] }
 0x5a6   :  { %3010 = vmatpush.bf16.msra.mxu2 %v4906_v12 }
 0x5a7   :  { %v2667_v59 = vadd.f32 %v2666_v41, %v2628_v56  ;;  %v4905_v56 = vld [vmem:[#allocation7 + $0x8] sm:$0xff] }
 0x5aa   :  { %v2735_v55 = vpop.f32.mrf.mxu0  ;;  %3011 = vmatpush.bf16.msra.mxu2 %v4905_v56  ;;  %v6939_v56 = vld [vmem:[#allocation20_spill] sm:$0xff] }
 0x5ab   :  { %v2736_v6 = vadd.f32 %v2735_v55, %v2667_v59  ;;  %v6934_v55 = vld [vmem:[#allocation12_spill] sm:$0xff] }
 0x5ad   :  { %v2773_v32 = vadd.f32 %v2772_v47, %v2736_v6  ;;  %v2787_v6 = vld [vmem:[%s6724_s8] sm:$0x1] }
 0x5ae   :  { %3012 = vmatpush.bf16.msra.mxu2 %v4904_v62  ;;  %v6935_v47 = vld [vmem:[#allocation14_spill] sm:$0xff] }
 0x5af   :  { %v2775_v61 = vmul.f32 0.0078125, %v2773_v32 }
 0x5b1   :  { %v2776_v63 = vadd.f32 1e-05, %v2775_v61  ;;  %v6938_v61 = vld [vmem:[#allocation13_spill] sm:$0xff] }
 0x5b2   :  { %3100 = vmatpush.msrb.mxu2 %v5295_v37  ;;  %3225 = vmatpush.msrb.mxu3 %v6938_v61 }
 0x5b3   :  { %5002 = vrsqrt.f32 %v2776_v63  ;;  %vm2783_vm7 = vweird.f32 %v2776_v63 }
 0x5b4   :  { %3106 = vmatpush.msrb.mxu2 %v5298_v38  ;;  %3228 = vmatpush.msrb.mxu3 %v6940_v8 }
 0x5b6   :  { %3112 = vmatpush.msrb.mxu2 %v5315_v43 }
 0x5b8   :  { %3118 = vmatpush.msrb.mxu2 %v6934_v55 }
 0x5b9   :  { %v5003_v32 = vpop.eup %5002 }
 0x5ba   :  { %v2778_v41 = vmul.f32 %v5003_v32, %v2776_v63  ;;  %vm2784_vm6 = vweird.f32 %v5003_v32  ;;  %3124 = vmatpush.msrb.mxu2 %v6935_v47  ;;  %v2789_v63 = vld [vmem:[%s6725_s9] sm:$0x1] }
 0x5bb   :  { %vm2785_vm8 = vmor %vm2783_vm7, %vm2784_vm6 }
 0x5bc   :  { %v2779_v59 = vmul.f32 %v5003_v32, %v2778_v41  ;;  %3130 = vmatpush.msrb.mxu2 %v6937_v44 }
 0x5be   :  { %v2780_v60 = vmul.f32 0.5, %v2779_v59  ;;  %3136 = vmatpush.msrb.mxu2 %v6939_v56  ;;  %v6942_v59 = vld [vmem:[#allocation16_spill] sm:$0xff] }
 0x5bf   :  { %3231 = vmatpush.msrb.mxu3 %v6942_v59 }
 0x5c0   :  { %v2781_v46 = vsub.f32 1.5, %v2780_v60  ;;  %v6943_v60 = vld [vmem:[#allocation25_spill] sm:$0xff] }
 0x5c2   :  { %v2782_v0 = vmul.f32 %v5003_v32, %v2781_v46 }
 0x5c4   :  { %v6128_v12 = vsel %vm2785_vm8, %v5003_v32, %v2782_v0  ;;  %v6941_v32 = vld [vmem:[#allocation22_spill] sm:$0xff] }
 0x5c5   :  { %6936 = vst [vmem:[#allocation11_spill] sm:$0xff] %v6128_v12  ;;  %v2788_v52 = vmul.f32 %v2787_v6, %v6128_v12  ;;  %3142 = vmatpush.msrb.mxu2 %v6941_v32 }
 0x5c7   :  { %v2790_v26 = vmul.f32 %v2788_v52, %v6069_v39  ;;  %v2793_v62 = vperm.slane %v2788_v52, 0  ;;  %3148 = vmatpush.msrb.mxu2 %v6943_v60  ;;  %v6944_v52 = vld [vmem:[#allocation21_spill] sm:$0xff]  ;;  %v6945_v39 = vld [vmem:[#allocation27_spill] sm:$0xff] }
 0x5c8   :  { %3234 = vmatpush.msrb.mxu3 %v6944_v52 }
 0x5c9   :  { %v2791_v41 = vsub.f32 %v2789_v63, %v2790_v26  ;;  %v2795_v46 = vmul.f32 %v2793_v62, %v5999_v36  ;;  %v2796_v0 = vmul.f32 %v2793_v62, %v6001_v49  ;;  %3154 = vmatpush.msrb.mxu2 %v6945_v39  ;;  %v6946_v63 = vld [vmem:[#allocation23_spill] sm:$0xff]  ;;  %v6947_v26 = vld [vmem:[#allocation30_spill] sm:$0xff] }
 0x5ca   :  { %3237 = vmatpush.msrb.mxu3 %v6946_v63  ;;  %v6948_v62 = vld [vmem:[#allocation26_spill] sm:$0xff] }
 0x5cb   :  { %v2798_v6 = vperm.slane %v2791_v41, 0  ;;  %3160 = vmatpush.msrb.mxu2 %v6947_v26  ;;  %v6949_v41 = vld [vmem:[#allocation32_spill] sm:$0xff] }
 0x5cc   :  { %3240 = vmatpush.msrb.mxu3 %v6948_v62 }
 0x5cd   :  { %v2800_v12 = vadd.f32 %v2798_v6, %v2795_v46  ;;  %v2801_v50 = vadd.f32 %v2798_v6, %v2796_v0  ;;  %3166 = vmatpush.msrb.mxu2 %v6949_v41  ;;  %v6950_v46 = vld [vmem:[#allocation29_spill] sm:$0xff]  ;;  %v6951_v0 = vld [vmem:[#allocation34_spill] sm:$0xff] }
 0x5ce   :  { %3243 = vmatpush.msrb.mxu3 %v6950_v46 }
 0x5cf   :  { %v2802_v58 = vmax.f32 %v2800_v12, 0.0  ;;  %v2803_v7 = vmax.f32 %v2801_v50, 0.0  ;;  %3172 = vmatpush.msrb.mxu2 %v6951_v0  ;;  %v6952_v12 = vld [vmem:[#allocation35_spill] sm:$0xff]  ;;  %v6953_v50 = vld [vmem:[#allocation36_spill] sm:$0xff] }
 0x5d1   :  { %2804 = vst [vmem:[#allocation2 + $0x1] sm:$0xff] %v2802_v58  ;;  %v2811_v49 = vpack.c.bf16 %v2803_v7, %v2802_v58  ;;  %3178 = vmatpush.msrb.mxu2 %v6952_v12 }
 0x5d2   :  { %2805 = vst [vmem:[#allocation2 + $0x11] sm:$0xff] %v2803_v7  ;;  %v6954_v7 = vld [vmem:[#allocation37_spill] sm:$0xff] }
 0x5d3   :  { %3027 = vmatmul.bf16.vlgmr.msra.gmra.mxu3 %v2811_v49  ;;  %3184 = vmatpush.msrb.mxu2 %v6953_v50 }
 0x5d4   :  { %3409 = vmatpush.msra.mxu3 %v5198_v3 }
 0x5d5   :  { %3190 = vmatpush.msrb.mxu2 %v6954_v7 }
 0x5d6   :  { %3411 = vmatpush.msra.mxu3 %v5200_v4 }
 0x5d8   :  { %v2806_v58 = vld [vmem:[#allocation2] sm:$0xff]  ;;  %3413 = vmatpush.msra.mxu3 %v5202_v5 }
 0x5d9   :  { %v2808_v6 = vld [vmem:[#allocation2 + $0x2] sm:$0xff]  ;;  %v2807_v49 = vld [vmem:[#allocation2 + $0x10] sm:$0xff] }
 0x5da   :  { %v2809_v36 = vld [vmem:[#allocation2 + $0x12] sm:$0xff]  ;;  %v2810_v46 = vpack.c.bf16 %v2807_v49, %v2806_v58  ;;  %3415 = vmatpush.msra.mxu3 %v5213_v9 }
 0x5db   :  { %v2812_v62 = vpack.c.bf16 %v2809_v36, %v2808_v6 }
 0x5dc   :  { %3013 = vmatmul.bf16.vlgmr.msra.gmra.mxu2 %v2810_v46  ;;  %3417 = vmatpush.msra.mxu3 %v5215_v10 }
 0x5dd   :  { %3041 = vmatmul.bf16.vlgmr.msrb.gmra.mxu0 %v2812_v62  ;;  %3359 = vmatpush.msra.mxu2 %v5198_v3 }
 0x5de   :  { %3454 = vmatpush.msrb.mxu0 %v5295_v37  ;;  %3419 = vmatpush.msra.mxu3 %v5217_v11 }
 0x5df   :  { %3361 = vmatpush.msra.mxu2 %v5200_v4 }
 0x5e0   :  { %3460 = vmatpush.msrb.mxu0 %v5298_v38  ;;  %3421 = vmatpush.msra.mxu3 %v5235_v17 }
 0x5e1   :  { %3363 = vmatpush.msra.mxu2 %v5202_v5 }
 0x5e2   :  { %3466 = vmatpush.msrb.mxu0 %v5315_v43  ;;  %3423 = vmatpush.msra.mxu3 %v5260_v25 }
 0x5e3   :  { %3365 = vmatpush.msra.mxu2 %v5213_v9 }
 0x5e4   :  { %3472 = vmatpush.msrb.mxu0 %v6934_v55  ;;  %3425 = vmatpush.msra.mxu3 %v5269_v28 }
 0x5e5   :  { %3367 = vmatpush.msra.mxu2 %v5215_v10 }
 0x5e6   :  { %3478 = vmatpush.msrb.mxu0 %v6935_v47  ;;  %3427 = vmatpush.msra.mxu3 %v5289_v35 }
 0x5e7   :  { %3369 = vmatpush.msra.mxu2 %v5217_v11 }
 0x5e8   :  { %3484 = vmatpush.msrb.mxu0 %v6937_v44  ;;  %3429 = vmatpush.msra.mxu3 %v5319_v45 }
 0x5e9   :  { %3371 = vmatpush.msra.mxu2 %v5235_v17 }
 0x5ea   :  { %3490 = vmatpush.msrb.mxu0 %v6939_v56  ;;  %3431 = vmatpush.msra.mxu3 %v5327_v48 }
 0x5eb   :  { %3373 = vmatpush.msra.mxu2 %v5260_v25 }
 0x5ec   :  { %3496 = vmatpush.msrb.mxu0 %v6941_v32  ;;  %3433 = vmatpush.msra.mxu3 %v5345_v54 }
 0x5ed   :  { %3375 = vmatpush.msra.mxu2 %v5269_v28 }
 0x5ee   :  { %3502 = vmatpush.msrb.mxu0 %v6943_v60  ;;  %3435 = vmatpush.msra.mxu3 %v5389_v2 }
 0x5ef   :  { %3377 = vmatpush.msra.mxu2 %v5289_v35 }
 0x5f0   :  { %3508 = vmatpush.msrb.mxu0 %v6945_v39  ;;  %3437 = vmatpush.msra.mxu3 %v5408_v18 }
 0x5f1   :  { %3379 = vmatpush.msra.mxu2 %v5319_v45 }
 0x5f2   :  { %3514 = vmatpush.msrb.mxu0 %v6947_v26  ;;  %3439 = vmatpush.msra.mxu3 %v5415_v31 }
 0x5f3   :  { %3381 = vmatpush.msra.mxu2 %v5327_v48 }
 0x5f4   :  { %3520 = vmatpush.msrb.mxu0 %v6949_v41 }
 0x5f5   :  { %3383 = vmatpush.msra.mxu2 %v5345_v54 }
 0x5f6   :  { %3526 = vmatpush.msrb.mxu0 %v6951_v0 }
 0x5f7   :  { %3385 = vmatpush.msra.mxu2 %v5389_v2 }
 0x5f8   :  { %3532 = vmatpush.msrb.mxu0 %v6952_v12 }
 0x5f9   :  { %3387 = vmatpush.msra.mxu2 %v5408_v18 }
 0x5fa   :  { %3538 = vmatpush.msrb.mxu0 %v6953_v50 }
 0x5fb   :  { %3389 = vmatpush.msra.mxu2 %v5415_v31 }
 0x5fc   :  { %3544 = vmatpush.msrb.mxu0 %v6954_v7 }
 0x656   :  { %v3028_v37 = vpop.f32.mrf.mxu3 }
 0x65a   :  { %v3042_v38 = vpop.f32.mrf.mxu0 }
 0x65e   :  { %v3030_v39 = vpop.f32.mrf.mxu3 }
 0x65f   :  { %v3014_v43 = vpop.f32.mrf.mxu2 }
 0x660   :  { %v3029_v36 = vadd.f32 %v3028_v37, %v3014_v43 }
 0x662   :  { %v3044_v44 = vpop.f32.mrf.mxu0  ;;  %v6214_v56 = vadd.f32 %v3042_v38, %v3029_v36  ;;  %v3778_v36 = vld [vmem:[%s6729_s13] sm:$0x1] }
 0x667   :  { %v3016_v55 = vpop.f32.mrf.mxu2 }
 0x668   :  { %v3031_v47 = vadd.f32 %v3030_v39, %v3016_v55 }
 0x66a   :  { %v6216_v32 = vadd.f32 %v3044_v44, %v3031_v47  ;;  %v6961_v44 = vld [vmem:[#allocation11_spill] sm:$0xff] }
 0x66c   :  { %v3047_v60 = vadd.f32 %v6216_v32, %v6214_v56 }
 0x66e   :  { %v3048_v26 = vrot.slane %v3047_v60, 4 }
 0x670   :  { %v3049_v62 = vadd.f32 %v3048_v26, %v3047_v60  ;;  %v3779_v60 = vmul.f32 %v3778_v36, %v6961_v44 }
 0x672   :  { %v3050_v41 = vrot.slane %v3049_v62, 2 }
 0x674   :  { %v3051_v46 = vadd.f32 %v3050_v41, %v3049_v62  ;;  %v6962_v41 = vld [vmem:[#allocation18_spill] sm:$0xff] }
 0x676   :  { %v3052_v0 = vrot.slane %v3051_v46, 1 }
 0x678   :  { %v3053_v12 = vadd.f32 %v3052_v0, %v3051_v46  ;;  %v3781_v46 = vmul.f32 %v3779_v60, %v6962_v41  ;;  %v4939_v41 = vld [vmem:[%s6731_s15 + $0x54] sm:$0xf0] }
 0x67a   :  { %v3086_v50 = vand.u32 4294901760, %v3053_v12 }
 0x67c   :  { %3192 = vmatmul.f32.vlgmr.msrb.gmra.mxu2 %v3086_v50  ;;  %v3087_v58 = vsub.f32 %v3053_v12, %v3086_v50  ;;  %v3780_v12 = vld [vmem:[%s6730_s14] sm:$0x1] }
 0x67d   :  { %3605 = vmatpush.msrb.mxu2 %v5198_v3 }
 0x67e   :  { %3246 = vmatmul.f32.vlgmr.msrb.gmra.mxu3 %v3087_v58  ;;  %v3088_v6 = vand.u32 4294901760, %v3087_v58 }
 0x67f   :  { %3607 = vmatpush.msrb.mxu2 %v5200_v4  ;;  %3646 = vmatpush.msrb.mxu3 %v5252_v22  ;;  %v4955_v22 = vld [vmem:[%s6731_s15 + $0xd4] sm:$0xf0] }
 0x680   :  { %3285 = vmatmul.f32.vlgmr.msra.gmra.mxu0 %v3088_v6  ;;  %v3089_v7 = vsub.f32 %v3087_v58, %v3088_v6  ;;  %v3782_v58 = vsub.f32 %v3780_v12, %v3781_v46  ;;  %v4938_v46 = vld [vmem:[%s6731_s15 + $0x54] sm:$0xf]  ;;  %v4644_v12 = vld [vmem:[%s6731_s15 + $0x58] sm:$0xf0] }
 0x681   :  { %3609 = vmatpush.msrb.mxu2 %v5202_v5  ;;  %3713 = vmatpush.msra.mxu0 %v5198_v3  ;;  %v6955_v3 = vld [vmem:[#allocation24_spill] sm:$0xff] }
 0x682   :  { %v3090_v49 = vand.u32 4294901760, %v3089_v7  ;;  %3650 = vmatpush.msrb.mxu3 %v5255_v23  ;;  %v4958_v7 = vld [vmem:[%s6731_s15 + $0xf4] sm:$0xf] }
 0x683   :  { %3611 = vmatpush.msrb.mxu2 %v5213_v9  ;;  %3715 = vmatpush.msra.mxu0 %v5200_v4  ;;  %v6956_v4 = vld [vmem:[#allocation28_spill] sm:$0xff] }
 0x684   :  { %3091 = vmatmul.f32.vlgmr.msrb.gmra.mxu1 %v3090_v49  ;;  %3391 = vmatmul.f32.vlgmr.msra.gmra.mxu2 %v3086_v50  ;;  %v4724_v49 = vld [vmem:[%s6731_s15 + $0xf8] sm:$0xf0] }
 0x685   :  { %3613 = vmatpush.msrb.mxu2 %v5215_v10  ;;  %3552 = vmatpush.msrb.mxu1 %v5227_v14  ;;  %v4722_v14 = vld [vmem:[%s6731_s15 + $0xf0] sm:$0xf] }
 0x686   :  { %3717 = vmatpush.msra.mxu0 %v5202_v5  ;;  %3654 = vmatpush.msrb.mxu3 %v5258_v24  ;;  %v6957_v5 = vld [vmem:[#allocation31_spill] sm:$0xff]  ;;  %v4698_v24 = vld [vmem:[%s6731_s15 + $0xc0] sm:$0xf] }
 0x687   :  { %3615 = vmatpush.msrb.mxu2 %v5217_v11  ;;  %3555 = vmatpush.msrb.mxu1 %v5230_v15  ;;  %v4959_v15 = vld [vmem:[%s6731_s15 + $0xf4] sm:$0xf0] }
 0x688   :  { %3719 = vmatpush.msra.mxu0 %v5213_v9  ;;  %3658 = vmatpush.msrb.mxu3 %v5267_v27  ;;  %v6958_v9 = vld [vmem:[#allocation26_spill] sm:$0xff] }
 0x689   :  { %3617 = vmatpush.msrb.mxu2 %v5235_v17  ;;  %3558 = vmatpush.msrb.mxu1 %v5233_v16  ;;  %v4723_v16 = vor.u32 %v4959_v15, %v4722_v14  ;;  %v4716_v14 = vld [vmem:[%s6731_s15 + $0xe8] sm:$0xf0]  ;;  %v6963_v15 = vld [vmem:[#allocation10_spill] sm:$0xff] }
 0x68a   :  { %3721 = vmatpush.msra.mxu0 %v5215_v10  ;;  %3662 = vmatpush.msrb.mxu3 %v5283_v33  ;;  %v6959_v10 = vld [vmem:[#allocation33_spill] sm:$0xff] }
 0x68b   :  { %3619 = vmatpush.msrb.mxu2 %v5260_v25  ;;  %3561 = vmatpush.msrb.mxu1 %v5242_v19  ;;  %v4957_v19 = vld [vmem:[%s6731_s15 + $0xe4] sm:$0xf0] }
 0x68c   :  { %3354 = vmatmul.f32.vlgmr.msra.gmra.mxu1 %v3086_v50  ;;  %3723 = vmatpush.msra.mxu0 %v5217_v11  ;;  %v6960_v11 = vld [vmem:[#allocation29_spill] sm:$0xff] }
 0x68d   :  { %3621 = vmatpush.msrb.mxu2 %v5269_v28  ;;  %3564 = vmatpush.msrb.mxu1 %v5245_v20 }
 0x68e   :  { %3725 = vmatpush.msra.mxu0 %v5235_v17  ;;  %3666 = vmatpush.msrb.mxu3 %v5287_v34  ;;  %v4714_v17 = vld [vmem:[%s6731_s15 + $0xe0] sm:$0xf] }
 0x68f   :  { %3623 = vmatpush.msrb.mxu2 %v5289_v35  ;;  %3567 = vmatpush.msrb.mxu1 %v5248_v21  ;;  %v4715_v20 = vor.u32 %v4957_v19, %v4714_v17  ;;  %v4706_v21 = vld [vmem:[%s6731_s15 + $0xd0] sm:$0xf]  ;;  %v6964_v19 = vld [vmem:[#allocation17_spill] sm:$0xff] }
 0x690   :  { %3727 = vmatpush.msra.mxu0 %v5260_v25  ;;  %3670 = vmatpush.msrb.mxu3 %v5310_v42  ;;  %v4707_v23 = vor.u32 %v4955_v22, %v4706_v21  ;;  %v4953_v25 = vld [vmem:[%s6731_s15 + $0xc4] sm:$0xf0] }
 0x691   :  { %3625 = vmatpush.msrb.mxu2 %v5319_v45  ;;  %3570 = vmatpush.msrb.mxu1 %v5272_v29  ;;  %v4699_v27 = vor.u32 %v4953_v25, %v4698_v24  ;;  %v4951_v29 = vld [vmem:[%s6731_s15 + $0xb4] sm:$0xf0]  ;;  %v4954_v24 = vld [vmem:[%s6731_s15 + $0xd4] sm:$0xf]  ;;  %v4708_v25 = vld [vmem:[%s6731_s15 + $0xd8] sm:$0xf0] }
 0x692   :  { %3729 = vmatpush.msra.mxu0 %v5269_v28  ;;  %3674 = vmatpush.msrb.mxu3 %v5338_v51  ;;  %v4690_v28 = vld [vmem:[%s6731_s15 + $0xb0] sm:$0xf]  ;;  %v4682_v51 = vld [vmem:[%s6731_s15 + $0xa0] sm:$0xf] }
 0x693   :  { %3627 = vmatpush.msrb.mxu2 %v5327_v48  ;;  %3573 = vmatpush.msrb.mxu1 %v6871_v40  ;;  %v4691_v33 = vor.u32 %v4951_v29, %v4690_v28  ;;  %v4711_v29 = vor.u32 %v4954_v24, %v4708_v25 }
 0x694   :  { %3731 = vmatpush.msra.mxu0 %v5289_v35  ;;  %3678 = vmatpush.msrb.mxu3 %v5357_v57 }
 0x695   :  { %3629 = vmatpush.msrb.mxu2 %v5345_v54  ;;  %3576 = vmatpush.msrb.mxu1 %v6880_v53 }
 0x696   :  { %3733 = vmatpush.msra.mxu0 %v5319_v45  ;;  %3682 = vmatpush.msrb.mxu3 %v5387_v1 }
 0x697   :  { %3631 = vmatpush.msrb.mxu2 %v5389_v2  ;;  %3579 = vmatpush.msrb.mxu1 %v6938_v61 }
 0x698   :  { %3735 = vmatpush.msra.mxu0 %v5327_v48  ;;  %3686 = vmatpush.msrb.mxu3 %v5406_v13 }
 0x699   :  { %3633 = vmatpush.msrb.mxu2 %v5408_v18  ;;  %3582 = vmatpush.msrb.mxu1 %v6940_v8  ;;  %v4666_v8 = vld [vmem:[%s6731_s15 + $0x80] sm:$0xf] }
 0x69a   :  { %3737 = vmatpush.msra.mxu0 %v5345_v54  ;;  %3690 = vmatpush.msrb.mxu3 %v5413_v30  ;;  %v4949_v54 = vld [vmem:[%s6731_s15 + $0xa4] sm:$0xf0]  ;;  %v4947_v30 = vld [vmem:[%s6731_s15 + $0x94] sm:$0xf0] }
 0x69b   :  { %3635 = vmatpush.msrb.mxu2 %v5415_v31  ;;  %3585 = vmatpush.msrb.mxu1 %v6942_v59  ;;  %v4683_v57 = vor.u32 %v4949_v54, %v4682_v51  ;;  %v4945_v59 = vld [vmem:[%s6731_s15 + $0x84] sm:$0xf0]  ;;  %v4950_v54 = vld [vmem:[%s6731_s15 + $0xb4] sm:$0xf] }
 0x69c   :  { %3739 = vmatpush.msra.mxu0 %v5389_v2  ;;  %3694 = vmatpush.msrb.mxu3 %v6955_v3  ;;  %v3784_v3 = vperm.slane %v3779_v60, 0  ;;  %v4652_v60 = vld [vmem:[%s6731_s15 + $0x68] sm:$0xf0] }
 0x69d   :  { %3588 = vmatpush.msrb.mxu1 %v6944_v52  ;;  %4008 = vmatpush.bf16.msra.mxu2 %v4723_v16 }
 0x69e   :  { %3741 = vmatpush.msra.mxu0 %v5408_v18  ;;  %3698 = vmatpush.msrb.mxu3 %v6956_v4  ;;  %v4674_v18 = vld [vmem:[%s6731_s15 + $0x90] sm:$0xf]  ;;  %v3786_v16 = vmul.f32 %v3784_v3, %v6963_v15 }
 0x69f   :  { %3591 = vmatpush.msrb.mxu1 %v6946_v63  ;;  %v4675_v40 = vor.u32 %v4947_v30, %v4674_v18  ;;  %v4667_v63 = vor.u32 %v4945_v59, %v4666_v8  ;;  %v4946_v30 = vld [vmem:[%s6731_s15 + $0x94] sm:$0xf]  ;;  %v4658_v59 = vld [vmem:[%s6731_s15 + $0x70] sm:$0xf] }
 0x6a0   :  { %3743 = vmatpush.msra.mxu0 %v5415_v31  ;;  %3702 = vmatpush.msrb.mxu3 %v6957_v5  ;;  %v4727_v5 = vor.u32 %v4958_v7, %v4724_v49  ;;  %v4936_v7 = vld [vmem:[%s6731_s15 + $0x44] sm:$0xf] }
 0x6a1   :  { %3594 = vmatpush.msrb.mxu1 %v6958_v9  ;;  %4009 = vmatpush.bf16.msra.mxu2 %v4715_v20  ;;  %v3789_v9 = vperm.slane %v3782_v58, 0  ;;  %v3787_v20 = vmul.f32 %v3784_v3, %v6964_v19  ;;  %v4634_v58 = vld [vmem:[%s6731_s15 + $0x40] sm:$0xf]  ;;  %v4636_v3 = vld [vmem:[%s6731_s15 + $0x48] sm:$0xf0] }
 0x6a2   :  { %3706 = vmatpush.msrb.mxu3 %v6959_v10  ;;  %v4932_v19 = vld [vmem:[%s6731_s15 + $0x24] sm:$0xf] }
 0x6a3   :  { %3597 = vmatpush.msrb.mxu1 %v6960_v11  ;;  %v4956_v11 = vld [vmem:[%s6731_s15 + $0xe4] sm:$0xf]  ;;  %v3791_v22 = vadd.f32 %v3789_v9, %v3786_v16  ;;  %v4618_v16 = vld [vmem:[%s6731_s15 + $0x20] sm:$0xf] }
 0x6a4   :  { %v4719_v21 = vor.u32 %v4956_v11, %v4716_v14  ;;  %v4628_v14 = vld [vmem:[%s6731_s15 + $0x38] sm:$0xf0] }
 0x6a5   :  { %4010 = vmatpush.bf16.msra.mxu2 %v4707_v23 }
 0x6a9   :  { %4011 = vmatpush.bf16.msra.mxu2 %v4699_v27  ;;  %v3792_v27 = vadd.f32 %v3789_v9, %v3787_v20  ;;  %v4935_v9 = vld [vmem:[%s6731_s15 + $0x34] sm:$0xf0] }
 0x6ad   :  { %4012 = vmatpush.bf16.msra.mxu2 %v4691_v33  ;;  %v3793_v33 = vmax.f32 %v3791_v22, 0.0  ;;  %v4850_v22 = vld [vmem:[%s6732_s16 + $0xf0] sm:$0xf] }
 0x6b1   :  { %4013 = vmatpush.bf16.msra.mxu2 %v4683_v57  ;;  %v4692_v57 = vld [vmem:[%s6731_s15 + $0xb8] sm:$0xf0] }
 0x6b5   :  { %4014 = vmatpush.bf16.msra.mxu2 %v4675_v40 }
 0x6b9   :  { %4015 = vmatpush.bf16.msra.mxu2 %v4667_v63  ;;  %v4943_v63 = vld [vmem:[%s6731_s15 + $0x74] sm:$0xf0] }
 0x6fd   :  { %v3286_v1 = vpop.f32.mrf.mxu0 }
 0x6ff   :  { %v3193_v34 = vpop.f32.mrf.mxu2 }
 0x701   :  { %v3092_v35 = vpop.f32.mrf.mxu1  ;;  %v3247_v45 = vpop.f32.mrf.mxu3 }
 0x702   :  { %v3194_v42 = vadd.f32 %v3193_v34, %v3092_v35  ;;  %v3794_v35 = vmax.f32 %v3792_v27, 0.0  ;;  %v4990_v27 = vld [vmem:[%s6732_s16 + $0xf4] sm:$0xf] }
 0x704   :  { %v3248_v48 = vadd.f32 %v3247_v45, %v3194_v42  ;;  %v4952_v42 = vld [vmem:[%s6731_s15 + $0xc4] sm:$0xf]  ;;  %v4700_v45 = vld [vmem:[%s6731_s15 + $0xc8] sm:$0xf0]  ;;  %v3800_v51 = vpack.c.bf16 %v3794_v35, %v3793_v33  ;;  %v4610_v33 = vld [vmem:[%s6731_s15 + $0x10] sm:$0xf] }
 0x705   :  { %v4930_v35 = vld [vmem:[%s6731_s15 + $0x14] sm:$0xf] }
 0x706   :  { %v3287_v2 = vadd.f32 %v3286_v1, %v3248_v48  ;;  %v4703_v48 = vor.u32 %v4952_v42, %v4700_v45  ;;  %v4695_v1 = vor.u32 %v4950_v54, %v4692_v57  ;;  %v4612_v45 = vld [vmem:[%s6731_s15 + $0x18] sm:$0xf0] }
 0x707   :  { %v3392_v53 = vpop.f32.mrf.mxu2  ;;  %v4615_v54 = vor.u32 %v4930_v35, %v4612_v45  ;;  %v4969_v35 = vld [vmem:[%s6732_s16 + $0x44] sm:$0xf0] }
 0x709   :  { %v3355_v13 = vpop.f32.mrf.mxu1 }
 0x70a   :  { %v3356_v31 = vadd.f32 %v3355_v13, %v3287_v2  ;;  %v4948_v2 = vld [vmem:[%s6731_s15 + $0xa4] sm:$0xf]  ;;  %v4684_v13 = vld [vmem:[%s6731_s15 + $0xa8] sm:$0xf0] }
 0x70b   :  { %v4687_v18 = vor.u32 %v4948_v2, %v4684_v13  ;;  %v4844_v2 = vld [vmem:[%s6732_s16 + $0xe8] sm:$0xf0] }
 0x70c   :  { %v3393_v61 = vadd.f32 %v3392_v53, %v3356_v31  ;;  %v4676_v31 = vld [vmem:[%s6731_s15 + $0x98] sm:$0xf0]  ;;  %v4944_v53 = vld [vmem:[%s6731_s15 + $0x84] sm:$0xf] }
 0x70d   :  { %v4679_v40 = vor.u32 %v4946_v30, %v4676_v31  ;;  %v4929_v30 = vld [vmem:[%s6731_s15 + $0x4] sm:$0xf0]  ;;  %v4928_v31 = vld [vmem:[%s6731_s15 + $0x4] sm:$0xf] }
 0x70e   :  { %v6332_v52 = vmul.f32 0.0078125, %v3393_v61  ;;  %v4668_v61 = vld [vmem:[%s6731_s15 + $0x88] sm:$0xf0] }
 0x70f   :  { %v4671_v8 = vor.u32 %v4944_v53, %v4668_v61 }
 0x710   :  { %v3396_v37 = vperm.slane %v6332_v52, 0 }
 0x712   :  { %v3397_v38 = vsub.f32 %v6214_v56, %v3396_v37  ;;  %v3398_v43 = vsub.f32 %v6216_v32, %v3396_v37  ;;  %v4942_v37 = vld [vmem:[%s6731_s15 + $0x74] sm:$0xf] }
 0x714   :  { %v3399_v39 = vmul.f32 %v3397_v38, %v3397_v38  ;;  %v3400_v55 = vmul.f32 %v3398_v43, %v3398_v43  ;;  %v4659_v38 = vor.u32 %v4943_v63, %v4658_v59  ;;  %v4660_v43 = vld [vmem:[%s6731_s15 + $0x78] sm:$0xf0]  ;;  %v4786_v59 = vld [vmem:[%s6732_s16 + $0x70] sm:$0xf]  ;;  %v4975_v63 = vld [vmem:[%s6732_s16 + $0x74] sm:$0xf0] }
 0x715   :  { %v4663_v36 = vor.u32 %v4942_v37, %v4660_v43  ;;  %v4787_v43 = vor.u32 %v4975_v63, %v4786_v59  ;;  %v4967_v59 = vld [vmem:[%s6732_s16 + $0x34] sm:$0xf0]  ;;  %v4802_v63 = vld [vmem:[%s6732_s16 + $0x90] sm:$0xf] }
 0x716   :  { %v3401_v47 = vadd.f32 %v3400_v55, %v3399_v39  ;;  %3994 = vmatpush.bf16.msra.mxu1 %v4659_v38  ;;  %v4650_v39 = vld [vmem:[%s6731_s15 + $0x60] sm:$0xf]  ;;  %v4941_v55 = vld [vmem:[%s6731_s15 + $0x64] sm:$0xf0] }
 0x717   :  { %v4651_v44 = vor.u32 %v4941_v55, %v4650_v39  ;;  %v4987_v39 = vld [vmem:[%s6732_s16 + $0xd4] sm:$0xf0]  ;;  %v4974_v55 = vld [vmem:[%s6732_s16 + $0x74] sm:$0xf] }
 0x718   :  { %v3402_v26 = vrot.slane %v3401_v47, 4 }
 0x71a   :  { %v3403_v62 = vadd.f32 %v3402_v26, %v3401_v47  ;;  %v4940_v47 = vld [vmem:[%s6731_s15 + $0x64] sm:$0xf]  ;;  %3995 = vmatpush.bf16.msra.mxu1 %v4651_v44 }
 0x71b   :  { %v4655_v26 = vor.u32 %v4940_v47, %v4652_v60  ;;  %v4788_v60 = vld [vmem:[%s6732_s16 + $0x78] sm:$0xf0] }
 0x71c   :  { %v3404_v0 = vrot.slane %v3403_v62, 2 }
 0x71e   :  { %v3405_v50 = vadd.f32 %v3404_v0, %v3403_v62  ;;  %v4642_v62 = vld [vmem:[%s6731_s15 + $0x50] sm:$0xf] }
 0x71f   :  { %v4643_v0 = vor.u32 %v4939_v41, %v4642_v62  ;;  %v4791_v41 = vor.u32 %v4974_v55, %v4788_v60  ;;  %v4746_v60 = vld [vmem:[%s6732_s16 + $0x20] sm:$0xf] }
 0x720   :  { %v3406_v6 = vrot.slane %v3405_v50, 1 }
 0x721   :  { %3996 = vmatpush.bf16.msra.mxu1 %v4643_v0 }
 0x722   :  { %v3407_v4 = vadd.f32 %v3406_v6, %v3405_v50  ;;  %v4647_v50 = vor.u32 %v4938_v46, %v4644_v12  ;;  %v4937_v6 = vld [vmem:[%s6731_s15 + $0x44] sm:$0xf0]  ;;  %v4836_v46 = vld [vmem:[%s6732_s16 + $0xd8] sm:$0xf0]  ;;  %v4778_v12 = vld [vmem:[%s6732_s16 + $0x60] sm:$0xf] }
 0x723   :  { %v4635_v49 = vor.u32 %v4937_v6, %v4634_v58  ;;  %v4826_v58 = vld [vmem:[%s6732_s16 + $0xc0] sm:$0xf] }
 0x724   :  { %v3440_v10 = vand.u32 4294901760, %v3407_v4 }
 0x725   :  { %3997 = vmatpush.bf16.msra.mxu1 %v4635_v49  ;;  %v4972_v49 = vld [vmem:[%s6732_s16 + $0x64] sm:$0xf] }
 0x726   :  { %3546 = vmatmul.f32.vlgmr.msrb.gmra.mxu0 %v3440_v10  ;;  %v3441_v17 = vsub.f32 %v3407_v4, %v3440_v10  ;;  %v4639_v4 = vor.u32 %v4936_v7, %v4636_v3  ;;  %v4985_v7 = vld [vmem:[%s6732_s16 + $0xc4] sm:$0xf0]  ;;  %v4780_v3 = vld [vmem:[%s6732_s16 + $0x68] sm:$0xf0] }
 0x727   :  { %4036 = vmatpush.bf16.msrb.mxu0 %v4727_v5  ;;  %v4626_v5 = vld [vmem:[%s6731_s15 + $0x30] sm:$0xf] }
 0x728   :  { %3600 = vmatmul.f32.vlgmr.msrb.gmra.mxu1 %v3441_v17  ;;  %v3442_v23 = vand.u32 4294901760, %v3441_v17  ;;  %v4627_v11 = vor.u32 %v4935_v9, %v4626_v5  ;;  %v4827_v5 = vor.u32 %v4985_v7, %v4826_v58  ;;  %v4783_v9 = vor.u32 %v4972_v49, %v4780_v3  ;;  %v4748_v58 = vld [vmem:[%s6732_s16 + $0x28] sm:$0xf0] }
 0x729   :  { %v4796_v49 = vld [vmem:[%s6732_s16 + $0x88] sm:$0xf0] }
 0x72a   :  { %3639 = vmatmul.f32.vlgmr.msrb.gmra.mxu2 %v3442_v23  ;;  %v3443_v28 = vsub.f32 %v3441_v17, %v3442_v23  ;;  %3998 = vmatpush.bf16.msra.mxu1 %v4627_v11  ;;  %v4933_v17 = vld [vmem:[%s6731_s15 + $0x24] sm:$0xf0]  ;;  %v4991_v23 = vld [vmem:[%s6732_s16 + $0xf4] sm:$0xf0]  ;;  %v4828_v11 = vld [vmem:[%s6732_s16 + $0xc8] sm:$0xf0] }
 0x72b   :  { %4037 = vmatpush.bf16.msrb.mxu0 %v4719_v21  ;;  %v4619_v20 = vor.u32 %v4933_v17, %v4618_v16  ;;  %v4620_v21 = vld [vmem:[%s6731_s15 + $0x28] sm:$0xf0]  ;;  %v4851_v25 = vor.u32 %v4991_v23, %v4850_v22  ;;  %v4971_v17 = vld [vmem:[%s6732_s16 + $0x54] sm:$0xf0] }
 0x72c   :  { %v3444_v34 = vand.u32 4294901760, %v3443_v28  ;;  %v4623_v24 = vor.u32 %v4932_v19, %v4620_v21  ;;  %v4852_v28 = vld [vmem:[%s6732_s16 + $0xf8] sm:$0xf0]  ;;  %v4818_v19 = vld [vmem:[%s6732_s16 + $0xb0] sm:$0xf] }
 0x72d   :  { %4256 = vmatpush.bf16.msrb.mxu2 %v4851_v25  ;;  %v4772_v25 = vld [vmem:[%s6732_s16 + $0x58] sm:$0xf0] }
 0x72e   :  { %3445 = vmatmul.f32.vlgmr.msra.gmra.mxu3 %v3444_v34  ;;  %3745 = vmatmul.f32.vlgmr.msra.gmra.mxu0 %v3440_v10  ;;  %v4931_v34 = vld [vmem:[%s6731_s15 + $0x14] sm:$0xf0] }
 0x72f   :  { %4038 = vmatpush.bf16.msrb.mxu0 %v4711_v29  ;;  %4022 = vmatpush.bf16.msra.mxu3 %v4663_v36  ;;  %v4855_v29 = vor.u32 %v4990_v27, %v4852_v28  ;;  %v4611_v42 = vor.u32 %v4931_v34, %v4610_v33  ;;  %v4834_v36 = vld [vmem:[%s6732_s16 + $0xd0] sm:$0xf]  ;;  %v4982_v27 = vld [vmem:[%s6732_s16 + $0xb4] sm:$0xf]  ;;  %v4820_v33 = vld [vmem:[%s6732_s16 + $0xb8] sm:$0xf0] }
 0x730   :  { %3999 = vmatpush.bf16.msra.mxu1 %v4619_v20  ;;  %v4835_v44 = vor.u32 %v4987_v39, %v4834_v36  ;;  %v4983_v20 = vld [vmem:[%s6732_s16 + $0xb4] sm:$0xf0]  ;;  %v4762_v34 = vld [vmem:[%s6732_s16 + $0x40] sm:$0xf]  ;;  %v4823_v45 = vor.u32 %v4982_v27, %v4820_v33  ;;  %v4756_v36 = vld [vmem:[%s6732_s16 + $0x38] sm:$0xf0] }
 0x731   :  { %v4819_v23 = vor.u32 %v4983_v20, %v4818_v19  ;;  %v4730_v19 = vld [vmem:[%s6732_s16] sm:$0xf]  ;;  %v4961_v20 = vld [vmem:[%s6732_s16 + $0x4] sm:$0xf0] }
 0x732   :  { %4016 = vmatmul.bf16.vlgmr.msra.gmra.mxu2 %v3800_v51 }
 0x733   :  { %4039 = vmatpush.bf16.msrb.mxu0 %v4703_v48  ;;  %4023 = vmatpush.bf16.msra.mxu3 %v4655_v26  ;;  %v4842_v48 = vld [vmem:[%s6732_s16 + $0xe0] sm:$0xf]  ;;  %v4986_v26 = vld [vmem:[%s6732_s16 + $0xd4] sm:$0xf] }
 0x734   :  { %4000 = vmatpush.bf16.msra.mxu1 %v4611_v42  ;;  %v4839_v0 = vor.u32 %v4986_v26, %v4836_v46  ;;  %v4977_v46 = vld [vmem:[%s6732_s16 + $0x84] sm:$0xf0] }
 0x736   :  { %3708 = vmatmul.f32.vlgmr.msrb.gmra.mxu3 %v3440_v10  ;;  %v4934_v10 = vld [vmem:[%s6731_s15 + $0x34] sm:$0xf] }
 0x737   :  { %4040 = vmatpush.bf16.msrb.mxu0 %v4695_v1  ;;  %4024 = vmatpush.bf16.msra.mxu3 %v4647_v50  ;;  %v4631_v15 = vor.u32 %v4934_v10, %v4628_v14  ;;  %v4988_v1 = vld [vmem:[%s6732_s16 + $0xe4] sm:$0xf]  ;;  %v4973_v50 = vld [vmem:[%s6732_s16 + $0x64] sm:$0xf0]  ;;  %v4770_v14 = vld [vmem:[%s6732_s16 + $0x50] sm:$0xf] }
 0x738   :  { %v4847_v13 = vor.u32 %v4988_v1, %v4844_v2  ;;  %v4779_v6 = vor.u32 %v4973_v50, %v4778_v12  ;;  %v4984_v10 = vld [vmem:[%s6732_s16 + $0xc4] sm:$0xf]  ;;  %v4771_v22 = vor.u32 %v4971_v17, %v4770_v14  ;;  %v4763_v1 = vor.u32 %v4969_v35, %v4762_v34  ;;  %v4764_v2 = vld [vmem:[%s6732_s16 + $0x48] sm:$0xf0]  ;;  %v3763_v35 = vld [vmem:[%s6728_s12] sm:$0x1] }
 0x739   :  { %v4831_v16 = vor.u32 %v4984_v10, %v4828_v11  ;;  %v4964_v50 = vld [vmem:[%s6732_s16 + $0x24] sm:$0xf]  ;;  %v4963_v10 = vld [vmem:[%s6732_s16 + $0x14] sm:$0xf0]  ;;  %v4962_v11 = vld [vmem:[%s6732_s16 + $0x14] sm:$0xf] }
 0x73a   :  { %v4751_v7 = vor.u32 %v4964_v50, %v4748_v58 }
 0x73b   :  { %4041 = vmatpush.bf16.msrb.mxu0 %v4687_v18  ;;  %4025 = vmatpush.bf16.msra.mxu3 %v4639_v4  ;;  %v4602_v18 = vld [vmem:[%s6731_s15] sm:$0xf] }
 0x73c   :  { %v4603_v61 = vor.u32 %v4929_v30, %v4602_v18  ;;  %v4812_v18 = vld [vmem:[%s6732_s16 + $0xa8] sm:$0xf0] }
 0x73e   :  { %4001 = vmatpush.bf16.msra.mxu1 %v4603_v61 }
 0x73f   :  { %4042 = vmatpush.bf16.msrb.mxu0 %v4679_v40  ;;  %4026 = vmatpush.bf16.msra.mxu3 %v4631_v15 }
 0x742   :  { %4242 = vmatpush.bf16.msrb.mxu1 %v4787_v43  ;;  %v4966_v43 = vld [vmem:[%s6732_s16 + $0x34] sm:$0xf] }
 0x743   :  { %4043 = vmatpush.bf16.msrb.mxu0 %v4671_v8  ;;  %4027 = vmatpush.bf16.msra.mxu3 %v4623_v24  ;;  %v4604_v8 = vld [vmem:[%s6731_s15 + $0x8] sm:$0xf0]  ;;  %v4970_v24 = vld [vmem:[%s6732_s16 + $0x54] sm:$0xf]  ;;  %v4759_v55 = vor.u32 %v4966_v43, %v4756_v36 }
 0x744   :  { %v4607_v38 = vor.u32 %v4928_v31, %v4604_v8  ;;  %v4754_v8 = vld [vmem:[%s6732_s16 + $0x30] sm:$0xf] }
 0x746   :  { %4044 = vmatmul.bf16.vlgmr.msrb.gmra.mxu0 %v3800_v51  ;;  %v4989_v51 = vld [vmem:[%s6732_s16 + $0xe4] sm:$0xf0]  ;;  %4243 = vmatpush.bf16.msrb.mxu1 %v4779_v6  ;;  %v4976_v6 = vld [vmem:[%s6732_s16 + $0x84] sm:$0xf] }
 0x747   :  { %4284 = vmatpush.bf16.msra.mxu0 %v4855_v29  ;;  %v4843_v57 = vor.u32 %v4989_v51, %v4842_v48  ;;  %4028 = vmatpush.bf16.msra.mxu3 %v4615_v54  ;;  %v4775_v29 = vor.u32 %v4970_v24, %v4772_v25  ;;  %v4810_v48 = vld [vmem:[%s6732_s16 + $0xa0] sm:$0xf]  ;;  %v4981_v51 = vld [vmem:[%s6732_s16 + $0xa4] sm:$0xf0]  ;;  %v4968_v54 = vld [vmem:[%s6732_s16 + $0x44] sm:$0xf]  ;;  %v4799_v3 = vor.u32 %v4976_v6, %v4796_v49 }
 0x748   :  { %v4811_v30 = vor.u32 %v4981_v51, %v4810_v48 }
 0x749   :  { %4257 = vmatpush.bf16.msrb.mxu2 %v4843_v57 }
 0x74a   :  { %4244 = vmatpush.bf16.msrb.mxu1 %v4771_v22  ;;  %v4731_v22 = vor.u32 %v4961_v20, %v4730_v19 }
 0x74b   :  { %4285 = vmatpush.bf16.msra.mxu0 %v4847_v13  ;;  %4029 = vmatpush.bf16.msra.mxu3 %v4607_v38  ;;  %v4980_v13 = vld [vmem:[%s6732_s16 + $0xa4] sm:$0xf]  ;;  %v4979_v38 = vld [vmem:[%s6732_s16 + $0x94] sm:$0xf0] }
 0x74c   :  { %v4803_v39 = vor.u32 %v4979_v38, %v4802_v63 }
 0x74d   :  { %4258 = vmatpush.bf16.msrb.mxu2 %v4835_v44  ;;  %v4804_v44 = vld [vmem:[%s6732_s16 + $0x98] sm:$0xf0] }
 0x74e   :  { %4245 = vmatpush.bf16.msrb.mxu1 %v4763_v1 }
 0x74f   :  { %4270 = vmatpush.bf16.msrb.mxu3 %v4791_v41  ;;  %4286 = vmatpush.bf16.msra.mxu0 %v4839_v0  ;;  %v4794_v41 = vld [vmem:[%s6732_s16 + $0x80] sm:$0xf] }
 0x750   :  { %v4795_v12 = vor.u32 %v4977_v46, %v4794_v41 }
 0x751   :  { %4259 = vmatpush.bf16.msrb.mxu2 %v4827_v5 }
 0x753   :  { %4271 = vmatpush.bf16.msrb.mxu3 %v4783_v9  ;;  %4287 = vmatpush.bf16.msra.mxu0 %v4831_v16  ;;  %v4738_v9 = vld [vmem:[%s6732_s16 + $0x10] sm:$0xf] }
 0x754   :  { %v4739_v14 = vor.u32 %v4963_v10, %v4738_v9 }
 0x755   :  { %4260 = vmatpush.bf16.msrb.mxu2 %v4819_v23  ;;  %v4732_v23 = vld [vmem:[%s6732_s16 + $0x8] sm:$0xf0] }
 0x757   :  { %4272 = vmatpush.bf16.msrb.mxu3 %v4775_v29  ;;  %4288 = vmatpush.bf16.msra.mxu0 %v4823_v45  ;;  %v3761_v29 = vld [vmem:[%s6727_s11] sm:$0x1] }
 0x759   :  { %4261 = vmatpush.bf16.msrb.mxu2 %v4811_v30 }
 0x75d   :  { %4262 = vmatpush.bf16.msrb.mxu2 %v4803_v39 }
 0x761   :  { %4263 = vmatpush.bf16.msrb.mxu2 %v4795_v12 }
 0x7a3   :  { %v3547_v40 = vpop.f32.mrf.mxu0 }
 0x7a5   :  { %v3601_v47 = vpop.f32.mrf.mxu1 }
 0x7ab   :  { %v3746_v42 = vpop.f32.mrf.mxu0 }
 0x7ad   :  { %v3640_v4 = vpop.f32.mrf.mxu2 }
 0x7b1   :  { %v3446_v53 = vpop.f32.mrf.mxu3 }
 0x7b2   :  { %v3548_v37 = vadd.f32 %v3547_v40, %v3446_v53  ;;  %v4767_v40 = vor.u32 %v4968_v54, %v4764_v2  ;;  %v4815_v53 = vor.u32 %v4980_v13, %v4812_v18 }
 0x7b4   :  { %v3602_v62 = vadd.f32 %v3601_v47, %v3548_v37  ;;  %4273 = vmatpush.bf16.msrb.mxu3 %v4767_v40  ;;  %v4755_v37 = vor.u32 %v4967_v59, %v4754_v8  ;;  %4289 = vmatpush.bf16.msra.mxu0 %v4815_v53  ;;  %v4978_v47 = vld [vmem:[%s6732_s16 + $0x94] sm:$0xf] }
 0x7b5   :  { %v4807_v26 = vor.u32 %v4978_v47, %v4804_v44 }
 0x7b6   :  { %v3641_v15 = vadd.f32 %v3640_v4, %v3602_v62  ;;  %4246 = vmatpush.bf16.msrb.mxu1 %v4755_v37  ;;  %v4965_v62 = vld [vmem:[%s6732_s16 + $0x24] sm:$0xf0] }
 0x7b7   :  { %v4747_v0 = vor.u32 %v4965_v62, %v4746_v60 }
 0x7b8   :  { %4274 = vmatpush.bf16.msrb.mxu3 %v4759_v55  ;;  %4290 = vmatpush.bf16.msra.mxu0 %v4807_v26 }
 0x7b9   :  { %v3709_v21 = vpop.f32.mrf.mxu3 }
 0x7ba   :  { %v3710_v28 = vadd.f32 %v3709_v21, %v3641_v15  ;;  %4247 = vmatpush.bf16.msrb.mxu1 %v4747_v0  ;;  %v4740_v15 = vld [vmem:[%s6732_s16 + $0x18] sm:$0xf0]  ;;  %v4960_v21 = vld [vmem:[%s6732_s16 + $0x4] sm:$0xf] }
 0x7bb   :  { %v4743_v17 = vor.u32 %v4962_v11, %v4740_v15  ;;  %v4735_v25 = vor.u32 %v4960_v21, %v4732_v23 }
 0x7bc   :  { %v3747_v57 = vadd.f32 %v3746_v42, %v3710_v28  ;;  %4275 = vmatpush.bf16.msrb.mxu3 %v4751_v7  ;;  %4291 = vmatpush.bf16.msra.mxu0 %v4799_v3 }
 0x7be   :  { %v3749_v31 = vmul.f32 0.0078125, %v3747_v57  ;;  %4248 = vmatpush.bf16.msrb.mxu1 %v4739_v14 }
 0x7c0   :  { %v3750_v61 = vadd.f32 1e-05, %v3749_v31  ;;  %4276 = vmatpush.bf16.msrb.mxu3 %v4743_v17 }
 0x7c2   :  { %5004 = vrsqrt.f32 %v3750_v61  ;;  %4249 = vmatpush.bf16.msrb.mxu1 %v4731_v22  ;;  %vm3757_vm10 = vweird.f32 %v3750_v61 }
 0x7c4   :  { %4277 = vmatpush.bf16.msrb.mxu3 %v4735_v25 }
 0x7c8   :  { %v5005_v4 = vpop.eup %5004 }
 0x7c9   :  { %v3752_v5 = vmul.f32 %v5005_v4, %v3750_v61  ;;  %vm3758_vm9 = vweird.f32 %v5005_v4  ;;  %v4045_v61 = vpop.f32.mrf.mxu0 }
 0x7ca   :  { %vm3759_vm11 = vmor %vm3757_vm10, %vm3758_vm9 }
 0x7cb   :  { %v3753_v16 = vmul.f32 %v5005_v4, %v3752_v5 }
 0x7cd   :  { %v3754_v24 = vmul.f32 0.5, %v3753_v16 }
 0x7cf   :  { %v3755_v27 = vsub.f32 1.5, %v3754_v24 }
 0x7d1   :  { %v3756_v28 = vmul.f32 %v5005_v4, %v3755_v27  ;;  %v4047_v43 = vpop.f32.mrf.mxu0 }
 0x7d3   :  { %v3760_v33 = vsel %vm3759_vm11, %v5005_v4, %v3756_v28 }
 0x7d4   :  { %v3762_v34 = vmul.f32 %v3761_v29, %v3760_v33 }
 0x7d6   :  { %v3764_v42 = vmul.f32 %v3762_v34, %v6332_v52  ;;  %v3767_v45 = vperm.slane %v3762_v34, 0 }
 0x7d8   :  { %v3765_v48 = vsub.f32 %v3763_v35, %v3764_v42  ;;  %v3769_v51 = vmul.f32 %v3767_v45, %v6214_v56  ;;  %v3770_v54 = vmul.f32 %v3767_v45, %v6216_v32  ;;  %v4017_v56 = vpop.f32.mrf.mxu2 }
 0x7da   :  { %v3772_v57 = vperm.slane %v3765_v48, 0 }
 0x7dc   :  { %v3774_v1 = vadd.f32 %v3772_v57, %v3769_v51  ;;  %v3775_v2 = vadd.f32 %v3772_v57, %v3770_v54 }
 0x7de   :  { %v3776_v13 = vmax.f32 %v3774_v1, 0.0  ;;  %v3777_v18 = vmax.f32 %v3775_v2, 0.0 }
 0x7e0   :  { %v3799_v30 = vpack.c.bf16 %v3777_v18, %v3776_v13  ;;  %3795 = vst [vmem:[#allocation2 + $0x1] sm:$0xff] %v3776_v13  ;;  %v4019_v59 = vpop.f32.mrf.mxu2 }
 0x7e1   :  { %3796 = vst [vmem:[#allocation2 + $0x11] sm:$0xff] %v3777_v18 }
 0x7e2   :  { %4002 = vmatmul.bf16.vlgmr.msra.gmra.mxu1 %v3799_v30  ;;  %4030 = vmatmul.bf16.vlgmr.msra.gmra.mxu3 %v3799_v30 }
 0x7e7   :  { %v3797_v31 = vld [vmem:[#allocation2 + $0x2] sm:$0xff] }
 0x7e8   :  { %v3798_v40 = vld [vmem:[#allocation2 + $0x12] sm:$0xff] }
 0x7e9   :  { %v3801_v53 = vpack.c.bf16 %v3798_v40, %v3797_v31 }
 0x7eb   :  { %4264 = vmatmul.bf16.vlgmr.msrb.gmra.mxu2 %v3801_v53  ;;  %4292 = vmatmul.bf16.vlgmr.msra.gmra.mxu0 %v3801_v53 }
 0x7f2   :  { %4250 = vmatmul.bf16.vlgmr.msrb.gmra.mxu1 %v3799_v30  ;;  %4278 = vmatmul.bf16.vlgmr.msrb.gmra.mxu3 %v3799_v30 }
 0x85f   :  { %v4003_v52 = vpop.f32.mrf.mxu1 }
 0x860   :  { %v4018_v32 = vadd.f32 %v4017_v56, %v4003_v52 }
 0x862   :  { %4298 = vst [vmem:[%s6733_s17] sm:$0xff] %v4018_v32 }
 0x865   :  { %v4031_v8 = vpop.f32.mrf.mxu3 }
 0x866   :  { %v4046_v63 = vadd.f32 %v4045_v61, %v4031_v8 }
 0x867   :  { %v4005_v37 = vpop.f32.mrf.mxu1 }
 0x868   :  { %4299 = vst [vmem:[%s6733_s17 + $0x8] sm:$0xff] %v4046_v63  ;;  %v4020_v38 = vadd.f32 %v4019_v59, %v4005_v37  ;;  %v4293_v60 = vpop.f32.mrf.mxu0 }
 0x86a   :  { %4300 = vst [vmem:[%s6733_s17 + $0x20] sm:$0xff] %v4020_v38 }
 0x86d   :  { %v4033_v36 = vpop.f32.mrf.mxu3 }
 0x86e   :  { %v4048_v39 = vadd.f32 %v4047_v43, %v4033_v36  ;;  %v4265_v55 = vpop.f32.mrf.mxu2 }
 0x86f   :  { %v4251_v47 = vpop.f32.mrf.mxu1 }
 0x870   :  { %4301 = vst [vmem:[%s6733_s17 + $0x28] sm:$0xff] %v4048_v39  ;;  %v4266_v44 = vadd.f32 %v4265_v55, %v4251_v47  ;;  %v4295_v12 = vpop.f32.mrf.mxu0 }
 0x872   :  { %4302 = vst [vmem:[%s6733_s17 + $0x10] sm:$0xff] %v4266_v44 }
 0x875   :  { %v4279_v26 = vpop.f32.mrf.mxu3 }
 0x876   :  { %v4294_v62 = vadd.f32 %v4293_v60, %v4279_v26  ;;  %v4267_v41 = vpop.f32.mrf.mxu2 }
 0x877   :  { %v4253_v46 = vpop.f32.mrf.mxu1 }
 0x878   :  { %4303 = vst [vmem:[%s6733_s17 + $0x18] sm:$0xff] %v4294_v62  ;;  %v4268_v0 = vadd.f32 %v4267_v41, %v4253_v46 }
 0x87a   :  { %4304 = vst [vmem:[%s6733_s17 + $0x30] sm:$0xff] %v4268_v0 }
 0x87d   :  { %v4281_v50 = vpop.f32.mrf.mxu3 }
 0x87e   :  { %v4296_v58 = vadd.f32 %v4295_v12, %v4281_v50 }
 0x880   :  { %4305 = vst [vmem:[%s6733_s17 + $0x38] sm:$0xff] %v4296_v58 }
 0x881   :  { %4310 = vsyncpa [#allocation4], 1 }
 0x882   :  { %4311 = vsyncpa [#allocation6], 1 }

</bundles_post_ra>
